<compile_context>
chip_gen: v5e
topology: v5e:2x2
jax: 0.10.0
libtpu: 0.0.40
codegen_flags: <defaults>
</compile_context>

<pallas_src>
from functools import partial

import jax
import jax.numpy as jnp
from jax import lax
from jax.experimental import pallas as pl
from jax.experimental.pallas import tpu as pltpu

SELU_ALPHA = 1.6732632423543772
SELU_SCALE = 1.0507009873554805
BN_EPS = 1e-5


def _cdiv(a, b):
    return -(-a // b)


# ----------------------------------------------------------------------------- kernel
def _htrg_gat_kernel(n1, n2, din, dout,
                     x1_ref, x2_ref, w12_ref, wap2_ref, wboth_ref, vd_ref, vi_ref,
                     o_ref):
    n = n1 + n2
    bb = x1_ref.shape[0]
    f32 = jnp.float32
    mmdt = w12_ref.dtype      # bf16 when din/dout are production sized, else f32

    # ---- parameter slabs (static, aligned slices) ----
    w12 = w12_ref[...]                               # (din, 2*din)   = [W1 | W2]
    wap2 = wap2_ref[...]                             # (2*din, dout)  = [Wap ; WapM]
    wap, wapm = wap2[0:din, :], wap2[din:2 * din, :]
    wboth = wboth_ref[...]                           # (2*din, 2*dout) = [[Wwa;Wwo] | [WwaM;WwoM]]
    vd = vd_ref[...]                                 # (10, dout) f32 vectors
    bap, bapm = vd[0:1, :], vd[1:2, :]
    aw3 = vd[2:5, :]                                 # rows: w11, w22, w12 (already / temp)
    awm = vd[5:6, :]                                 # row : wM            (already / temp)
    bf3 = vd[6:7, :].reshape(1, 1, dout)             # bwa + bwo
    bfm2 = vd[7:8, :]                                # bwaM + bwoM
    bn_scale = vd[8:9, :].reshape(1, 1, dout)
    bn_shift = vd[9:10, :].reshape(1, 1, dout)
    vi = vi_ref[...]                                 # (2, din) f32 vectors
    b1 = vi[0:1, :].reshape(1, 1, din)
    b2 = vi[1:2, :].reshape(1, 1, din)

    # ---- merged type projections: [x1;x2] @ [W1 | W2], per-type half select ----
    xin = jnp.concatenate([x1_ref[...], x2_ref[...]], axis=1)            # (bb, n, din)
    h12 = jnp.dot(xin.reshape(bb * n, din).astype(mmdt), w12,
                  preferred_element_type=f32).reshape(bb, n, 2 * din)
    node_i = lax.broadcasted_iota(jnp.int32, (1, n, 1), 1)
    h3 = jnp.where(node_i < n1,
                   h12[..., 0:din] + b1,
                   h12[..., din:2 * din] + b2)                            # (bb, n, din)
    master = jnp.mean(h3, axis=1, keepdims=True)                          # (bb, 1, din)
    # input_drop (p=0.2): inference mode -> identity

    # ---- heterogeneous attention map (pairwise node products) ----
    pair = (h3[:, :, None, :] * h3[:, None, :, :]).reshape(bb * n * n, din)
    a2 = jnp.tanh(jnp.dot(pair.astype(mmdt), wap,
                          preferred_element_type=f32) + bap)              # (bb*n*n, dout)
    # one MXU contraction against all three quadrant weight rows, then a scalar
    # (n, n) quadrant select
    s3 = lax.dot_general(a2, aw3, (((1,), (1,)), ((), ())),
                         preferred_element_type=f32).reshape(bb, n, n, 3)
    ii = lax.broadcasted_iota(jnp.int32, (n, n), 0)
    jj = lax.broadcasted_iota(jnp.int32, (n, n), 1)
    m11 = ((ii < n1) & (jj < n1))[None]
    m22 = ((ii >= n1) & (jj >= n1))[None]
    score = jnp.where(m11, s3[..., 0], jnp.where(m22, s3[..., 1], s3[..., 2]))
    # softmax over j (the axis contracted with h) == torch softmax(dim=-2)
    score = score - jnp.max(score, axis=2, keepdims=True)
    e = jnp.exp(score)
    att = e * pl.reciprocal(jnp.sum(e, axis=2, keepdims=True), approx=True)  # (bb, n, n)

    # ---- master attention, folded into the node aggregation as an extra row ----
    am = jnp.tanh(jnp.dot((h3 * master).reshape(bb * n, din).astype(mmdt), wapm,
                          preferred_element_type=f32) + bapm)             # (bb*n, dout)
    sm = lax.dot_general(am, awm, (((1,), (1,)), ((), ())),
                         preferred_element_type=f32).reshape(bb, n, 1)
    sm = sm - jnp.max(sm, axis=1, keepdims=True)
    em = jnp.exp(sm)
    attm = em * pl.reciprocal(jnp.sum(em, axis=1, keepdims=True), approx=True)  # (bb, n, 1)
    attm_row = attm[:, :, 0][:, None, :]                                  # (bb, 1, n)

    att_ext = jnp.concatenate([att, attm_row], axis=1)                    # (bb, n+1, n)
    h_ext = jnp.concatenate([h3, master], axis=1)                         # (bb, n+1, din)
    # one batched matmul yields both the node aggregations and magg (row n)
    agg_ext = jnp.einsum('bij,bjd->bid', att_ext, h3,
                         preferred_element_type=f32)                      # (bb, n+1, din)

    # ---- fused output projections (K- and N-stacked) + folded BN(eval) + SELU ----
    z = jnp.concatenate([agg_ext, h_ext], axis=-1).reshape(bb * (n + 1), 2 * din)
    yall = jnp.dot(z.astype(mmdt), wboth,
                   preferred_element_type=f32).reshape(bb, n + 1, 2 * dout)
    y = yall[:, 0:n, 0:dout] + bf3                                        # node rows
    y = y * bn_scale + bn_shift                                           # folded BatchNorm (eval)
    y = SELU_SCALE * jnp.where(y > 0, y, SELU_ALPHA * (jnp.exp(y) - 1.0))
    ym = yall[:, n, dout:2 * dout] + bfm2                                 # master row (bb, dout)

    # lane-dense writeback: one (bb, (n+1)*dout) row per batch element
    o_ref[...] = jnp.concatenate([y[:, r, :] for r in range(n)] + [ym], axis=-1)


# ----------------------------------------------------------------------------- grid / block sizing
def _per_elem_vmem_bytes(n, din, dout):
    """Rough per-batch-element live-set estimate (bytes), with a 2x fudge factor."""
    f = 4
    pair = n * n * din * f
    a2 = n * n * dout * f
    maps = 8 * n * n * f
    acts = (n + 1) * (6 * din + 6 * dout) * f
    io = 2 * 2 * (n * din + (n + 1) * dout) * f       # double-buffered in/out blocks
    return 2 * (pair + a2 + maps + acts + io)


def _tpu_tensorcores_per_chip():
    try:
        kind = jax.devices()[0].device_kind.lower()
    except Exception:
        return 1
    return 2 if "7" in kind else 1                    # v7x: 2 TensorCores per chip


def _choose_grid(batch, n, din, dout, vmem_budget_bytes=24 << 20):
    """Return (bb, steps, padded_batch): VMEM-budgeted batch block, generation-aware
    step count (single step on 1-TC chips, even step count on 2-TC chips)."""
    per_elem = max(1, _per_elem_vmem_bytes(n, din, dout))
    bb_cap = max(1, vmem_budget_bytes // per_elem)
    cores = _tpu_tensorcores_per_chip()
    if batch <= bb_cap and (cores <= 1 or batch < 16):
        return batch, 1, batch                        # one step, block == full batch
    steps = _cdiv(batch, bb_cap)
    if cores >= 2:
        steps = max(2, steps)
        if steps % 2:
            steps += 1
    bb = _cdiv(batch, steps)
    bb = _cdiv(bb, 8) * 8                             # keep the output block sublane-aligned
    steps = _cdiv(batch, bb)
    if cores >= 2 and steps % 2:
        steps += 1
    return bb, steps, bb * steps


# ----------------------------------------------------------------------------- params
def pack_params(p, temperature=1.0, use_bf16=False):
    """Coalesce the 17 module parameters into 5 slabs; fold 1/temperature into the
    attention-weight rows, fold eval-BatchNorm into scale/shift, fuse the with/
    without-att projection pairs along K and the node/master pair along N."""
    inv_t = jnp.float32(1.0 / float(temperature))
    wdt = jnp.bfloat16 if use_bf16 else jnp.float32
    w12 = jnp.concatenate([p["W1"], p["W2"]], axis=1).astype(wdt)          # (din, 2*din)
    wap2 = jnp.concatenate([p["Wap"], p["WapM"]], axis=0).astype(wdt)      # (2*din, dout)
    wboth = jnp.concatenate(
        [jnp.concatenate([p["Wwa"], p["Wwo"]], axis=0),
         jnp.concatenate([p["WwaM"], p["WwoM"]], axis=0)], axis=1).astype(wdt)  # (2*din, 2*dout)
    gamma, beta, rmean, rvar = p["BN"][0], p["BN"][1], p["BN"][2], p["BN"][3]
    bn_scale = gamma * lax.rsqrt(rvar + BN_EPS)
    bn_shift = beta - rmean * bn_scale
    vd = jnp.concatenate([p["bap"], p["bapM"],
                          p["AW"][0:3] * inv_t, p["AW"][3:4] * inv_t,
                          p["bwa"] + p["bwo"], p["bwaM"] + p["bwoM"],
                          bn_scale[None, :], bn_shift[None, :]],
                         axis=0).astype(jnp.float32)                       # (10, dout)
    vi = jnp.concatenate([p["b1"], p["b2"]], axis=0).astype(jnp.float32)   # (2, din)
    return {"W12": w12, "WAP2": wap2, "WBOTH": wboth, "VD": vd, "VI": vi}


def _full_spec(arr):
    zeros = (0,) * arr.ndim
    return pl.BlockSpec(arr.shape, lambda g, _z=zeros: _z)


# ----------------------------------------------------------------------------- wrapper
def htrg_gat_forward(x1, x2, params, temperature=1.0, batch_block=None, use_bf16=None):
    b, n1, din = x1.shape
    _, n2, din2 = x2.shape
    assert din2 == din
    n = n1 + n2
    dout = params["Wap"].shape[1]

    if use_bf16 is None:
        use_bf16 = (din >= 128 and dout >= 128)       # bf16 MXU operands only at production sizes
    packed = pack_params(params, temperature, use_bf16)   # host-side; hoist if calling repeatedly

    if batch_block is None:
        bb, steps, b_pad = _choose_grid(b, n, din, dout)
    else:
        bb = max(1, int(batch_block))
        steps = _cdiv(b, bb)
        if steps > 1 and bb % 8 != 0:                 # keep the output block sublane-aligned
            bb = _cdiv(bb, 8) * 8
            steps = _cdiv(b, bb)
        b_pad = bb * steps

    if b_pad != b:                                    # pad (independent per-element compute)
        pad = ((0, b_pad - b), (0, 0), (0, 0))
        x1p, x2p = jnp.pad(x1, pad), jnp.pad(x2, pad)
    else:
        x1p, x2p = x1, x2

    kernel = partial(_htrg_gat_kernel, n1, n2, din, dout)
    in_specs = [
        pl.BlockSpec((bb, n1, din), lambda g: (g, 0, 0)),
        pl.BlockSpec((bb, n2, din), lambda g: (g, 0, 0)),
        _full_spec(packed["W12"]),
        _full_spec(packed["WAP2"]),
        _full_spec(packed["WBOTH"]),
        _full_spec(packed["VD"]),
        _full_spec(packed["VI"]),
    ]
    out_specs = pl.BlockSpec((bb, (n + 1) * dout), lambda g: (g, 0))

    out = pl.pallas_call(
        kernel,
        out_shape=jax.ShapeDtypeStruct((b_pad, (n + 1) * dout), jnp.float32),
        grid=(steps,),
        in_specs=in_specs,
        out_specs=out_specs,
        compiler_params=pltpu.CompilerParams(
            dimension_semantics=("parallel",),
            vmem_limit_bytes=48 << 20),
    )(x1p, x2p, packed["W12"], packed["WAP2"], packed["WBOTH"],
      packed["VD"], packed["VI"])

    y = out[:b].reshape(b, n + 1, dout)
    return y[:, :n1, :], y[:, n1:n, :], y[:, n:n + 1, :]


# ----------------------------------------------------------------------------- params / reference
def init_params(key, in_dim, out_dim):
    ks = jax.random.split(key, 10)

    def lin(k, din, dout, scale=0.1):
        kw, kb = jax.random.split(k)
        return (jax.random.normal(kw, (din, dout), jnp.float32) * scale,
                jax.random.normal(kb, (1, dout), jnp.float32) * scale)

    p = {}
    p["W1"], p["b1"] = lin(ks[0], in_dim, in_dim)
    p["W2"], p["b2"] = lin(ks[1], in_dim, in_dim)
    p["Wap"], p["bap"] = lin(ks[2], in_dim, out_dim)
    p["WapM"], p["bapM"] = lin(ks[3], in_dim, out_dim)
    # rows: att_weight11, att_weight22, att_weight12, att_weightM
    p["AW"] = jax.random.normal(ks[4], (4, out_dim), jnp.float32) * 0.1
    p["Wwa"], p["bwa"] = lin(ks[5], in_dim, out_dim)
    p["Wwo"], p["bwo"] = lin(ks[6], in_dim, out_dim)
    p["WwaM"], p["bwaM"] = lin(ks[7], in_dim, out_dim)
    p["WwoM"], p["bwoM"] = lin(ks[8], in_dim, out_dim)
    # BatchNorm1d defaults (eval): weight=1, bias=0, running_mean=0, running_var=1
    p["BN"] = jnp.stack([jnp.ones(out_dim), jnp.zeros(out_dim),
                         jnp.zeros(out_dim), jnp.ones(out_dim)]).astype(jnp.float32)
    return p


def reference_forward(x1, x2, p, temperature=1.0):
    """Pure-JAX reference mirroring the PyTorch forward (eval mode)."""
    N1, N2 = x1.shape[1], x2.shape[1]
    N = N1 + N2
    h1 = x1 @ p["W1"] + p["b1"]
    h2 = x2 @ p["W2"] + p["b2"]
    h = jnp.concatenate([h1, h2], axis=1)                     # (B, N, Din)
    master = jnp.mean(h, axis=1, keepdims=True)

    pair = h[:, :, None, :] * h[:, None, :, :]                # (B, N, N, Din)
    a = jnp.tanh(pair @ p["Wap"] + p["bap"])                  # (B, N, N, Dout)
    s11 = jnp.einsum("bijd,d->bij", a, p["AW"][0])
    s22 = jnp.einsum("bijd,d->bij", a, p["AW"][1])
    s12 = jnp.einsum("bijd,d->bij", a, p["AW"][2])
    ii = jnp.arange(N)[:, None]
    jj = jnp.arange(N)[None, :]
    m11 = (ii < N1) & (jj < N1)
    m22 = (ii >= N1) & (jj >= N1)
    score = jnp.where(m11, s11, jnp.where(m22, s22, s12)) / temperature
    att = jax.nn.softmax(score, axis=2)

    am = jnp.tanh((h * master) @ p["WapM"] + p["bapM"])
    sm = jnp.einsum("bnd,d->bn", am, p["AW"][3]) / temperature
    attm = jax.nn.softmax(sm, axis=1)
    magg = jnp.einsum("bn,bnd->bd", attm, h)[:, None, :]
    new_master = magg @ p["WwaM"] + p["bwaM"] + master @ p["WwoM"] + p["bwoM"]

    agg = jnp.einsum("bij,bjd->bid", att, h)
    y = agg @ p["Wwa"] + p["bwa"] + h @ p["Wwo"] + p["bwo"]
    gamma, beta, rmean, rvar = p["BN"][0], p["BN"][1], p["BN"][2], p["BN"][3]
    y = (y - rmean) / jnp.sqrt(rvar + BN_EPS) * gamma + beta
    y = SELU_SCALE * jnp.where(y > 0, y, SELU_ALPHA * (jnp.exp(y) - 1.0))
    return y[:, :N1], y[:, N1:], new_master


# ----------------------------------------------------------------------------- demo / test
if __name__ == "__main__":
    key = jax.random.PRNGKey(0)
    B, N1, N2, Din, Dout = 2, 8, 8, 32, 32
    kx1, kx2, kp = jax.random.split(key, 3)
    x1 = jax.random.normal(kx1, (B, N1, Din), jnp.float32)
    x2 = jax.random.normal(kx2, (B, N2, Din), jnp.float32)
    params = init_params(kp, Din, Dout)

    o1, o2, om = htrg_gat_forward(x1, x2, params, temperature=1.0)
    o1 = jax.block_until_ready(o1)
    o2 = jax.block_until_ready(o2)
    om = jax.block_until_ready(om)

    r1, r2, rm = reference_forward(x1, x2, params, temperature=1.0)
    assert o1.shape == (B, N1, Dout) and o2.shape == (B, N2, Dout) and om.shape == (B, 1, Dout)
    # 5e-3 slack accommodates the EUP approximate reciprocal used for the softmax
    # denominators (everything else is f32-exact up to reassociation).
    assert jnp.allclose(o1, r1, atol=5e-3, rtol=5e-3)
    assert jnp.allclose(o2, r2, atol=5e-3, rtol=5e-3)
    assert jnp.allclose(om, rm, atol=5e-3, rtol=5e-3)
    print("KERNEL_OK")
</pallas_src>

<mosaic_0001>
module attributes {stable_mosaic.version = 11 : i64} {
  func.func @_htrg_gat_kernel(%arg0: i32, %arg1: memref<2x8x32xf32, #tpu.memory_space<vmem>>, %arg2: memref<2x8x32xf32, #tpu.memory_space<vmem>>, %arg3: memref<32x64xf32, #tpu.memory_space<vmem>>, %arg4: memref<64x32xf32, #tpu.memory_space<vmem>>, %arg5: memref<64x64xf32, #tpu.memory_space<vmem>>, %arg6: memref<10x32xf32, #tpu.memory_space<vmem>>, %arg7: memref<2x32xf32, #tpu.memory_space<vmem>>, %arg8: memref<2x544xf32, #tpu.memory_space<vmem>>) attributes {dimension_semantics = [#tpu.dimension_semantics<parallel>], iteration_bounds = array<i64: 1>, scalar_prefetch = 0 : i64, scratch_operands = 0 : i64, tpu.core_type = #tpu.core_type<tc>, window_params = [{transform_indices = @transform_0, window_bounds = array<i64: 2, 8, 32>}, {transform_indices = @transform_1, window_bounds = array<i64: 2, 8, 32>}, {pipeline_mode = #tpu.pipeline_mode<synchronous>, transform_indices = @transform_2, window_bounds = array<i64: 32, 64>}, {pipeline_mode = #tpu.pipeline_mode<synchronous>, transform_indices = @transform_3, window_bounds = array<i64: 64, 32>}, {pipeline_mode = #tpu.pipeline_mode<synchronous>, transform_indices = @transform_4, window_bounds = array<i64: 64, 64>}, {pipeline_mode = #tpu.pipeline_mode<synchronous>, transform_indices = @transform_5, window_bounds = array<i64: 10, 32>}, {pipeline_mode = #tpu.pipeline_mode<synchronous>, transform_indices = @transform_6, window_bounds = array<i64: 2, 32>}, {transform_indices = @transform_7, window_bounds = array<i64: 2, 544>}]} {
    %c0 = arith.constant 0 : index
    %c0_0 = arith.constant 0 : index
    %0 = vector.load %arg3[%c0, %c0_0] : memref<32x64xf32, #tpu.memory_space<vmem>>, vector<32x64xf32>
    %c0_1 = arith.constant 0 : index
    %c0_2 = arith.constant 0 : index
    %1 = vector.load %arg4[%c0_1, %c0_2] : memref<64x32xf32, #tpu.memory_space<vmem>>, vector<64x32xf32>
    %2 = vector.extract_strided_slice %1 {offsets = [0, 0], sizes = [32, 32], strides = [1, 1]} : vector<64x32xf32> to vector<32x32xf32>
    %3 = vector.extract_strided_slice %1 {offsets = [32, 0], sizes = [32, 32], strides = [1, 1]} : vector<64x32xf32> to vector<32x32xf32>
    %c0_3 = arith.constant 0 : index
    %c0_4 = arith.constant 0 : index
    %4 = vector.load %arg5[%c0_3, %c0_4] : memref<64x64xf32, #tpu.memory_space<vmem>>, vector<64x64xf32>
    %c0_5 = arith.constant 0 : index
    %c0_6 = arith.constant 0 : index
    %5 = vector.load %arg6[%c0_5, %c0_6] : memref<10x32xf32, #tpu.memory_space<vmem>>, vector<10x32xf32>
    %6 = vector.extract_strided_slice %5 {offsets = [0, 0], sizes = [1, 32], strides = [1, 1]} : vector<10x32xf32> to vector<1x32xf32>
    %7 = vector.extract_strided_slice %5 {offsets = [1, 0], sizes = [1, 32], strides = [1, 1]} : vector<10x32xf32> to vector<1x32xf32>
    %8 = vector.extract_strided_slice %5 {offsets = [2, 0], sizes = [3, 32], strides = [1, 1]} : vector<10x32xf32> to vector<3x32xf32>
    %9 = vector.extract_strided_slice %5 {offsets = [5, 0], sizes = [1, 32], strides = [1, 1]} : vector<10x32xf32> to vector<1x32xf32>
    %10 = vector.extract_strided_slice %5 {offsets = [6, 0], sizes = [1, 32], strides = [1, 1]} : vector<10x32xf32> to vector<1x32xf32>
    %11 = vector.shape_cast %10 : vector<1x32xf32> to vector<1x1x32xf32>
    %12 = vector.extract_strided_slice %5 {offsets = [7, 0], sizes = [1, 32], strides = [1, 1]} : vector<10x32xf32> to vector<1x32xf32>
    %13 = vector.extract_strided_slice %5 {offsets = [8, 0], sizes = [1, 32], strides = [1, 1]} : vector<10x32xf32> to vector<1x32xf32>
    %14 = vector.shape_cast %13 : vector<1x32xf32> to vector<1x1x32xf32>
    %15 = vector.extract_strided_slice %5 {offsets = [9, 0], sizes = [1, 32], strides = [1, 1]} : vector<10x32xf32> to vector<1x32xf32>
    %16 = vector.shape_cast %15 : vector<1x32xf32> to vector<1x1x32xf32>
    %c0_7 = arith.constant 0 : index
    %c0_8 = arith.constant 0 : index
    %17 = vector.load %arg7[%c0_7, %c0_8] : memref<2x32xf32, #tpu.memory_space<vmem>>, vector<2x32xf32>
    %18 = vector.extract_strided_slice %17 {offsets = [0, 0], sizes = [1, 32], strides = [1, 1]} : vector<2x32xf32> to vector<1x32xf32>
    %19 = vector.shape_cast %18 : vector<1x32xf32> to vector<1x1x32xf32>
    %20 = vector.extract_strided_slice %17 {offsets = [1, 0], sizes = [1, 32], strides = [1, 1]} : vector<2x32xf32> to vector<1x32xf32>
    %21 = vector.shape_cast %20 : vector<1x32xf32> to vector<1x1x32xf32>
    %c0_9 = arith.constant 0 : index
    %c0_10 = arith.constant 0 : index
    %c0_11 = arith.constant 0 : index
    %22 = vector.load %arg1[%c0_9, %c0_10, %c0_11] : memref<2x8x32xf32, #tpu.memory_space<vmem>>, vector<2x8x32xf32>
    %c0_12 = arith.constant 0 : index
    %c0_13 = arith.constant 0 : index
    %c0_14 = arith.constant 0 : index
    %23 = vector.load %arg2[%c0_12, %c0_13, %c0_14] : memref<2x8x32xf32, #tpu.memory_space<vmem>>, vector<2x8x32xf32>
    %24 = tpu.concatenate %22, %23 in 1 : vector<2x8x32xf32>, vector<2x8x32xf32> -> vector<2x16x32xf32>
    %25 = vector.shape_cast %24 : vector<2x16x32xf32> to vector<32x32xf32>
    %cst = arith.constant dense<0.000000e+00> : vector<32x64xf32>
    %26 = tpu.matmul %25, %0, %cst {dimension_numbers = #tpu.dot_dimension_numbers<[1], [0], [0], [1], [0, 0, 1, 1], [], []>} : vector<32x32xf32>, vector<32x64xf32>, vector<32x64xf32> -> vector<32x64xf32>
    %27 = vector.shape_cast %26 : vector<32x64xf32> to vector<2x16x64xf32>
    %28 = tpu.iota {dimensions = array<i32: 1>} : vector<1x16x1xi32>
    %c8_i32 = arith.constant 8 : i32
    %29 = vector.broadcast %c8_i32 : i32 to vector<1x16x1xi32>
    %30 = arith.cmpi slt, %28, %29 : vector<1x16x1xi32>
    %31 = vector.extract_strided_slice %27 {offsets = [0, 0, 0], sizes = [2, 16, 32], strides = [1, 1, 1]} : vector<2x16x64xf32> to vector<2x16x32xf32>
    %32 = vector.broadcast %19 : vector<1x1x32xf32> to vector<2x16x32xf32>
    %33 = arith.addf %31, %32 : vector<2x16x32xf32>
    %34 = vector.extract_strided_slice %27 {offsets = [0, 0, 32], sizes = [2, 16, 32], strides = [1, 1, 1]} : vector<2x16x64xf32> to vector<2x16x32xf32>
    %35 = vector.broadcast %21 : vector<1x1x32xf32> to vector<2x16x32xf32>
    %36 = arith.addf %34, %35 : vector<2x16x32xf32>
    %37 = vector.shape_cast %30 : vector<1x16x1xi1> to vector<1x16x1xi1>
    %38 = vector.broadcast %37 : vector<1x16x1xi1> to vector<2x16x32xi1>
    %39 = arith.select %38, %33, %36 : vector<2x16x32xi1>, vector<2x16x32xf32>
    %cst_15 = arith.constant dense<0.000000e+00> : vector<2x32xf32>
    %40 = vector.multi_reduction <add>, %39, %cst_15 [1] : vector<2x16x32xf32> to vector<2x32xf32>
    %41 = vector.shape_cast %40 : vector<2x32xf32> to vector<2x1x32xf32>
    %cst_16 = arith.constant 1.600000e+01 : f32
    %42 = vector.broadcast %cst_16 : f32 to vector<2x1x32xf32>
    %43 = arith.divf %41, %42 : vector<2x1x32xf32>
    %44 = vector.shape_cast %39 : vector<2x16x32xf32> to vector<2x16x1x32xf32>
    %45 = vector.shape_cast %39 : vector<2x16x32xf32> to vector<2x1x16x32xf32>
    %46 = vector.broadcast %44 : vector<2x16x1x32xf32> to vector<2x16x16x32xf32>
    %47 = vector.broadcast %45 : vector<2x1x16x32xf32> to vector<2x16x16x32xf32>
    %48 = arith.mulf %46, %47 : vector<2x16x16x32xf32>
    %49 = vector.shape_cast %48 : vector<2x16x16x32xf32> to vector<512x32xf32>
    %cst_17 = arith.constant dense<0.000000e+00> : vector<512x32xf32>
    %50 = tpu.matmul %49, %2, %cst_17 {dimension_numbers = #tpu.dot_dimension_numbers<[1], [0], [0], [1], [0, 0, 1, 1], [], []>} : vector<512x32xf32>, vector<32x32xf32>, vector<512x32xf32> -> vector<512x32xf32>
    %51 = vector.broadcast %6 : vector<1x32xf32> to vector<512x32xf32>
    %52 = arith.addf %50, %51 : vector<512x32xf32>
    %53 = math.tanh %52 : vector<512x32xf32>
    %cst_18 = arith.constant dense<0.000000e+00> : vector<512x3xf32>
    %54 = tpu.matmul %53, %8, %cst_18 {dimension_numbers = #tpu.dot_dimension_numbers<[1], [1], [0], [0], [0, 0, 1, 0], [], []>} : vector<512x32xf32>, vector<3x32xf32>, vector<512x3xf32> -> vector<512x3xf32>
    %55 = vector.shape_cast %54 : vector<512x3xf32> to vector<2x16x16x3xf32>
    %56 = tpu.iota {dimensions = array<i32: 0>} : vector<16x16xi32>
    %57 = tpu.iota {dimensions = array<i32: 1>} : vector<16x16xi32>
    %c8_i32_19 = arith.constant 8 : i32
    %58 = vector.broadcast %c8_i32_19 : i32 to vector<16x16xi32>
    %59 = arith.cmpi slt, %56, %58 : vector<16x16xi32>
    %c8_i32_20 = arith.constant 8 : i32
    %60 = vector.broadcast %c8_i32_20 : i32 to vector<16x16xi32>
    %61 = arith.cmpi slt, %57, %60 : vector<16x16xi32>
    %62 = arith.andi %59, %61 : vector<16x16xi1>
    %63 = vector.shape_cast %62 : vector<16x16xi1> to vector<1x16x16xi1>
    %c8_i32_21 = arith.constant 8 : i32
    %64 = vector.broadcast %c8_i32_21 : i32 to vector<16x16xi32>
    %65 = arith.cmpi sge, %56, %64 : vector<16x16xi32>
    %c8_i32_22 = arith.constant 8 : i32
    %66 = vector.broadcast %c8_i32_22 : i32 to vector<16x16xi32>
    %67 = arith.cmpi sge, %57, %66 : vector<16x16xi32>
    %68 = arith.andi %65, %67 : vector<16x16xi1>
    %69 = vector.shape_cast %68 : vector<16x16xi1> to vector<1x16x16xi1>
    %70 = vector.extract_strided_slice %55 {offsets = [0, 0, 0, 0], sizes = [2, 16, 16, 1], strides = [1, 1, 1, 1]} : vector<2x16x16x3xf32> to vector<2x16x16x1xf32>
    %71 = vector.shape_cast %70 : vector<2x16x16x1xf32> to vector<2x16x16xf32>
    %72 = vector.extract_strided_slice %55 {offsets = [0, 0, 0, 1], sizes = [2, 16, 16, 1], strides = [1, 1, 1, 1]} : vector<2x16x16x3xf32> to vector<2x16x16x1xf32>
    %73 = vector.shape_cast %72 : vector<2x16x16x1xf32> to vector<2x16x16xf32>
    %74 = vector.extract_strided_slice %55 {offsets = [0, 0, 0, 2], sizes = [2, 16, 16, 1], strides = [1, 1, 1, 1]} : vector<2x16x16x3xf32> to vector<2x16x16x1xf32>
    %75 = vector.shape_cast %74 : vector<2x16x16x1xf32> to vector<2x16x16xf32>
    %76 = vector.shape_cast %69 : vector<1x16x16xi1> to vector<1x16x16xi1>
    %77 = vector.broadcast %76 : vector<1x16x16xi1> to vector<2x16x16xi1>
    %78 = arith.select %77, %73, %75 : vector<2x16x16xi1>, vector<2x16x16xf32>
    %79 = vector.shape_cast %63 : vector<1x16x16xi1> to vector<1x16x16xi1>
    %80 = vector.broadcast %79 : vector<1x16x16xi1> to vector<2x16x16xi1>
    %81 = arith.select %80, %71, %78 : vector<2x16x16xi1>, vector<2x16x16xf32>
    %cst_23 = arith.constant dense<0xFF800000> : vector<2x16xf32>
    %82 = vector.multi_reduction <maximumf>, %81, %cst_23 [2] : vector<2x16x16xf32> to vector<2x16xf32>
    %83 = vector.shape_cast %82 : vector<2x16xf32> to vector<2x16x1xf32>
    %84 = vector.broadcast %83 : vector<2x16x1xf32> to vector<2x16x16xf32>
    %85 = arith.subf %81, %84 : vector<2x16x16xf32>
    %86 = math.exp %85 : vector<2x16x16xf32>
    %cst_24 = arith.constant dense<0.000000e+00> : vector<2x16xf32>
    %87 = vector.multi_reduction <add>, %86, %cst_24 [2] : vector<2x16x16xf32> to vector<2x16xf32>
    %88 = vector.shape_cast %87 : vector<2x16xf32> to vector<2x16x1xf32>
    %89 = tpu.reciprocal %88 {approx = true} : vector<2x16x1xf32> -> vector<2x16x1xf32>
    %90 = vector.broadcast %89 : vector<2x16x1xf32> to vector<2x16x16xf32>
    %91 = arith.mulf %86, %90 : vector<2x16x16xf32>
    %92 = vector.broadcast %43 : vector<2x1x32xf32> to vector<2x16x32xf32>
    %93 = arith.mulf %39, %92 : vector<2x16x32xf32>
    %94 = vector.shape_cast %93 : vector<2x16x32xf32> to vector<32x32xf32>
    %cst_25 = arith.constant dense<0.000000e+00> : vector<32x32xf32>
    %95 = tpu.matmul %94, %3, %cst_25 {dimension_numbers = #tpu.dot_dimension_numbers<[1], [0], [0], [1], [0, 0, 1, 1], [], []>} : vector<32x32xf32>, vector<32x32xf32>, vector<32x32xf32> -> vector<32x32xf32>
    %96 = vector.broadcast %7 : vector<1x32xf32> to vector<32x32xf32>
    %97 = arith.addf %95, %96 : vector<32x32xf32>
    %98 = math.tanh %97 : vector<32x32xf32>
    %cst_26 = arith.constant dense<0.000000e+00> : vector<32x1xf32>
    %99 = tpu.matmul %98, %9, %cst_26 {dimension_numbers = #tpu.dot_dimension_numbers<[1], [1], [0], [0], [0, 0, 1, 0], [], []>} : vector<32x32xf32>, vector<1x32xf32>, vector<32x1xf32> -> vector<32x1xf32>
    %100 = vector.shape_cast %99 : vector<32x1xf32> to vector<2x16x1xf32>
    %cst_27 = arith.constant dense<0xFF800000> : vector<2x1xf32>
    %101 = vector.multi_reduction <maximumf>, %100, %cst_27 [1] : vector<2x16x1xf32> to vector<2x1xf32>
    %102 = vector.shape_cast %101 : vector<2x1xf32> to vector<2x1x1xf32>
    %103 = vector.broadcast %102 : vector<2x1x1xf32> to vector<2x16x1xf32>
    %104 = arith.subf %100, %103 : vector<2x16x1xf32>
    %105 = math.exp %104 : vector<2x16x1xf32>
    %cst_28 = arith.constant dense<0.000000e+00> : vector<2x1xf32>
    %106 = vector.multi_reduction <add>, %105, %cst_28 [1] : vector<2x16x1xf32> to vector<2x1xf32>
    %107 = vector.shape_cast %106 : vector<2x1xf32> to vector<2x1x1xf32>
    %108 = tpu.reciprocal %107 {approx = true} : vector<2x1x1xf32> -> vector<2x1x1xf32>
    %109 = vector.broadcast %108 : vector<2x1x1xf32> to vector<2x16x1xf32>
    %110 = arith.mulf %105, %109 : vector<2x16x1xf32>
    %111 = vector.shape_cast %110 : vector<2x16x1xf32> to vector<2x16xf32>
    %112 = vector.shape_cast %111 : vector<2x16xf32> to vector<2x1x16xf32>
    %113 = tpu.concatenate %91, %112 in 1 : vector<2x16x16xf32>, vector<2x1x16xf32> -> vector<2x17x16xf32>
    %114 = tpu.concatenate %39, %43 in 1 : vector<2x16x32xf32>, vector<2x1x32xf32> -> vector<2x17x32xf32>
    "tpu.trace_start"() <{level = 10 : i32, message = "bij,bjd->bid"}> : () -> ()
    %cst_29 = arith.constant dense<0.000000e+00> : vector<2x17x32xf32>
    %115 = tpu.matmul %113, %39, %cst_29 {dimension_numbers = #tpu.dot_dimension_numbers<[2], [1], [1], [2], [0, 0, 0, 1, 1, 2], [0], [0]>} : vector<2x17x16xf32>, vector<2x16x32xf32>, vector<2x17x32xf32> -> vector<2x17x32xf32>
    "tpu.trace_stop"() : () -> ()
    %116 = tpu.concatenate %115, %114 in 2 : vector<2x17x32xf32>, vector<2x17x32xf32> -> vector<2x17x64xf32>
    %117 = vector.shape_cast %116 : vector<2x17x64xf32> to vector<34x64xf32>
    %cst_30 = arith.constant dense<0.000000e+00> : vector<34x64xf32>
    %118 = tpu.matmul %117, %4, %cst_30 {dimension_numbers = #tpu.dot_dimension_numbers<[1], [0], [0], [1], [0, 0, 1, 1], [], []>} : vector<34x64xf32>, vector<64x64xf32>, vector<34x64xf32> -> vector<34x64xf32>
    %119 = vector.shape_cast %118 : vector<34x64xf32> to vector<2x17x64xf32>
    %120 = vector.extract_strided_slice %119 {offsets = [0, 0, 0], sizes = [2, 16, 32], strides = [1, 1, 1]} : vector<2x17x64xf32> to vector<2x16x32xf32>
    %121 = vector.broadcast %11 : vector<1x1x32xf32> to vector<2x16x32xf32>
    %122 = arith.addf %120, %121 : vector<2x16x32xf32>
    %123 = vector.broadcast %14 : vector<1x1x32xf32> to vector<2x16x32xf32>
    %124 = arith.mulf %122, %123 : vector<2x16x32xf32>
    %125 = vector.broadcast %16 : vector<1x1x32xf32> to vector<2x16x32xf32>
    %126 = arith.addf %124, %125 : vector<2x16x32xf32>
    %cst_31 = arith.constant 0.000000e+00 : f32
    %127 = vector.broadcast %cst_31 : f32 to vector<2x16x32xf32>
    %128 = arith.cmpf ogt, %126, %127 : vector<2x16x32xf32>
    %129 = math.exp %126 : vector<2x16x32xf32>
    %cst_32 = arith.constant 1.000000e+00 : f32
    %130 = vector.broadcast %cst_32 : f32 to vector<2x16x32xf32>
    %131 = arith.subf %129, %130 : vector<2x16x32xf32>
    %cst_33 = arith.constant 1.67326319 : f32
    %132 = vector.broadcast %cst_33 : f32 to vector<2x16x32xf32>
    %133 = arith.mulf %132, %131 : vector<2x16x32xf32>
    %134 = arith.select %128, %126, %133 : vector<2x16x32xi1>, vector<2x16x32xf32>
    %cst_34 = arith.constant 1.05070102 : f32
    %135 = vector.broadcast %cst_34 : f32 to vector<2x16x32xf32>
    %136 = arith.mulf %135, %134 : vector<2x16x32xf32>
    %137 = vector.extract_strided_slice %119 {offsets = [0, 16, 32], sizes = [2, 1, 32], strides = [1, 1, 1]} : vector<2x17x64xf32> to vector<2x1x32xf32>
    %138 = vector.shape_cast %137 : vector<2x1x32xf32> to vector<2x32xf32>
    %139 = vector.broadcast %12 : vector<1x32xf32> to vector<2x32xf32>
    %140 = arith.addf %138, %139 : vector<2x32xf32>
    %141 = vector.extract_strided_slice %136 {offsets = [0, 0, 0], sizes = [2, 1, 32], strides = [1, 1, 1]} : vector<2x16x32xf32> to vector<2x1x32xf32>
    %142 = vector.shape_cast %141 : vector<2x1x32xf32> to vector<2x32xf32>
    %143 = vector.extract_strided_slice %136 {offsets = [0, 1, 0], sizes = [2, 1, 32], strides = [1, 1, 1]} : vector<2x16x32xf32> to vector<2x1x32xf32>
    %144 = vector.shape_cast %143 : vector<2x1x32xf32> to vector<2x32xf32>
    %145 = vector.extract_strided_slice %136 {offsets = [0, 2, 0], sizes = [2, 1, 32], strides = [1, 1, 1]} : vector<2x16x32xf32> to vector<2x1x32xf32>
    %146 = vector.shape_cast %145 : vector<2x1x32xf32> to vector<2x32xf32>
    %147 = vector.extract_strided_slice %136 {offsets = [0, 3, 0], sizes = [2, 1, 32], strides = [1, 1, 1]} : vector<2x16x32xf32> to vector<2x1x32xf32>
    %148 = vector.shape_cast %147 : vector<2x1x32xf32> to vector<2x32xf32>
    %149 = vector.extract_strided_slice %136 {offsets = [0, 4, 0], sizes = [2, 1, 32], strides = [1, 1, 1]} : vector<2x16x32xf32> to vector<2x1x32xf32>
    %150 = vector.shape_cast %149 : vector<2x1x32xf32> to vector<2x32xf32>
    %151 = vector.extract_strided_slice %136 {offsets = [0, 5, 0], sizes = [2, 1, 32], strides = [1, 1, 1]} : vector<2x16x32xf32> to vector<2x1x32xf32>
    %152 = vector.shape_cast %151 : vector<2x1x32xf32> to vector<2x32xf32>
    %153 = vector.extract_strided_slice %136 {offsets = [0, 6, 0], sizes = [2, 1, 32], strides = [1, 1, 1]} : vector<2x16x32xf32> to vector<2x1x32xf32>
    %154 = vector.shape_cast %153 : vector<2x1x32xf32> to vector<2x32xf32>
    %155 = vector.extract_strided_slice %136 {offsets = [0, 7, 0], sizes = [2, 1, 32], strides = [1, 1, 1]} : vector<2x16x32xf32> to vector<2x1x32xf32>
    %156 = vector.shape_cast %155 : vector<2x1x32xf32> to vector<2x32xf32>
    %157 = vector.extract_strided_slice %136 {offsets = [0, 8, 0], sizes = [2, 1, 32], strides = [1, 1, 1]} : vector<2x16x32xf32> to vector<2x1x32xf32>
    %158 = vector.shape_cast %157 : vector<2x1x32xf32> to vector<2x32xf32>
    %159 = vector.extract_strided_slice %136 {offsets = [0, 9, 0], sizes = [2, 1, 32], strides = [1, 1, 1]} : vector<2x16x32xf32> to vector<2x1x32xf32>
    %160 = vector.shape_cast %159 : vector<2x1x32xf32> to vector<2x32xf32>
    %161 = vector.extract_strided_slice %136 {offsets = [0, 10, 0], sizes = [2, 1, 32], strides = [1, 1, 1]} : vector<2x16x32xf32> to vector<2x1x32xf32>
    %162 = vector.shape_cast %161 : vector<2x1x32xf32> to vector<2x32xf32>
    %163 = vector.extract_strided_slice %136 {offsets = [0, 11, 0], sizes = [2, 1, 32], strides = [1, 1, 1]} : vector<2x16x32xf32> to vector<2x1x32xf32>
    %164 = vector.shape_cast %163 : vector<2x1x32xf32> to vector<2x32xf32>
    %165 = vector.extract_strided_slice %136 {offsets = [0, 12, 0], sizes = [2, 1, 32], strides = [1, 1, 1]} : vector<2x16x32xf32> to vector<2x1x32xf32>
    %166 = vector.shape_cast %165 : vector<2x1x32xf32> to vector<2x32xf32>
    %167 = vector.extract_strided_slice %136 {offsets = [0, 13, 0], sizes = [2, 1, 32], strides = [1, 1, 1]} : vector<2x16x32xf32> to vector<2x1x32xf32>
    %168 = vector.shape_cast %167 : vector<2x1x32xf32> to vector<2x32xf32>
    %169 = vector.extract_strided_slice %136 {offsets = [0, 14, 0], sizes = [2, 1, 32], strides = [1, 1, 1]} : vector<2x16x32xf32> to vector<2x1x32xf32>
    %170 = vector.shape_cast %169 : vector<2x1x32xf32> to vector<2x32xf32>
    %171 = vector.extract_strided_slice %136 {offsets = [0, 15, 0], sizes = [2, 1, 32], strides = [1, 1, 1]} : vector<2x16x32xf32> to vector<2x1x32xf32>
    %172 = vector.shape_cast %171 : vector<2x1x32xf32> to vector<2x32xf32>
    %173 = tpu.concatenate %142, %144, %146, %148, %150, %152, %154, %156, %158, %160, %162, %164, %166, %168, %170, %172 in 1 : vector<2x32xf32>, vector<2x32xf32>, vector<2x32xf32>, vector<2x32xf32>, vector<2x32xf32>, vector<2x32xf32>, vector<2x32xf32>, vector<2x32xf32>, vector<2x32xf32>, vector<2x32xf32>, vector<2x32xf32>, vector<2x32xf32>, vector<2x32xf32>, vector<2x32xf32>, vector<2x32xf32>, vector<2x32xf32> -> vector<2x512xf32>
    %174 = tpu.concatenate %173, %140 in 1 : vector<2x512xf32>, vector<2x32xf32> -> vector<2x544xf32>
    %c0_35 = arith.constant 0 : index
    %c0_36 = arith.constant 0 : index
    %175 = vector.load %arg8[%c0_35, %c0_36] : memref<2x544xf32, #tpu.memory_space<vmem>>, vector<2x544xf32>
    tpu.vector_store %arg8[%c0_35, %c0_36], %174 {strides = array<i32>} : memref<2x544xf32, #tpu.memory_space<vmem>>, vector<2x544xf32>,
    return
  }
  func.func @transform_0(%arg0: i32) -> (i32, i32, i32) {
    %c0_i32 = arith.constant 0 : i32
    %c0_i32_0 = arith.constant 0 : i32
    %c0_i32_1 = arith.constant 0 : i32
    return %arg0, %c0_i32, %c0_i32_0 : i32, i32, i32
  }
  func.func @transform_1(%arg0: i32) -> (i32, i32, i32) {
    %c0_i32 = arith.constant 0 : i32
    %c0_i32_0 = arith.constant 0 : i32
    %c0_i32_1 = arith.constant 0 : i32
    return %arg0, %c0_i32, %c0_i32_0 : i32, i32, i32
  }
  func.func @transform_2(%arg0: i32) -> (i32, i32) {
    %c0_i32 = arith.constant 0 : i32
    %c0_i32_0 = arith.constant 0 : i32
    %c0_i32_1 = arith.constant 0 : i32
    return %c0_i32, %c0_i32_0 : i32, i32
  }
  func.func @transform_3(%arg0: i32) -> (i32, i32) {
    %c0_i32 = arith.constant 0 : i32
    %c0_i32_0 = arith.constant 0 : i32
    %c0_i32_1 = arith.constant 0 : i32
    return %c0_i32, %c0_i32_0 : i32, i32
  }
  func.func @transform_4(%arg0: i32) -> (i32, i32) {
    %c0_i32 = arith.constant 0 : i32
    %c0_i32_0 = arith.constant 0 : i32
    %c0_i32_1 = arith.constant 0 : i32
    return %c0_i32, %c0_i32_0 : i32, i32
  }
  func.func @transform_5(%arg0: i32) -> (i32, i32) {
    %c0_i32 = arith.constant 0 : i32
    %c0_i32_0 = arith.constant 0 : i32
    %c0_i32_1 = arith.constant 0 : i32
    return %c0_i32, %c0_i32_0 : i32, i32
  }
  func.func @transform_6(%arg0: i32) -> (i32, i32) {
    %c0_i32 = arith.constant 0 : i32
    %c0_i32_0 = arith.constant 0 : i32
    %c0_i32_1 = arith.constant 0 : i32
    return %c0_i32, %c0_i32_0 : i32, i32
  }
  func.func @transform_7(%arg0: i32) -> (i32, i32) {
    %c0_i32 = arith.constant 0 : i32
    %c0_i32_0 = arith.constant 0 : i32
    return %arg0, %c0_i32 : i32, i32
  }
}

</mosaic_0001>

<bundles_post_ra>
// kernel: tpu_custom_call.1
= control target key start
LH: loop header
LB: loop body
LE: loop exit
PB: predicated region body
PF: predicated region fallthrough
CT: control target
= control target key end

     0   :  { %12 = vsyncpa [#allocation3], 0  ;;  %s5563_s0 = inlined_call_operand.hbm [shape: f32[2,8,32], index: 0, kind: input, shape index: {}]   ;;  %s5564_s1 = inlined_call_operand.hbm [shape: f32[2,8,32], index: 1, kind: input, shape index: {}]   ;;  %s5565_s2 = inlined_call_operand.vmem [shape: f32[32,64], index: 2, kind: input, shape index: {}]   ;;  %s5566_s3 = inlined_call_operand.vmem [shape: f32[64,32], index: 3, kind: input, shape index: {}]   ;;  %s5567_s4 = inlined_call_operand.vmem [shape: f32[64,64], index: 4, kind: input, shape index: {}]   ;;  %s5568_s5 = inlined_call_operand.hbm [shape: f32[10,32], index: 5, kind: input, shape index: {}]   ;;  %s5569_s6 = inlined_call_operand.vmem [shape: f32[2,32], index: 6, kind: input, shape index: {}]   ;;  %s5570_s7 = inlined_call_operand.hbm [shape: f32[2,544], index: 7, kind: output, shape index: {}]  }
   0x1   :  { %13 = vsyncpa [#allocation6], 0 }
   0x2   :  { %14 = vsyncpa [#allocation4], 0  ;;  %s32_s26 = sshll.u32 %s5564_s1, 4  ;;  %s3963_s27 = smov [#allocation5]   ;;  %s33_s26 = int_to_ptr.hbm [resolvable:$true] %s32_s26 }
   0x3   :  { %s34_s28 = sshll.u32 %s3963_s27, 4  ;;  %s19_s8 = sshll.u32 %s5563_s0, 4  ;;  %s35_s28 = int_to_ptr.vmem [resolvable:$true] %s34_s28  ;;  %s20_s8 = int_to_ptr.hbm [resolvable:$true] %s19_s8 }
   0x4   :  { %s3964_s9 = smov 128   ;;  %s3965_s10 = smov 8  }
   0x5   :  { %40 = dma.hbm_to_vmem [thread:$0]  %s33_s26, 256, %s35_s28, [#allocation6], %s3964_s9, %s3964_s9, %s3965_s10  }
   0x6   :  { %s3966_s11 = smov [#allocation2]   ;;  %s51_s15 = sshll.u32 %s5568_s5, 4  ;;  %s52_s15 = int_to_ptr.hbm [resolvable:$true] %s51_s15 }
   0x7   :  { %s21_s12 = sshll.u32 %s3966_s11, 4  ;;  %s3967_s1 = smov [#allocation7]   ;;  %s22_s12 = int_to_ptr.vmem [resolvable:$true] %s21_s12 }
   0x8   :  { %27 = dma.hbm_to_vmem [thread:$0]  %s20_s8, 256, %s22_s12, [#allocation3], %s3964_s9, %s3964_s9, %s3965_s10  }
   0x9   :  { %s53_s16 = sshll.u32 %s3967_s1, 4  ;;  %s54_s16 = int_to_ptr.vmem [resolvable:$true] %s53_s16 }
   0xa   :  { %59 = dma.hbm_to_vmem [thread:$0]  %s52_s15, 256, %s54_s16, [#allocation6], %s3964_s9, %s3964_s9, %s3965_s10  }
   0xb   :  { %3957 = dma.done.wait [#allocation3], 256  }
   0xc   :  { %3958 = vsyncadd [#allocation3], 4294967040 }
   0xd   :  { %3959 = dma.done.wait [#allocation6], 512  }
   0xe   :  { %3960 = vsyncadd [#allocation6], 4294966784  ;;  %v77_v0 = vld [vmem:[%s5565_s2 + $0x18] sm:$0xff]  ;;  %v76_v1 = vld [vmem:[%s5565_s2 + $0x10] sm:$0xff]  ;;  %vm101_vm0 = vcmask 261120   ;;  %s3968_s25 = smov 32  }
   0xf   :  { %3503 = vmatpush.msra.mxu3 %v77_v0  ;;  %126 = vmatpush.msra.mxu0 %v77_v0  ;;  %v75_v2 = vld [vmem:[%s5565_s2 + $0x8] sm:$0xff]  ;;  %v4037_v3 = vld [vmem:[%s5569_s6] sm:$0x3]  ;;  %v99_v6 = vld [vmem:[#allocation5] sm:$0xff]  ;;  %s3969_s9 = smov 96   ;;  %vm1517_vm2 = vcmask 130112  }
  0x10   :  { %v153_v4 = vperm.slane %v4037_v3, 1  ;;  %v74_v5 = vld [vmem:[%s5565_s2] sm:$0xff]  ;;  %v97_v7 = vld [vmem:[#allocation2] sm:$0xff]  ;;  %v98_v8 = vld [vmem:[#allocation2 + $0x8] sm:$0xff]  ;;  %v148_v14 = vperm.slane %v4037_v3, 0  ;;  %vm1612_vm3 = vcmask 1041409  }
  0x11   :  { %3504 = vmatpush.msra.mxu3 %v76_v1  ;;  %127 = vmatpush.msra.mxu0 %v76_v1  ;;  %v100_v9 = vld [vmem:[#allocation5 + $0x8] sm:$0xff]  ;;  %v81_v10 = vld [vmem:[%s5566_s3 + $0x18] sm:$0xff]  ;;  %v80_v11 = vld [vmem:[%s5566_s3 + $0x10] sm:$0xff]  ;;  %vm1614_vm4 = vcmask 1042434   ;;  %vm1616_vm5 = vcmask 1043459   ;;  %vm1618_vm6 = vcmask 1044484  }
  0x12   :  { %155 = vrot.lane.b32.xlu0 %v153_v4, %s3968_s25  ;;  %578 = vmatpush.msra.mxu1 %v81_v10  ;;  %v79_v12 = vld [vmem:[%s5566_s3 + $0x8] sm:$0xff]  ;;  %v78_v13 = vld [vmem:[%s5566_s3] sm:$0xff]  ;;  %v85_v27 = vld [vmem:[%s5566_s3 + $0x38] sm:$0xff]  ;;  %vm1620_vm7 = vcmask 1045509   ;;  %vm1622_vm8 = vcmask 1046534   ;;  %vm1624_vm9 = vcmask 1047559  }
  0x13   :  { %3505 = vmatpush.msra.mxu3 %v75_v2  ;;  %128 = vmatpush.msra.mxu0 %v75_v2  ;;  %v4068_v25 = vld [vmem:[#allocation7] sm:$0xff]  ;;  %v84_v28 = vld [vmem:[%s5566_s3 + $0x30] sm:$0xff]  ;;  %v82_v30 = vld [vmem:[%s5566_s3 + $0x20] sm:$0xff]  ;;  %vm2303_vm11 = vcmask 130048   ;;  %vm2645_vm13 = vcmask 523264  }
  0x14   :  { %579 = vmatpush.msra.mxu1 %v80_v11  ;;  %v840_v26 = vrot.slane %v4068_v25, 2  ;;  %v83_v29 = vld [vmem:[%s5566_s3 + $0x28] sm:$0xff] }
  0x15   :  { %3506 = vmatpush.msra.mxu3 %v74_v5  ;;  %129 = vmatpush.msra.mxu0 %v74_v5 }
  0x16   :  { %3324 = vmatmul.msk.f32.vlgmr.msra.gmra.mxu3 %vm101_vm0, %v99_v6  ;;  %3323 = vmatmul.msk.f32.vlgmr.msra.gmra.mxu0 %vm101_vm0, %v97_v7 }
  0x17   :  { %3507 = vmatpush.msrb.mxu3 %v81_v10  ;;  %580 = vmatpush.msra.mxu1 %v79_v12 }
  0x18   :  { %3391 = vmatpush.xpose.msk.msrb.mxu0 %vm101_vm0, %v840_v26  ;;  %3511 = vmatpush.xpose.msk.msra.mxu2 %vm101_vm0, %v840_v26 }
  0x19   :  { %3508 = vmatpush.msrb.mxu3 %v80_v11  ;;  %581 = vmatpush.msra.mxu1 %v78_v13 }
  0x1b   :  { %3509 = vmatpush.msrb.mxu3 %v79_v12 }
  0x1d   :  { %3510 = vmatpush.msrb.mxu3 %v78_v13 }
  0x1e   :  { %3325 = vmatmul.msk.f32.gmra.mxu3 %vm101_vm0, %v98_v8  ;;  %v4145_v8 = vperm.slane %v4068_v25, 0 }
  0x1f   :  { %2377 = vmatpush.msra.mxu3 %v85_v27 }
  0x21   :  { %2378 = vmatpush.msra.mxu3 %v84_v28 }
  0x23   :  { %2379 = vmatpush.msra.mxu3 %v83_v29 }
  0x25   :  { %2380 = vmatpush.msra.mxu3 %v82_v30 }
  0x26   :  { %3326 = vmatmul.msk.f32.gmra.mxu3 %vm101_vm0, %v100_v9 }
  0x84   :  { %v156_v17 = vpop.permute.xlu0 %155 }
  0x93   :  { %v131_v15 = vpop.f32.mrf.mxu0 }
  0x94   :  { %v4061_v16 = vadd.f32 %v148_v14, %v131_v15 }
  0x96   :  { %5587 = vst [vmem:[#allocation12_spill] sm:$0xff] %v4061_v16  ;;  %v245_v18 = vperm.slane %v4061_v16, 0  ;;  %v217_v33 = vrot.slane %v4061_v16, 1  ;;  %v218_v42 = vrot.slane %v4061_v16, 2  ;;  %v219_v50 = vrot.slane %v4061_v16, 3 }
  0x97   :  { %v220_v58 = vrot.slane %v4061_v16, 4  ;;  %v221_v2 = vrot.slane %v4061_v16, 5  ;;  %v222_v11 = vrot.slane %v4061_v16, 6 }
  0x98   :  { %v309_v20 = vmul.f32 %v245_v18, %v4061_v16  ;;  %v246_v35 = vperm.slane %v217_v33, 0  ;;  %v247_v44 = vperm.slane %v218_v42, 0  ;;  %v248_v52 = vperm.slane %v219_v50, 0 }
  0x99   :  { %v134_v19 = vpop.f32.mrf.mxu3  ;;  %v249_v60 = vperm.slane %v220_v58, 0  ;;  %v250_v4 = vperm.slane %v221_v2, 0  ;;  %v251_v15 = vperm.slane %v222_v11, 0 }
  0x9a   :  { %v159_v21 = vadd.f32 %v156_v17, %v134_v19  ;;  %3327 = vmatmul.msk.f32.vlgmr.msra.gmra.mxu1 %vm101_vm0, %v309_v20  ;;  %v311_v36 = vmul.f32 %v246_v35, %v4061_v16  ;;  %v313_v47 = vmul.f32 %v247_v44, %v4061_v16  ;;  %v315_v55 = vmul.f32 %v248_v52, %v4061_v16 }
  0x9b   :  { %v317_v63 = vmul.f32 %v249_v60, %v4061_v16  ;;  %v319_v7 = vmul.f32 %v250_v4, %v4061_v16  ;;  %v321_v19 = vmul.f32 %v251_v15, %v4061_v16 }
  0x9c   :  { %172 = vrot.lane.b32.xlu0 %v159_v21, %s3969_s9 }
  0xa1   :  { %v137_v22 = vpop.f32.mrf.mxu3 }
  0xa2   :  { %v4092_v34 = vadd.f32 %v148_v14, %v137_v22 }
  0xa4   :  { %5589 = vst [vmem:[#allocation14_spill] sm:$0xff] %v4092_v34  ;;  %v232_v37 = vrot.slane %v4092_v34, 2  ;;  %v233_v43 = vrot.slane %v4092_v34, 3  ;;  %v234_v51 = vrot.slane %v4092_v34, 4  ;;  %v235_v59 = vrot.slane %v4092_v34, 5 }
  0xa5   :  { %v236_v3 = vrot.slane %v4092_v34, 6  ;;  %v237_v12 = vrot.slane %v4092_v34, 7 }
  0xa6   :  { %v4097_v38 = vperm.slane %v232_v37, 0  ;;  %v264_v45 = vperm.slane %v233_v43, 0  ;;  %v265_v53 = vperm.slane %v234_v51, 0  ;;  %v266_v61 = vperm.slane %v235_v59, 0 }
  0xa7   :  { %v267_v5 = vperm.slane %v236_v3, 0 }
  0xa8   :  { %v347_v46 = vmul.f32 %v264_v45, %v4092_v34  ;;  %v349_v54 = vmul.f32 %v265_v53, %v4092_v34  ;;  %v351_v62 = vmul.f32 %v266_v61, %v4092_v34 }
  0xa9   :  { %v140_v23 = vpop.f32.mrf.mxu3  ;;  %v353_v6 = vmul.f32 %v267_v5, %v4092_v34 }
  0xaa   :  { %v161_v24 = vadd.f32 %v156_v17, %v140_v23  ;;  %v268_v17 = vperm.slane %v237_v12, 0  ;;  %v223_v23 = vrot.slane %v4061_v16, 7 }
  0xac   :  { %176 = vrot.lane.b32.xlu1 %v161_v24, %s3969_s9  ;;  %v252_v24 = vperm.slane %v223_v23, 0 }
  0xae   :  { %v323_v26 = vmul.f32 %v252_v24, %v4061_v16 }
 0x10e   :  { %v4085_v31 = vpop.permute.xlu0 %172 }
 0x10f   :  { %5588 = vst [vmem:[#allocation13_spill] sm:$0xff] %v4085_v31  ;;  %2493 = vmatpush.msra.mxu0 %v4085_v31  ;;  %v310_v32 = vmul.f32 %v245_v18, %v4085_v31  ;;  %v312_v40 = vmul.f32 %v246_v35, %v4085_v31  ;;  %v314_v48 = vmul.f32 %v247_v44, %v4085_v31  ;;  %v227_v23 = vrot.slane %v4085_v31, 4 }
 0x110   :  { %v316_v56 = vmul.f32 %v248_v52, %v4085_v31  ;;  %v318_v0 = vmul.f32 %v249_v60, %v4085_v31  ;;  %v320_v9 = vmul.f32 %v250_v4, %v4085_v31  ;;  %v355_v18 = vmul.f32 %v268_v17, %v4092_v34 }
 0x111   :  { %3328 = vmatmul.msk.f32.gmra.mxu1 %vm101_vm0, %v310_v32  ;;  %2494 = vmatpush.msra.mxu0 %v4061_v16  ;;  %v322_v21 = vmul.f32 %v251_v15, %v4085_v31  ;;  %v324_v28 = vmul.f32 %v252_v24, %v4085_v31  ;;  %v253_v32 = vperm.slane %v4085_v31, 0 }
 0x113   :  { %v325_v35 = vmul.f32 %v253_v32, %v4061_v16  ;;  %v326_v42 = vmul.f32 %v253_v32, %v4085_v31 }
 0x117   :  { %v583_v13 = vpop.f32.mrf.mxu1 }
 0x118   :  { %v584_v14 = vadd.f32 %v583_v13, %v4145_v8 }
 0x119   :  { %3329 = vmatmul.msk.f32.gmra.mxu1 %vm101_vm0, %v311_v36 }
 0x11a   :  { %3629 = vtanh.f32 %v584_v14 }
 0x11e   :  { %v4099_v39 = vpop.permute.xlu1 %176 }
 0x11f   :  { %5590 = vst [vmem:[#allocation15_spill] sm:$0xff] %v4099_v39  ;;  %v346_v41 = vmul.f32 %v4097_v38, %v4099_v39  ;;  %v348_v49 = vmul.f32 %v264_v45, %v4099_v39  ;;  %v350_v57 = vmul.f32 %v265_v53, %v4099_v39  ;;  %v352_v1 = vmul.f32 %v266_v61, %v4099_v39 }
 0x120   :  { %v354_v10 = vmul.f32 %v267_v5, %v4099_v39  ;;  %v3630_v20 = vpop.eup %3629  ;;  %v356_v22 = vmul.f32 %v268_v17, %v4099_v39  ;;  %v269_v25 = vperm.slane %v4099_v39, 0  ;;  %v238_v30 = vrot.slane %v4099_v39, 1 }
 0x121   :  { %3330 = vmatmul.msk.f32.gmra.mxu1 %vm101_vm0, %v312_v40  ;;  %3364 = vmatmul.msk.f32.vlgmr.msrb.gmra.mxu3 %vm101_vm0, %v346_v41  ;;  %v224_v40 = vrot.slane %v4085_v31, 1  ;;  %v239_v44 = vrot.slane %v4099_v39, 2  ;;  %v225_v53 = vrot.slane %v4085_v31, 2  ;;  %v240_v58 = vrot.slane %v4099_v39, 3 }
 0x122   :  { %2527 = vmatpush.msrb.mxu3 %v4099_v39  ;;  %3392 = vmatmul.msk.f32.vlgmr.msrb.gmra.mxu0 %vm101_vm0, %v3630_v20  ;;  %v357_v27 = vmul.f32 %v269_v25, %v4092_v34  ;;  %v358_v29 = vmul.f32 %v269_v25, %v4099_v39  ;;  %v270_v33 = vperm.slane %v238_v30, 0  ;;  %v226_v5 = vrot.slane %v4085_v31, 3 }
 0x123   :  { %v254_v45 = vperm.slane %v224_v40, 0  ;;  %v255_v59 = vperm.slane %v225_v53, 0  ;;  %v272_v60 = vperm.slane %v240_v58, 0  ;;  %v241_v11 = vrot.slane %v4099_v39, 4 }
 0x124   :  { %2528 = vmatpush.msrb.mxu3 %v4092_v34  ;;  %v359_v36 = vmul.f32 %v270_v33, %v4092_v34  ;;  %v360_v43 = vmul.f32 %v270_v33, %v4099_v39  ;;  %v256_v12 = vperm.slane %v226_v5, 0 }
 0x125   :  { %v327_v50 = vmul.f32 %v254_v45, %v4061_v16  ;;  %v363_v2 = vmul.f32 %v272_v60, %v4092_v34  ;;  %v273_v13 = vperm.slane %v241_v11, 0 }
 0x127   :  { %v365_v20 = vmul.f32 %v273_v13, %v4092_v34 }
 0x129   :  { %3331 = vmatmul.msk.f32.gmra.mxu1 %vm101_vm0, %v313_v47  ;;  %3365 = vmatmul.msk.f32.gmra.mxu3 %vm101_vm0, %v347_v46  ;;  %v271_v46 = vperm.slane %v239_v44, 0 }
 0x12b   :  { %v361_v51 = vmul.f32 %v271_v46, %v4092_v34 }
 0x131   :  { %3332 = vmatmul.msk.f32.gmra.mxu1 %vm101_vm0, %v314_v48  ;;  %3366 = vmatmul.msk.f32.gmra.mxu3 %vm101_vm0, %v348_v49 }
 0x139   :  { %3333 = vmatmul.msk.f32.gmra.mxu1 %vm101_vm0, %v315_v55  ;;  %3367 = vmatmul.msk.f32.gmra.mxu3 %vm101_vm0, %v349_v54 }
 0x141   :  { %3334 = vmatmul.msk.f32.gmra.mxu1 %vm101_vm0, %v316_v56  ;;  %3368 = vmatmul.msk.f32.gmra.mxu3 %vm101_vm0, %v350_v57  ;;  %v328_v56 = vmul.f32 %v254_v45, %v4085_v31  ;;  %v362_v57 = vmul.f32 %v271_v46, %v4099_v39 }
 0x149   :  { %3335 = vmatmul.msk.f32.gmra.mxu1 %vm101_vm0, %v317_v63  ;;  %3369 = vmatmul.msk.f32.gmra.mxu3 %vm101_vm0, %v351_v62 }
 0x151   :  { %3336 = vmatmul.msk.f32.gmra.mxu1 %vm101_vm0, %v318_v0  ;;  %3370 = vmatmul.msk.f32.gmra.mxu3 %vm101_vm0, %v352_v1  ;;  %v329_v1 = vmul.f32 %v255_v59, %v4061_v16 }
 0x159   :  { %3337 = vmatmul.msk.f32.gmra.mxu1 %vm101_vm0, %v319_v7  ;;  %3371 = vmatmul.msk.f32.gmra.mxu3 %vm101_vm0, %v353_v6 }
 0x161   :  { %3338 = vmatmul.msk.f32.gmra.mxu1 %vm101_vm0, %v320_v9  ;;  %3372 = vmatmul.msk.f32.gmra.mxu3 %vm101_vm0, %v354_v10  ;;  %v330_v9 = vmul.f32 %v255_v59, %v4085_v31  ;;  %v364_v10 = vmul.f32 %v272_v60, %v4099_v39 }
 0x169   :  { %3339 = vmatmul.msk.f32.gmra.mxu1 %vm101_vm0, %v321_v19  ;;  %3373 = vmatmul.msk.f32.gmra.mxu3 %vm101_vm0, %v355_v18  ;;  %v331_v19 = vmul.f32 %v256_v12, %v4061_v16 }
 0x171   :  { %3340 = vmatmul.msk.f32.gmra.mxu1 %vm101_vm0, %v322_v21  ;;  %3374 = vmatmul.msk.f32.gmra.mxu3 %vm101_vm0, %v356_v22 }
 0x179   :  { %3341 = vmatmul.msk.f32.gmra.mxu1 %vm101_vm0, %v323_v26  ;;  %3375 = vmatmul.msk.f32.gmra.mxu3 %vm101_vm0, %v357_v27  ;;  %v332_v26 = vmul.f32 %v256_v12, %v4085_v31  ;;  %v366_v27 = vmul.f32 %v273_v13, %v4099_v39 }
 0x181   :  { %3342 = vmatmul.msk.f32.gmra.mxu1 %vm101_vm0, %v324_v28  ;;  %3376 = vmatmul.msk.f32.gmra.mxu3 %vm101_vm0, %v358_v29  ;;  %v242_v28 = vrot.slane %v4099_v39, 5  ;;  %v257_v29 = vperm.slane %v227_v23, 0 }
 0x183   :  { %v274_v30 = vperm.slane %v242_v28, 0  ;;  %v334_v46 = vmul.f32 %v257_v29, %v4085_v31 }
 0x185   :  { %v367_v40 = vmul.f32 %v274_v30, %v4092_v34 }
 0x189   :  { %3343 = vmatmul.msk.f32.gmra.mxu1 %vm101_vm0, %v325_v35  ;;  %3377 = vmatmul.msk.f32.gmra.mxu3 %vm101_vm0, %v359_v36 }
 0x18e   :  { %v586_v37 = vpop.f32.mrf.mxu1 }
 0x18f   :  { %v587_v41 = vadd.f32 %v586_v37, %v4145_v8  ;;  %v333_v37 = vmul.f32 %v257_v29, %v4061_v16 }
 0x191   :  { %3631 = vtanh.f32 %v587_v41  ;;  %3344 = vmatmul.msk.f32.gmra.mxu1 %vm101_vm0, %v326_v42  ;;  %3378 = vmatmul.msk.f32.gmra.mxu3 %vm101_vm0, %v360_v43  ;;  %v228_v43 = vrot.slane %v4085_v31, 5 }
 0x196   :  { %v589_v47 = vpop.f32.mrf.mxu1 }
 0x197   :  { %v3632_v48 = vpop.eup %3631  ;;  %v590_v49 = vadd.f32 %v589_v47, %v4145_v8  ;;  %v368_v47 = vmul.f32 %v274_v30, %v4099_v39 }
 0x198   :  { %3393 = vmatmul.msk.f32.gmra.mxu0 %vm101_vm0, %v3632_v48  ;;  %v243_v48 = vrot.slane %v4099_v39, 6 }
 0x199   :  { %3633 = vtanh.f32 %v590_v49  ;;  %3345 = vmatmul.msk.f32.gmra.mxu1 %vm101_vm0, %v327_v50  ;;  %3379 = vmatmul.msk.f32.gmra.mxu3 %vm101_vm0, %v361_v51  ;;  %v258_v49 = vperm.slane %v228_v43, 0 }
 0x19a   :  { %v275_v50 = vperm.slane %v243_v48, 0 }
 0x19b   :  { %v335_v58 = vmul.f32 %v258_v49, %v4061_v16 }
 0x19c   :  { %v369_v59 = vmul.f32 %v275_v50, %v4092_v34 }
 0x19e   :  { %v592_v52 = vpop.f32.mrf.mxu1 }
 0x19f   :  { %v3634_v54 = vpop.eup %3633  ;;  %v593_v55 = vadd.f32 %v592_v52, %v4145_v8  ;;  %v187_v52 = vsel %vm101_vm0, %v4085_v31, 0.0  ;;  %v1052_v30 = vpop.f32.mrf.mxu0 }
 0x1a0   :  { %3394 = vmatmul.msk.f32.gmra.mxu0 %vm101_vm0, %v3634_v54  ;;  %v186_v54 = vsel %vm101_vm0, %v4061_v16, 0.0 }
 0x1a1   :  { %3635 = vtanh.f32 %v593_v55  ;;  %3346 = vmatmul.msk.f32.gmra.mxu1 %vm101_vm0, %v328_v56  ;;  %3380 = vmatmul.msk.f32.gmra.mxu3 %vm101_vm0, %v362_v57  ;;  %v3970_v55 = vmov 16.0   ;;  %v188_v60 = vadd.f32 %v187_v52, %v186_v54 }
 0x1a4   :  { %v4200_v61 = vpop.f32.mrf.mxu3 }
 0x1a6   :  { %v595_v62 = vpop.f32.mrf.mxu1 }
 0x1a7   :  { %v3636_v63 = vpop.eup %3635  ;;  %v596_v0 = vadd.f32 %v595_v62, %v4145_v8  ;;  %v189_v62 = vrot.slane %v188_v60, 4 }
 0x1a8   :  { %3395 = vmatmul.msk.f32.gmra.mxu0 %vm101_vm0, %v3636_v63 }
 0x1a9   :  { %3637 = vtanh.f32 %v596_v0  ;;  %3347 = vmatmul.msk.f32.gmra.mxu1 %vm101_vm0, %v329_v1  ;;  %3381 = vmatmul.msk.f32.gmra.mxu3 %vm101_vm0, %v363_v2  ;;  %v336_v2 = vmul.f32 %v258_v49, %v4085_v31 }
 0x1ac   :  { %v4208_v3 = vpop.f32.mrf.mxu3 }
 0x1ae   :  { %v598_v4 = vpop.f32.mrf.mxu1 }
 0x1af   :  { %v3638_v6 = vpop.eup %3637  ;;  %v599_v7 = vadd.f32 %v598_v4, %v4145_v8  ;;  %v229_v4 = vrot.slane %v4085_v31, 6 }
 0x1b0   :  { %3396 = vmatmul.msk.f32.gmra.mxu0 %vm101_vm0, %v3638_v6 }
 0x1b1   :  { %3639 = vtanh.f32 %v599_v7  ;;  %3348 = vmatmul.msk.f32.gmra.mxu1 %vm101_vm0, %v330_v9  ;;  %3382 = vmatmul.msk.f32.gmra.mxu3 %vm101_vm0, %v364_v10  ;;  %v370_v7 = vmul.f32 %v275_v50, %v4099_v39  ;;  %v244_v9 = vrot.slane %v4099_v39, 7  ;;  %v190_v10 = vadd.f32 %v189_v62, %v188_v60 }
 0x1b2   :  { %v259_v12 = vperm.slane %v229_v4, 0 }
 0x1b3   :  { %v276_v13 = vperm.slane %v244_v9, 0 }
 0x1b4   :  { %v4218_v14 = vpop.f32.mrf.mxu3  ;;  %v337_v23 = vmul.f32 %v259_v12, %v4061_v16 }
 0x1b5   :  { %v372_v48 = vmul.f32 %v276_v13, %v4099_v39 }
 0x1b6   :  { %v601_v15 = vpop.f32.mrf.mxu1 }
 0x1b7   :  { %v3640_v17 = vpop.eup %3639  ;;  %v602_v18 = vadd.f32 %v601_v15, %v4145_v8  ;;  %v191_v15 = vrot.slane %v190_v10, 2 }
 0x1b8   :  { %3397 = vmatmul.msk.f32.gmra.mxu0 %vm101_vm0, %v3640_v17 }
 0x1b9   :  { %3641 = vtanh.f32 %v602_v18  ;;  %3349 = vmatmul.msk.f32.gmra.mxu1 %vm101_vm0, %v331_v19  ;;  %3383 = vmatmul.msk.f32.gmra.mxu3 %vm101_vm0, %v365_v20  ;;  %v195_v19 = vsel %vm101_vm0, %v4092_v34, 0.0  ;;  %v196_v20 = vsel %vm101_vm0, %v4099_v39, 0.0 }
 0x1ba   :  { %v197_v28 = vadd.f32 %v196_v20, %v195_v19 }
 0x1bc   :  { %v4226_v21 = vpop.f32.mrf.mxu3 }
 0x1be   :  { %v604_v22 = vpop.f32.mrf.mxu1 }
 0x1bf   :  { %v3642_v24 = vpop.eup %3641  ;;  %v605_v25 = vadd.f32 %v604_v22, %v4145_v8 }
 0x1c0   :  { %3398 = vmatmul.msk.f32.gmra.mxu0 %vm101_vm0, %v3642_v24 }
 0x1c1   :  { %3643 = vtanh.f32 %v605_v25  ;;  %3350 = vmatmul.msk.f32.gmra.mxu1 %vm101_vm0, %v332_v26  ;;  %3384 = vmatmul.msk.f32.gmra.mxu3 %vm101_vm0, %v366_v27  ;;  %v371_v26 = vmul.f32 %v276_v13, %v4092_v34  ;;  %v192_v27 = vadd.f32 %v191_v15, %v190_v10  ;;  %v261_v13 = vperm.slane %v4092_v34, 0 }
 0x1c3   :  { %v341_v20 = vmul.f32 %v261_v13, %v4092_v34 }
 0x1c4   :  { %v4236_v32 = vpop.f32.mrf.mxu3 }
 0x1c6   :  { %v607_v33 = vpop.f32.mrf.mxu1 }
 0x1c7   :  { %v3644_v35 = vpop.eup %3643  ;;  %v608_v36 = vadd.f32 %v607_v33, %v4145_v8  ;;  %v5571_v33 = vmov 0  }
 0x1c8   :  { %3399 = vmatmul.msk.f32.gmra.mxu0 %vm101_vm0, %v3644_v35  ;;  %3526 = vset.pattern.permute.xlu2 %v5571_v33  ;;  %v5579_v35 = vmov 2  }
 0x1c9   :  { %3645 = vtanh.f32 %v608_v36  ;;  %3351 = vmatmul.msk.f32.gmra.mxu1 %vm101_vm0, %v333_v37  ;;  %3385 = vmatmul.msk.f32.gmra.mxu3 %vm101_vm0, %v367_v40  ;;  %v193_v36 = vrot.slane %v192_v27, 1  ;;  %v198_v37 = vrot.slane %v197_v28, 4 }
 0x1ca   :  { %3525 = vset.pattern.permute.xlu0 %v5579_v35  ;;  %1980 = vperm.xlu2 %3526, %v1052_v30  }
 0x1cb   :  { %1652 = vperm.xlu0 %3525, %v1052_v30   ;;  %3527 = vset.pattern.permute.xlu1 %v5579_v35  ;;  %v194_v49 = vadd.f32 %v193_v36, %v192_v27  ;;  %v199_v50 = vadd.f32 %v198_v37, %v197_v28  ;;  %v342_v27 = vmul.f32 %v261_v13, %v4099_v39 }
 0x1cc   :  { %v4244_v41 = vpop.f32.mrf.mxu3 }
 0x1ce   :  { %v610_v42 = vpop.f32.mrf.mxu1 }
 0x1cf   :  { %v3646_v44 = vpop.eup %3645  ;;  %v611_v45 = vadd.f32 %v610_v42, %v4145_v8 }
 0x1d0   :  { %3400 = vmatmul.msk.f32.gmra.mxu0 %vm101_vm0, %v3646_v44  ;;  %v338_v44 = vmul.f32 %v259_v12, %v4085_v31 }
 0x1d1   :  { %3647 = vtanh.f32 %v611_v45  ;;  %3352 = vmatmul.msk.f32.gmra.mxu1 %vm101_vm0, %v334_v46  ;;  %3386 = vmatmul.msk.f32.gmra.mxu3 %vm101_vm0, %v368_v47  ;;  %v230_v45 = vrot.slane %v4085_v31, 7 }
 0x1d2   :  { %3649 = vrcp.f32 %v3970_v55  ;;  %v200_v55 = vrot.slane %v199_v50, 2  ;;  %3529 = vset.pattern.permute.xlu2 %v5579_v35 }
 0x1d3   :  { %3528 = vset.pattern.permute.xlu0 %v5571_v33 }
 0x1d4   :  { %v4254_v51 = vpop.f32.mrf.mxu3 }
 0x1d6   :  { %v613_v53 = vpop.f32.mrf.mxu1 }
 0x1d7   :  { %v3648_v56 = vpop.eup %3647  ;;  %v614_v57 = vadd.f32 %v613_v53, %v4145_v8  ;;  %v260_v53 = vperm.slane %v230_v45, 0 }
 0x1d8   :  { %3401 = vmatmul.msk.f32.gmra.mxu0 %vm101_vm0, %v3648_v56  ;;  %v3650_v63 = vpop.eup %3649 }
 0x1d9   :  { %3651 = vtanh.f32 %v614_v57  ;;  %3353 = vmatmul.msk.f32.gmra.mxu1 %vm101_vm0, %v335_v58  ;;  %3387 = vmatmul.msk.f32.gmra.mxu3 %vm101_vm0, %v369_v59  ;;  %v205_v11 = vmul.f32 16.0, %v3650_v63  ;;  %vm209_vm1 = vweird.f32 %v3650_v63  ;;  %v339_v60 = vmul.f32 %v260_v53, %v4061_v16 }
 0x1db   :  { %v206_v18 = vsub.f32 1.0, %v205_v11 }
 0x1dc   :  { %v4266_v0 = vpop.f32.mrf.mxu3 }
 0x1dd   :  { %v207_v29 = vmul.f32 %v3650_v63, %v206_v18 }
 0x1de   :  { %v616_v1 = vpop.f32.mrf.mxu1 }
 0x1df   :  { %v3652_v5 = vpop.eup %3651  ;;  %v617_v6 = vadd.f32 %v616_v1, %v4145_v8  ;;  %v208_v42 = vadd.f32 %v3650_v63, %v207_v29  ;;  %v231_v29 = vrot.slane %v4092_v34, 1 }
 0x1e0   :  { %3402 = vmatmul.msk.f32.gmra.mxu0 %vm101_vm0, %v3652_v5 }
 0x1e1   :  { %3653 = vtanh.f32 %v617_v6  ;;  %3354 = vmatmul.msk.f32.gmra.mxu1 %vm101_vm0, %v336_v2  ;;  %3388 = vmatmul.msk.f32.gmra.mxu3 %vm101_vm0, %v370_v7  ;;  %v210_v52 = vsel %vm209_vm1, %v3650_v63, %v208_v42  ;;  %v201_v63 = vadd.f32 %v200_v55, %v199_v50  ;;  %v340_v7 = vmul.f32 %v260_v53, %v4085_v31 }
 0x1e2   :  { %v4300_v54 = vmul.f32 %v210_v52, %v194_v49  ;;  %v262_v37 = vperm.slane %v231_v29, 0 }
 0x1e3   :  { %v202_v1 = vrot.slane %v201_v63, 1 }
 0x1e4   :  { %v4276_v17 = vpop.f32.mrf.mxu3  ;;  %5591 = vst [vmem:[#allocation16_spill] sm:$0xff] %v4300_v54  ;;  %v2348_v62 = vmul.f32 %v4300_v54, %v4061_v16  ;;  %v2349_v9 = vmul.f32 %v4300_v54, %v4085_v31  ;;  %v343_v45 = vmul.f32 %v262_v37, %v4092_v34 }
 0x1e5   :  { %v203_v10 = vadd.f32 %v202_v1, %v201_v63 }
 0x1e6   :  { %v619_v22 = vpop.f32.mrf.mxu1 }
 0x1e7   :  { %v3654_v24 = vpop.eup %3653  ;;  %v620_v25 = vadd.f32 %v619_v22, %v4145_v8  ;;  %v4322_v11 = vmul.f32 %v210_v52, %v203_v10  ;;  %v344_v52 = vmul.f32 %v262_v37, %v4099_v39 }
 0x1e8   :  { %3403 = vmatmul.msk.f32.gmra.mxu0 %vm101_vm0, %v3654_v24 }
 0x1e9   :  { %3655 = vtanh.f32 %v620_v25  ;;  %3355 = vmatmul.msk.f32.gmra.mxu1 %vm101_vm0, %v337_v23  ;;  %3389 = vmatmul.msk.f32.gmra.mxu3 %vm101_vm0, %v371_v26  ;;  %5592 = vst [vmem:[#allocation17_spill] sm:$0xff] %v4322_v11  ;;  %v2350_v22 = vmul.f32 %v4322_v11, %v4092_v34  ;;  %v2351_v28 = vmul.f32 %v4322_v11, %v4099_v39 }
 0x1ea   :  { %v719_v11 = vadd.f32 %v4276_v17, %v4145_v8 }
 0x1ec   :  { %v4290_v40 = vpop.f32.mrf.mxu3 }
 0x1ed   :  { %v722_v54 = vadd.f32 %v4290_v40, %v4145_v8 }
 0x1ee   :  { %v622_v43 = vpop.f32.mrf.mxu1 }
 0x1ef   :  { %v3656_v46 = vpop.eup %3655  ;;  %v623_v47 = vadd.f32 %v622_v43, %v4145_v8 }
 0x1f0   :  { %3404 = vmatmul.msk.f32.gmra.mxu0 %vm101_vm0, %v3656_v46 }
 0x1f1   :  { %3657 = vtanh.f32 %v623_v47  ;;  %3356 = vmatmul.msk.f32.gmra.mxu1 %vm101_vm0, %v338_v44  ;;  %3390 = vmatmul.msk.f32.gmra.mxu3 %vm101_vm0, %v372_v48 }
 0x1f4   :  { %v4304_v56 = vpop.f32.mrf.mxu3 }
 0x1f6   :  { %v625_v57 = vpop.f32.mrf.mxu1 }
 0x1f7   :  { %v3658_v58 = vpop.eup %3657  ;;  %v626_v59 = vadd.f32 %v625_v57, %v4145_v8 }
 0x1f8   :  { %3405 = vmatmul.msk.f32.gmra.mxu0 %vm101_vm0, %v3658_v58 }
 0x1f9   :  { %3659 = vtanh.f32 %v626_v59  ;;  %3357 = vmatmul.msk.f32.gmra.mxu1 %vm101_vm0, %v339_v60  ;;  %3456 = vmatmul.msk.f32.vlgmr.msra.gmra.mxu3 %vm101_vm0, %v2348_v62  ;;  %v345_v60 = vmul.f32 %v4097_v38, %v4092_v34  ;;  %v725_v34 = vadd.f32 %v4304_v56, %v4145_v8  ;;  %v5601_v56 = vmov 2  }
 0x1fc   :  { %v4313_v2 = vpop.f32.mrf.mxu3 }
 0x1fe   :  { %v628_v4 = vpop.f32.mrf.mxu1 }
 0x1ff   :  { %v3660_v5 = vpop.eup %3659  ;;  %v629_v6 = vadd.f32 %v628_v4, %v4145_v8 }
 0x200   :  { %3406 = vmatmul.msk.f32.gmra.mxu0 %vm101_vm0, %v3660_v5 }
 0x201   :  { %3661 = vtanh.f32 %v629_v6  ;;  %3358 = vmatmul.msk.f32.gmra.mxu1 %vm101_vm0, %v340_v7  ;;  %3457 = vmatmul.msk.f32.gmra.mxu3 %vm101_vm0, %v2349_v9 }
 0x204   :  { %v4324_v12 = vpop.f32.mrf.mxu3 }
 0x206   :  { %v631_v15 = vpop.f32.mrf.mxu1 }
 0x207   :  { %v3662_v18 = vpop.eup %3661  ;;  %v632_v19 = vadd.f32 %v631_v15, %v4145_v8 }
 0x208   :  { %3407 = vmatmul.msk.f32.gmra.mxu0 %vm101_vm0, %v3662_v18 }
 0x209   :  { %3663 = vtanh.f32 %v632_v19  ;;  %3359 = vmatmul.msk.f32.gmra.mxu1 %vm101_vm0, %v341_v20  ;;  %3458 = vmatmul.msk.f32.gmra.mxu3 %vm101_vm0, %v2350_v22 }
 0x20c   :  { %v4334_v23 = vpop.f32.mrf.mxu3 }
 0x20e   :  { %v634_v24 = vpop.f32.mrf.mxu1 }
 0x20f   :  { %v3664_v25 = vpop.eup %3663  ;;  %v635_v26 = vadd.f32 %v634_v24, %v4145_v8 }
 0x210   :  { %3408 = vmatmul.msk.f32.gmra.mxu0 %vm101_vm0, %v3664_v25 }
 0x211   :  { %3665 = vtanh.f32 %v635_v26  ;;  %3360 = vmatmul.msk.f32.gmra.mxu1 %vm101_vm0, %v342_v27  ;;  %3459 = vmatmul.msk.f32.gmra.mxu3 %vm101_vm0, %v2351_v28 }
 0x214   :  { %v4344_v30 = vpop.f32.mrf.mxu3 }
 0x215   :  { %v1055_v36 = vpop.f32.mrf.mxu0 }
 0x216   :  { %1983 = vperm.xlu0 %3528, %v1055_v36   ;;  %1655 = vperm.xlu1 %3527, %v1055_v36   ;;  %v637_v42 = vpop.f32.mrf.mxu1 }
 0x217   :  { %v3666_v43 = vpop.eup %3665  ;;  %v638_v44 = vadd.f32 %v637_v42, %v4145_v8 }
 0x218   :  { %3409 = vmatmul.msk.f32.gmra.mxu0 %vm101_vm0, %v3666_v43 }
 0x219   :  { %3667 = vtanh.f32 %v638_v44  ;;  %3361 = vmatmul.msk.f32.gmra.mxu1 %vm101_vm0, %v343_v45 }
 0x21c   :  { %v4350_v46 = vpop.f32.mrf.mxu3 }
 0x21d   :  { %v1058_v47 = vpop.f32.mrf.mxu0 }
 0x21e   :  { %3530 = vset.pattern.permute.xlu1 %v5571_v33  ;;  %v640_v48 = vpop.f32.mrf.mxu1  ;;  %1658 = vperm.xlu2 %3529, %v1058_v47  }
 0x21f   :  { %v3668_v49 = vpop.eup %3667  ;;  %v641_v50 = vadd.f32 %v640_v48, %v4145_v8  ;;  %1986 = vperm.xlu1 %3530, %v1058_v47   ;;  %3535 = vset.pattern.permute.xlu0 %v5579_v35 }
 0x220   :  { %3410 = vmatmul.msk.f32.gmra.mxu0 %vm101_vm0, %v3668_v49 }
 0x221   :  { %3669 = vtanh.f32 %v641_v50  ;;  %3362 = vmatmul.msk.f32.gmra.mxu1 %vm101_vm0, %v344_v52 }
 0x224   :  { %v4358_v53 = vpop.f32.mrf.mxu3 }
 0x225   :  { %v1061_v55 = vpop.f32.mrf.mxu0 }
 0x226   :  { %v643_v57 = vpop.f32.mrf.mxu1  ;;  %3532 = vset.pattern.permute.xlu2 %v5571_v33 }
 0x227   :  { %v3670_v58 = vpop.eup %3669  ;;  %v644_v59 = vadd.f32 %v643_v57, %v4145_v8  ;;  %3531 = vset.pattern.permute.xlu1 %v5579_v35  ;;  %1989 = vperm.xlu2 %3532, %v1061_v55  }
 0x228   :  { %3411 = vmatmul.msk.f32.gmra.mxu0 %vm101_vm0, %v3670_v58  ;;  %1661 = vperm.xlu1 %3531, %v1061_v55  }
 0x229   :  { %3671 = vtanh.f32 %v644_v59  ;;  %3363 = vmatmul.msk.f32.gmra.mxu1 %vm101_vm0, %v345_v60 }
 0x22c   :  { %v4367_v62 = vpop.f32.mrf.mxu3 }
 0x22d   :  { %v1064_v63 = vpop.f32.mrf.mxu0 }
 0x22e   :  { %v646_v1 = vpop.f32.mrf.mxu1 }
 0x22f   :  { %v3672_v4 = vpop.eup %3671  ;;  %v647_v5 = vadd.f32 %v646_v1, %v4145_v8  ;;  %3533 = vset.pattern.permute.xlu2 %v5579_v35 }
 0x230   :  { %3412 = vmatmul.msk.f32.gmra.mxu0 %vm101_vm0, %v3672_v4  ;;  %3534 = vset.pattern.permute.xlu1 %v5571_v33 }
 0x231   :  { %3673 = vtanh.f32 %v647_v5  ;;  %1664 = vperm.xlu2 %3533, %v1064_v63   ;;  %1992 = vperm.xlu1 %3534, %v1064_v63  }
 0x234   :  { %v4373_v38 = vpop.f32.mrf.mxu3 }
 0x235   :  { %v1067_v6 = vpop.f32.mrf.mxu0 }
 0x236   :  { %v649_v7 = vpop.f32.mrf.mxu1  ;;  %1667 = vperm.xlu0 %3535, %v1067_v6  }
 0x237   :  { %v3674_v9 = vpop.eup %3673  ;;  %v650_v10 = vadd.f32 %v649_v7, %v4145_v8 }
 0x238   :  { %3413 = vmatmul.msk.f32.gmra.mxu0 %vm101_vm0, %v3674_v9 }
 0x239   :  { %3675 = vtanh.f32 %v650_v10  ;;  %3536 = vset.pattern.permute.xlu2 %v5571_v33  ;;  %3537 = vset.pattern.permute.xlu1 %v5579_v35 }
 0x23a   :  { %1995 = vperm.xlu2 %3536, %v1067_v6  }
 0x23c   :  { %v4379_v13 = vpop.f32.mrf.mxu3 }
 0x23d   :  { %v1070_v15 = vpop.f32.mrf.mxu0 }
 0x23e   :  { %v652_v18 = vpop.f32.mrf.mxu1  ;;  %3538 = vset.pattern.permute.xlu0 %v5571_v33  ;;  %1670 = vperm.xlu1 %3537, %v1070_v15  }
 0x23f   :  { %v3676_v19 = vpop.eup %3675  ;;  %v653_v20 = vadd.f32 %v652_v18, %v4145_v8  ;;  %1998 = vperm.xlu0 %3538, %v1070_v15  }
 0x240   :  { %3414 = vmatmul.msk.f32.gmra.mxu0 %vm101_vm0, %v3676_v19 }
 0x241   :  { %3677 = vtanh.f32 %v653_v20 }
 0x242   :  { %3539 = vset.pattern.permute.xlu2 %v5579_v35 }
 0x244   :  { %v4385_v22 = vpop.f32.mrf.mxu3 }
 0x245   :  { %v1073_v24 = vpop.f32.mrf.mxu0 }
 0x246   :  { %v655_v25 = vpop.f32.mrf.mxu1  ;;  %3540 = vset.pattern.permute.xlu1 %v5571_v33  ;;  %1673 = vperm.xlu2 %3539, %v1073_v24  }
 0x247   :  { %v3678_v26 = vpop.eup %3677  ;;  %v656_v27 = vadd.f32 %v655_v25, %v4145_v8  ;;  %2001 = vperm.xlu1 %3540, %v1073_v24   ;;  %3541 = vset.pattern.permute.xlu0 %v5579_v35 }
 0x248   :  { %3415 = vmatmul.msk.f32.gmra.mxu0 %vm101_vm0, %v3678_v26 }
 0x249   :  { %3679 = vtanh.f32 %v656_v27 }
 0x24c   :  { %v4391_v28 = vpop.f32.mrf.mxu3 }
 0x24d   :  { %v1076_v29 = vpop.f32.mrf.mxu0 }
 0x24e   :  { %v658_v36 = vpop.f32.mrf.mxu1  ;;  %3542 = vset.pattern.permute.xlu2 %v5571_v33  ;;  %1676 = vperm.xlu0 %3541, %v1076_v29  }
 0x24f   :  { %v3680_v37 = vpop.eup %3679  ;;  %v659_v42 = vadd.f32 %v658_v36, %v4145_v8  ;;  %2004 = vperm.xlu2 %3542, %v1076_v29   ;;  %3543 = vset.pattern.permute.xlu1 %v5579_v35 }
 0x250   :  { %3416 = vmatmul.msk.f32.gmra.mxu0 %vm101_vm0, %v3680_v37 }
 0x251   :  { %3681 = vtanh.f32 %v659_v42 }
 0x254   :  { %v4397_v43 = vpop.f32.mrf.mxu3 }
 0x255   :  { %v1079_v44 = vpop.f32.mrf.mxu0 }
 0x256   :  { %v661_v45 = vpop.f32.mrf.mxu1  ;;  %3544 = vset.pattern.permute.xlu0 %v5571_v33  ;;  %1679 = vperm.xlu1 %3543, %v1079_v44  }
 0x257   :  { %v3682_v47 = vpop.eup %3681  ;;  %v662_v48 = vadd.f32 %v661_v45, %v4145_v8  ;;  %2007 = vperm.xlu0 %3544, %v1079_v44   ;;  %3545 = vset.pattern.permute.xlu2 %v5579_v35 }
 0x258   :  { %3417 = vmatmul.msk.f32.gmra.mxu0 %vm101_vm0, %v3682_v47  ;;  %v5573_v47 = vmov 1  }
 0x259   :  { %3683 = vtanh.f32 %v662_v48  ;;  %v3859_v48 = vld [vmem:[#allocation7] sm:$0xff] }
 0x25c   :  { %v4403_v49 = vpop.f32.mrf.mxu3 }
 0x25d   :  { %v1082_v50 = vpop.f32.mrf.mxu0 }
 0x25e   :  { %v664_v52 = vpop.f32.mrf.mxu1  ;;  %1682 = vperm.xlu1 %3543, %v1082_v50  }
 0x25f   :  { %v3684_v55 = vpop.eup %3683  ;;  %v665_v57 = vadd.f32 %v664_v52, %v4145_v8  ;;  %2010 = vperm.xlu0 %3544, %v1082_v50   ;;  %v4435_v50 = vperm.slane %v3859_v48, 1 }
 0x260   :  { %3418 = vmatmul.msk.f32.vlgmr.msra.gmra.mxu2 %vm101_vm0, %v3684_v55 }
 0x261   :  { %3685 = vtanh.f32 %v665_v57  ;;  %5596 = vst [vmem:[#allocation21_spill] sm:$0xff] %v4435_v50 }
 0x264   :  { %v4407_v58 = vpop.f32.mrf.mxu3 }
 0x265   :  { %v1085_v59 = vpop.f32.mrf.mxu0 }
 0x266   :  { %v667_v60 = vpop.f32.mrf.mxu1  ;;  %3546 = vset.pattern.permute.xlu1 %v5571_v33  ;;  %1685 = vperm.xlu2 %3545, %v1085_v59  }
 0x267   :  { %v3686_v63 = vpop.eup %3685  ;;  %v668_v1 = vadd.f32 %v667_v60, %v4145_v8  ;;  %2013 = vperm.xlu1 %3546, %v1085_v59   ;;  %3547 = vset.pattern.permute.xlu0 %v5579_v35 }
 0x268   :  { %3419 = vmatmul.msk.f32.gmra.mxu2 %vm101_vm0, %v3686_v63 }
 0x269   :  { %3687 = vtanh.f32 %v668_v1  ;;  %v4440_v1 = vpop.permute.xlu2 %1980 }
 0x26c   :  { %v4413_v4 = vpop.f32.mrf.mxu3 }
 0x26d   :  { %v1088_v5 = vpop.f32.mrf.mxu0 }
 0x26e   :  { %v670_v6 = vpop.f32.mrf.mxu1  ;;  %1688 = vperm.xlu2 %3545, %v1088_v5  }
 0x26f   :  { %v3688_v7 = vpop.eup %3687  ;;  %v671_v9 = vadd.f32 %v670_v6, %v4145_v8  ;;  %2016 = vperm.xlu1 %3546, %v1088_v5  }
 0x270   :  { %3420 = vmatmul.msk.f32.gmra.mxu2 %vm101_vm0, %v3688_v7  ;;  %v4445_v7 = vperm.slane %v3859_v48, 5 }
 0x271   :  { %3689 = vtanh.f32 %v671_v9 }
 0x272   :  { %5597 = vst [vmem:[#allocation22_spill] sm:$0xff] %v4445_v7 }
 0x274   :  { %v4417_v10 = vpop.f32.mrf.mxu3 }
 0x275   :  { %5593 = vst [vmem:[#allocation18_spill] sm:$0xff] %v4417_v10  ;;  %v1091_v15 = vpop.f32.mrf.mxu0 }
 0x276   :  { %v673_v18 = vpop.f32.mrf.mxu1  ;;  %3548 = vset.pattern.permute.xlu2 %v5571_v33  ;;  %1691 = vperm.xlu0 %3547, %v1091_v15  }
 0x277   :  { %v3690_v19 = vpop.eup %3689  ;;  %v674_v20 = vadd.f32 %v673_v18, %v4145_v8  ;;  %2019 = vperm.xlu2 %3548, %v1091_v15   ;;  %3549 = vset.pattern.permute.xlu1 %v5579_v35 }
 0x278   :  { %3421 = vmatmul.msk.f32.gmra.mxu2 %vm101_vm0, %v3690_v19 }
 0x279   :  { %3691 = vtanh.f32 %v674_v20 }
 0x27c   :  { %v4423_v24 = vpop.f32.mrf.mxu3 }
 0x27d   :  { %5594 = vst [vmem:[#allocation19_spill] sm:$0xff] %v4423_v24  ;;  %v1094_v25 = vpop.f32.mrf.mxu0 }
 0x27e   :  { %v676_v26 = vpop.f32.mrf.mxu1  ;;  %3550 = vset.pattern.permute.xlu0 %v5571_v33  ;;  %1694 = vperm.xlu1 %3549, %v1094_v25  }
 0x27f   :  { %v3692_v27 = vpop.eup %3691  ;;  %v677_v29 = vadd.f32 %v676_v26, %v4145_v8  ;;  %2022 = vperm.xlu0 %3550, %v1094_v25   ;;  %3551 = vset.pattern.permute.xlu2 %v5579_v35 }
 0x280   :  { %3422 = vmatmul.msk.f32.gmra.mxu2 %vm101_vm0, %v3692_v27  ;;  %v4453_v27 = vpop.permute.xlu2 %1658 }
 0x281   :  { %3693 = vtanh.f32 %v677_v29 }
 0x284   :  { %v4429_v36 = vpop.f32.mrf.mxu3 }
 0x285   :  { %5595 = vst [vmem:[#allocation20_spill] sm:$0xff] %v4429_v36  ;;  %v1097_v37 = vpop.f32.mrf.mxu0 }
 0x286   :  { %v679_v42 = vpop.f32.mrf.mxu1  ;;  %3552 = vset.pattern.permute.xlu1 %v5571_v33  ;;  %1697 = vperm.xlu2 %3551, %v1097_v37  }
 0x287   :  { %v3694_v44 = vpop.eup %3693  ;;  %v680_v45 = vadd.f32 %v679_v42, %v4145_v8  ;;  %2025 = vperm.xlu1 %3552, %v1097_v37   ;;  %3557 = vset.pattern.permute.xlu0 %v5573_v47 }
 0x288   :  { %3423 = vmatmul.msk.f32.gmra.mxu2 %vm101_vm0, %v3694_v44  ;;  %v4443_v5 = vpop.permute.xlu1 %1655 }
 0x289   :  { %3695 = vtanh.f32 %v680_v45 }
 0x28c   :  { %v2388_v52 = vpop.f32.mrf.mxu3 }
 0x28d   :  { %v2389_v55 = vadd.f32 %v2388_v52, %v4435_v50  ;;  %v1100_v57 = vpop.f32.mrf.mxu0 }
 0x28e   :  { %v682_v59 = vpop.f32.mrf.mxu1  ;;  %1700 = vperm.xlu2 %3551, %v1100_v57  }
 0x28f   :  { %v3696_v60 = vpop.eup %3695  ;;  %3697 = vtanh.f32 %v2389_v55  ;;  %v683_v63 = vadd.f32 %v682_v59, %v4145_v8  ;;  %3553 = vset.pattern.permute.xlu1 %v5573_v47  ;;  %v4465_v55 = vpop.permute.xlu2 %1989 }
 0x290   :  { %3424 = vmatmul.msk.f32.gmra.mxu2 %vm101_vm0, %v3696_v60  ;;  %1371 = vperm.xlu1 %3553, %v1100_v57  }
 0x291   :  { %3699 = vtanh.f32 %v683_v63  ;;  %v4457_v29 = vpop.permute.xlu1 %1986 }
 0x294   :  { %v2391_v6 = vpop.f32.mrf.mxu3 }
 0x295   :  { %v3698_v9 = vpop.eup %3697  ;;  %v2392_v15 = vadd.f32 %v2391_v6, %v4435_v50  ;;  %v1103_v18 = vpop.f32.mrf.mxu0 }
 0x296   :  { %v685_v19 = vpop.f32.mrf.mxu1  ;;  %3554 = vset.pattern.permute.xlu2 %v5573_v47  ;;  %v4450_v20 = vmul.f32 %v3698_v9, %v4445_v7 }
 0x297   :  { %v3700_v25 = vpop.eup %3699  ;;  %3701 = vtanh.f32 %v2392_v15  ;;  %v686_v26 = vadd.f32 %v685_v19, %v4145_v8  ;;  %1374 = vperm.xlu2 %3554, %v1103_v18   ;;  %v4472_v9 = vpop.permute.xlu2 %1664  ;;  %v695_v15 = vadd.f32 %v4200_v61, %v4145_v8 }
 0x298   :  { %5598 = vst [vmem:[#allocation23_spill] sm:$0xff] %v4450_v20  ;;  %3425 = vmatmul.msk.f32.gmra.mxu2 %vm101_vm0, %v3700_v25  ;;  %3555 = vset.pattern.permute.xlu1 %v5579_v35 }
 0x299   :  { %3703 = vtanh.f32 %v686_v26  ;;  %1703 = vperm.xlu1 %3555, %v1103_v18   ;;  %v698_v26 = vadd.f32 %v4208_v3, %v4145_v8 }
 0x29a   :  { %v4467_v59 = vpop.permute.xlu1 %1661 }
 0x29d   :  { %v3702_v37 = vpop.eup %3701  ;;  %v1106_v42 = vpop.f32.mrf.mxu0 }
 0x29e   :  { %v688_v44 = vpop.f32.mrf.mxu1  ;;  %v4460_v45 = vmul.f32 %v3702_v37, %v4445_v7 }
 0x29f   :  { %v3704_v48 = vpop.eup %3703  ;;  %v689_v52 = vadd.f32 %v688_v44, %v4145_v8  ;;  %1377 = vperm.xlu2 %3554, %v1106_v42  }
 0x2a0   :  { %5599 = vst [vmem:[#allocation24_spill] sm:$0xff] %v4460_v45  ;;  %3426 = vmatmul.msk.f32.gmra.mxu2 %vm101_vm0, %v3704_v48  ;;  %v701_v48 = vadd.f32 %v4218_v14, %v4145_v8  ;;  %v704_v14 = vadd.f32 %v4226_v21, %v4145_v8  ;;  %v707_v21 = vadd.f32 %v4236_v32, %v4145_v8 }
 0x2a1   :  { %3705 = vtanh.f32 %v689_v52  ;;  %3559 = vset.pattern.permute.xlu1 %v5573_v47  ;;  %v710_v32 = vadd.f32 %v4244_v41, %v4145_v8 }
 0x2a3   :  { %v4477_v25 = vpop.permute.xlu1 %1992 }
 0x2a5   :  { %v1109_v57 = vpop.f32.mrf.mxu0 }
 0x2a6   :  { %v691_v60 = vpop.f32.mrf.mxu1  ;;  %1380 = vperm.xlu0 %3557, %v1109_v57  }
 0x2a7   :  { %v3706_v63 = vpop.eup %3705  ;;  %v692_v6 = vadd.f32 %v691_v60, %v4145_v8  ;;  %3556 = vset.pattern.permute.xlu2 %v5579_v35  ;;  %v4495_v60 = vpop.permute.xlu0 %1652 }
 0x2a8   :  { %3427 = vmatmul.msk.f32.gmra.mxu2 %vm101_vm0, %v3706_v63  ;;  %1706 = vperm.xlu2 %3556, %v1106_v42   ;;  %v4483_v42 = vpop.permute.xlu2 %1995 }
 0x2a9   :  { %3707 = vtanh.f32 %v692_v6 }
 0x2aa   :  { %3709 = vtanh.f32 %v695_v15 }
 0x2ab   :  { %3711 = vtanh.f32 %v698_v26 }
 0x2ac   :  { %3713 = vtanh.f32 %v701_v48 }
 0x2ad   :  { %v1112_v18 = vpop.f32.mrf.mxu0  ;;  %3715 = vtanh.f32 %v704_v14 }
 0x2ae   :  { %3558 = vset.pattern.permute.xlu0 %v5579_v35  ;;  %1383 = vperm.xlu1 %3559, %v1112_v18   ;;  %3717 = vtanh.f32 %v707_v21  ;;  %v713_v21 = vadd.f32 %v4254_v51, %v4145_v8  ;;  %v716_v51 = vadd.f32 %v4266_v0, %v4145_v8 }
 0x2af   :  { %v3708_v19 = vpop.eup %3707  ;;  %1709 = vperm.xlu0 %3558, %v1109_v57   ;;  %3719 = vtanh.f32 %v710_v32  ;;  %v5600_v32 = vmov 1  }
 0x2b0   :  { %3428 = vmatmul.msk.f32.gmra.mxu2 %vm101_vm0, %v3708_v19  ;;  %3561 = vset.pattern.permute.xlu2 %v5573_v47  ;;  %v3710_v61 = vpop.eup %3709  ;;  %v4487_v44 = vpop.permute.xlu1 %1670  ;;  %3721 = vtanh.f32 %v713_v21 }
 0x2b1   :  { %v4492_v3 = vpop.permute.xlu2 %1673  ;;  %v3712_v57 = vpop.eup %3711  ;;  %3723 = vtanh.f32 %v716_v51 }
 0x2b2   :  { %v3714_v15 = vpop.eup %3713  ;;  %3725 = vtanh.f32 %v719_v11 }
 0x2b3   :  { %3727 = vtanh.f32 %v722_v54 }
 0x2b4   :  { %3729 = vtanh.f32 %v725_v34 }
 0x2b5   :  { %v1115_v37 = vpop.f32.mrf.mxu0 }
 0x2b6   :  { %3560 = vset.pattern.permute.xlu1 %v5579_v35  ;;  %1386 = vperm.xlu2 %3561, %v1115_v37  }
 0x2b7   :  { %1712 = vperm.xlu1 %3560, %v1112_v18   ;;  %3567 = vset.pattern.permute.xlu0 %v5573_v47  ;;  %v4503_v18 = vpop.permute.xlu0 %1983 }
 0x2b8   :  { %3429 = vmatmul.msk.f32.gmra.mxu2 %vm101_vm0, %v3710_v61  ;;  %v3716_v61 = vpop.eup %3715 }
 0x2b9   :  { %v4499_v63 = vpop.permute.xlu1 %2001  ;;  %v4506_v19 = vpop.permute.xlu2 %2004 }
 0x2bd   :  { %v1118_v52 = vpop.f32.mrf.mxu0 }
 0x2be   :  { %3562 = vset.pattern.permute.xlu2 %v5579_v35 }
 0x2bf   :  { %3563 = vset.pattern.permute.xlu1 %v5573_v47  ;;  %1715 = vperm.xlu2 %3562, %v1115_v37   ;;  %v4514_v48 = vpop.permute.xlu0 %1667 }
 0x2c0   :  { %3430 = vmatmul.msk.f32.gmra.mxu2 %vm101_vm0, %v3712_v57  ;;  %1389 = vperm.xlu1 %3563, %v1118_v52  }
 0x2c1   :  { %v4516_v57 = vpop.permute.xlu2 %1685 }
 0x2c5   :  { %v1121_v6 = vpop.f32.mrf.mxu0 }
 0x2c7   :  { %3565 = vset.pattern.permute.xlu2 %v5573_v47  ;;  %v4526_v33 = vpop.permute.xlu0 %1998 }
 0x2c8   :  { %3431 = vmatmul.msk.f32.gmra.mxu2 %vm101_vm0, %v3714_v15  ;;  %3564 = vset.pattern.permute.xlu1 %v5579_v35  ;;  %v4510_v26 = vpop.permute.xlu1 %1679  ;;  %v3718_v15 = vpop.eup %3717 }
 0x2c9   :  { %1392 = vperm.xlu2 %3565, %v1121_v6   ;;  %1718 = vperm.xlu1 %3564, %v1118_v52  }
 0x2cd   :  { %v1124_v37 = vpop.f32.mrf.mxu0 }
 0x2ce   :  { %1395 = vperm.xlu0 %3567, %v1124_v37  }
 0x2cf   :  { %v4536_v41 = vpop.permute.xlu0 %1676 }
 0x2d0   :  { %3432 = vmatmul.msk.f32.gmra.mxu2 %vm101_vm0, %v3716_v61  ;;  %v4521_v52 = vpop.permute.xlu1 %1682  ;;  %v4528_v61 = vpop.permute.xlu2 %1688 }
 0x2d1   :  { %3566 = vset.pattern.permute.xlu2 %v5579_v35  ;;  %3568 = vset.pattern.permute.xlu1 %v5573_v47  ;;  %v3720_v47 = vpop.eup %3719 }
 0x2d2   :  { %1721 = vperm.xlu2 %3566, %v1121_v6  }
 0x2d5   :  { %v1127_v14 = vpop.f32.mrf.mxu0 }
 0x2d6   :  { %1398 = vperm.xlu1 %3568, %v1127_v14  }
 0x2d8   :  { %3433 = vmatmul.msk.f32.gmra.mxu2 %vm101_vm0, %v3718_v15  ;;  %v4539_v39 = vpop.permute.xlu2 %2019 }
 0x2d9   :  { %v4532_v6 = vpop.permute.xlu1 %2013 }
 0x2da   :  { %1724 = vperm.xlu2 %3566, %v1124_v37   ;;  %v3722_v37 = vpop.eup %3721 }
 0x2db   :  { %v3724_v0 = vpop.eup %3723 }
 0x2de   :  { %3569 = vset.pattern.permute.xlu1 %v5579_v35 }
 0x2df   :  { %1727 = vperm.xlu1 %3569, %v1127_v14  }
 0x2e0   :  { %3434 = vmatmul.msk.f32.gmra.mxu2 %vm101_vm0, %v3720_v47  ;;  %v4546_v47 = vpop.permute.xlu0 %2007  ;;  %v4548_v21 = vpop.permute.xlu2 %1697 }
 0x2e1   :  { %v4543_v16 = vpop.permute.xlu1 %2016 }
 0x2e2   :  { %3570 = vset.pattern.permute.xlu2 %v5600_v32 }
 0x2e3   :  { %v1130_v15 = vpop.f32.mrf.mxu2 }
 0x2e4   :  { %1401 = vperm.xlu2 %3570, %v1130_v15  }
 0x2e7   :  { %1730 = vperm.xlu1 %3569, %v1130_v15  }
 0x2e8   :  { %3435 = vmatmul.msk.f32.gmra.mxu2 %vm101_vm0, %v3722_v37  ;;  %v1244_v37 = vlaneseq  ;;  %v4562_v17 = vpop.permute.xlu2 %1700 }
 0x2ea   :  { %v4568_v11 = vand.u32 127, %v1244_v37 }
 0x2eb   :  { %v1133_v14 = vpop.f32.mrf.mxu2 }
 0x2ec   :  { %3571 = vset.pattern.permute.xlu2 %v5579_v35  ;;  %1404 = vperm.xlu0 %3567, %v1133_v14   ;;  %v4559_v35 = vpop.permute.xlu0 %2010  ;;  %v4574_v40 = vadd.s32 4294967288, %v4568_v11  ;;  %v2171_v20 = vperm.slane %v4440_v1, %v4568_v11  ;;  %v2174_v34 = vperm.slane %v4457_v29, %v4568_v11  ;;  %v1846_v29 = vperm.slane %v4453_v27, %v4568_v11 }
 0x2ed   :  { %1733 = vperm.xlu2 %3571, %v1133_v14   ;;  %v3726_v14 = vpop.eup %3725  ;;  %vm1246_vm10 = vcmp.lt.s32.totalorder %v4568_v11, 8  ;;  %vm1251_vm12 = vcmp.ge.s32.totalorder %v4568_v11, 8 }
 0x2ee   :  { %v2172_v54 = vperm.slane %v4503_v18, %v4574_v40  ;;  %v1847_v37 = vperm.slane %v4467_v59, %v4574_v40  ;;  %v1844_v1 = vperm.slane %v4443_v5, %v4574_v40  ;;  %v3728_v18 = vpop.eup %3727  ;;  %v2175_v59 = vperm.slane %v4465_v55, %v4574_v40 }
 0x2ef   :  { %3572 = vset.pattern.permute.xlu1 %v5600_v32  ;;  %v1849_v5 = vperm.slane %v4472_v9, %v4568_v11  ;;  %v3730_v27 = vpop.eup %3729  ;;  %v1853_v9 = vperm.slane %v4492_v3, %v4574_v40 }
 0x2f0   :  { %3436 = vmatmul.msk.f32.gmra.mxu2 %vm101_vm0, %v3724_v0  ;;  %v4555_v15 = vpop.permute.xlu1 %1694  ;;  %v728_v0 = vadd.f32 %v4313_v2, %v4145_v8  ;;  %v1843_v2 = vperm.slane %v4495_v60, %v4568_v11  ;;  %v1850_v60 = vperm.slane %v4514_v48, %v4574_v40  ;;  %v2181_v48 = vperm.slane %v4499_v63, %v4574_v40 }
 0x2f1   :  { %v1375_v24 = vpop.permute.xlu2 %1374  ;;  %v2173_v55 = vsel %vm1517_vm2, %v2172_v54, %v2171_v20  ;;  %v2176_v7 = vsel %vm1517_vm2, %v2175_v59, %v2174_v34  ;;  %v1855_v59 = vperm.slane %v4536_v41, %v4568_v11 }
 0x2f2   :  { %3731 = vtanh.f32 %v728_v0  ;;  %v2177_v0 = vperm.slane %v4477_v25, %v4568_v11  ;;  %v2178_v25 = vperm.slane %v4483_v42, %v4574_v40  ;;  %v1845_v42 = vsel %vm1517_vm2, %v1844_v1, %v1843_v2 }
 0x2f3   :  { %v1136_v51 = vpop.f32.mrf.mxu2  ;;  %v1851_v63 = vsel %vm1517_vm2, %v1850_v60, %v1849_v5  ;;  %v1541_v54 = vperm.slane %v1375_v24, %v4574_v40  ;;  %v2183_v24 = vperm.slane %v4506_v19, %v4568_v11  ;;  %v1859_v5 = vperm.slane %v4516_v57, %v4574_v40 }
 0x2f4   :  { %1407 = vperm.xlu1 %3572, %v1136_v51   ;;  %v2179_v50 = vsel %vm1517_vm2, %v2178_v25, %v2177_v0  ;;  %v2184_v0 = vperm.slane %v4546_v47, %v4574_v40  ;;  %v1856_v47 = vperm.slane %v4510_v26, %v4574_v40 }
 0x2f5   :  { %3574 = vset.pattern.permute.xlu2 %v5600_v32 }
 0x2f6   :  { %v2185_v26 = vsel %vm1517_vm2, %v2184_v0, %v2183_v24  ;;  %v1857_v57 = vsel %vm1517_vm2, %v1856_v47, %v1855_v59  ;;  %v5602_v24 = vmov 0  }
 0x2f8   :  { %3437 = vmatmul.msk.f32.gmra.mxu2 %vm101_vm0, %v3726_v14  ;;  %v4587_v14 = vpop.permute.xlu0 %1691  ;;  %v4613_v36 = vpop.eup %3731 }
 0x2f9   :  { %v4571_v31 = vpop.permute.xlu1 %2025  ;;  %v1862_v41 = vperm.slane %v4587_v14, %v4574_v40  ;;  %v1865_v14 = vperm.slane %v4548_v21, %v4574_v40 }
 0x2fa   :  { %v2193_v25 = vperm.slane %v4571_v31, %v4574_v40 }
 0x2fb   :  { %v1139_v45 = vpop.f32.mrf.mxu2 }
 0x2fc   :  { %1410 = vperm.xlu2 %3574, %v1139_v45   ;;  %3573 = vset.pattern.permute.xlu1 %v5601_v56 }
 0x2fd   :  { %1736 = vperm.xlu1 %3573, %v1136_v51   ;;  %v1852_v51 = vperm.slane %v4487_v44, %v4568_v11  ;;  %v1848_v44 = vsel %vm1517_vm2, %v1847_v37, %v1846_v29  ;;  %v2267_v37 = vsel %vm1612_vm3, %v2176_v7, %v2173_v55 }
 0x2fe   :  { %v1939_v2 = vsel %vm1612_vm3, %v1848_v44, %v1845_v42  ;;  %v1378_v42 = vpop.permute.xlu2 %1377 }
 0x2ff   :  { %v1854_v20 = vsel %vm1517_vm2, %v1853_v9, %v1852_v51  ;;  %v1940_v60 = vsel %vm1614_vm4, %v1851_v63, %v1939_v2  ;;  %v2189_v51 = vperm.slane %v4543_v16, %v4568_v11  ;;  %v2190_v16 = vperm.slane %v4539_v39, %v4574_v40 }
 0x300   :  { %3438 = vmatmul.msk.f32.gmra.mxu2 %vm101_vm0, %v3728_v18  ;;  %v2180_v18 = vperm.slane %v4526_v33, %v4568_v11  ;;  %v2268_v33 = vsel %vm1614_vm4, %v2179_v50, %v2267_v37  ;;  %v1941_v7 = vsel %vm1616_vm5, %v1854_v20, %v1940_v60  ;;  %v2187_v50 = vperm.slane %v4532_v6, %v4574_v40  ;;  %v2023_v19 = vpop.permute.xlu0 %2022 }
 0x301   :  { %v2186_v6 = vperm.slane %v4559_v35, %v4568_v11  ;;  %v1864_v35 = vperm.slane %v4555_v15, %v4568_v11  ;;  %v2192_v31 = vperm.slane %v2023_v19, %v4568_v11  ;;  %v2191_v55 = vsel %vm1517_vm2, %v2190_v16, %v2189_v51 }
 0x302   :  { %v1372_v10 = vpop.permute.xlu1 %1371  ;;  %v2182_v1 = vsel %vm1517_vm2, %v2181_v48, %v2180_v18  ;;  %v1867_v9 = vperm.slane %v4562_v17, %v4568_v11  ;;  %v731_v18 = vadd.f32 %v4324_v12, %v4145_v8  ;;  %v1942_v20 = vsel %vm1618_vm6, %v1857_v57, %v1941_v7 }
 0x303   :  { %v1540_v34 = vperm.slane %v1372_v10, %v4568_v11  ;;  %v4623_v3 = vpop.f32.mrf.mxu2  ;;  %v2269_v29 = vsel %vm1616_vm5, %v2182_v1, %v2268_v33  ;;  %v2188_v48 = vsel %vm1517_vm2, %v2187_v50, %v2186_v6  ;;  %v2194_v15 = vsel %vm1517_vm2, %v2193_v25, %v2192_v31 }
 0x304   :  { %3575 = vset.pattern.permute.xlu2 %v5601_v56  ;;  %v1866_v17 = vsel %vm1517_vm2, %v1865_v14, %v1864_v35  ;;  %3733 = vtanh.f32 %v731_v18  ;;  %v734_v7 = vadd.f32 %v4334_v23, %v4145_v8  ;;  %v1543_v59 = vperm.slane %v1378_v42, %v4568_v11 }
 0x305   :  { %v4634_v10 = vsel %vm1517_vm2, %v1541_v54, %v1540_v34  ;;  %1739 = vperm.xlu2 %3575, %v1139_v45   ;;  %3576 = vset.pattern.permute.xlu1 %v5600_v32  ;;  %v1858_v45 = vperm.slane %v4521_v52, %v4568_v11  ;;  %v1861_v52 = vperm.slane %v4528_v61, %v4568_v11 }
 0x306   :  { %v1707_v47 = vpop.permute.xlu2 %1706  ;;  %3735 = vtanh.f32 %v734_v7  ;;  %v743_v14 = vadd.f32 %v4358_v53, %v4145_v8 }
 0x307   :  { %v1860_v61 = vsel %vm1517_vm2, %v1859_v5, %v1858_v45  ;;  %v1863_v54 = vsel %vm1517_vm2, %v1862_v41, %v1861_v52  ;;  %v737_v5 = vadd.f32 %v4344_v30, %v4145_v8 }
 0x308   :  { %3439 = vmatmul.msk.f32.gmra.mxu2 %vm101_vm0, %v3730_v27  ;;  %v2270_v27 = vsel %vm1618_vm6, %v2185_v26, %v2269_v29  ;;  %v1943_v2 = vsel %vm1620_vm7, %v1860_v61, %v1942_v20 }
 0x309   :  { %v2271_v21 = vsel %vm1620_vm7, %v2188_v48, %v2270_v27  ;;  %v1944_v1 = vsel %vm1622_vm8, %v1863_v54, %v1943_v2  ;;  %3737 = vtanh.f32 %v737_v5  ;;  %v740_v27 = vadd.f32 %v4350_v46, %v4145_v8 }
 0x30a   :  { %v2272_v37 = vsel %vm1622_vm8, %v2191_v55, %v2271_v21  ;;  %v1945_v0 = vsel %vm1624_vm9, %v1866_v17, %v1944_v1  ;;  %v3734_v50 = vpop.eup %3733  ;;  %v752_v21 = vadd.f32 %v4379_v13, %v4145_v8  ;;  %v755_v2 = vadd.f32 %v4385_v22, %v4145_v8 }
 0x30b   :  { %v4673_v39 = vpop.f32.mrf.mxu2  ;;  %v1704_v44 = vpop.permute.xlu1 %1703  ;;  %v2273_v12 = vsel %vm1624_vm9, %v2194_v15, %v2272_v37  ;;  %3739 = vtanh.f32 %v740_v27 }
 0x30c   :  { %v1868_v63 = vperm.slane %v1704_v44, %v4574_v40  ;;  %1416 = vperm.xlu1 %3576, %v4673_v39   ;;  %v4700_v33 = vsel %vm1246_vm10, %v2273_v12, %v1945_v0  ;;  %v3736_v6 = vpop.eup %3735  ;;  %3741 = vtanh.f32 %v743_v14 }
 0x30d   :  { %1742 = vperm.xlu2 %3575, %v4623_v3  }
 0x30e   :  { %v1869_v34 = vsel %vm1517_vm2, %v1868_v63, %v1867_v9 }
 0x30f   :  { %v3738_v55 = vpop.eup %3737 }
 0x310   :  { %3440 = vmatmul.msk.f32.gmra.mxu2 %vm101_vm0, %v4613_v36  ;;  %v2304_v36 = vsel %vm2303_vm11, %v4700_v33, -inf  ;;  %v1387_v26 = vpop.permute.xlu2 %1386 }
 0x311   :  { %v1547_v52 = vperm.slane %v1387_v26, %v4574_v40  ;;  %v3740_v9 = vpop.eup %3739  ;;  %v767_v26 = vadd.f32 %v4407_v58, %v4145_v8 }
 0x312   :  { %v3742_v63 = vpop.eup %3741 }
 0x313   :  { %v1148_v60 = vpop.f32.mrf.mxu2 }
 0x314   :  { %3578 = vset.pattern.permute.xlu1 %v5602_v24 }
 0x315   :  { %2076 = vperm.xlu1 %3578, %v1148_v60   ;;  %3580 = vset.pattern.permute.xlu2 %v5602_v24 }
 0x316   :  { %2305 = vmax.xlane.f32.xlu0 %v2304_v36 }
 0x318   :  { %3441 = vmatmul.msk.f32.gmra.mxu2 %vm101_vm0, %v3734_v50  ;;  %v1381_v29 = vpop.permute.xlu0 %1380  ;;  %v761_v50 = vadd.f32 %v4397_v43, %v4145_v8 }
 0x319   :  { %v1544_v45 = vperm.slane %v1381_v29, %v4574_v40  ;;  %v4739_v46 = vpop.permute.xlu2 %1715 }
 0x31b   :  { %v1545_v51 = vsel %vm1517_vm2, %v1544_v45, %v1543_v59  ;;  %v1151_v23 = vpop.f32.mrf.mxu2 }
 0x31c   :  { %v1626_v19 = vsel %vm1612_vm3, %v1545_v51, %v4634_v10  ;;  %2079 = vperm.xlu2 %3580, %v1151_v23   ;;  %v1870_v10 = vperm.slane %v1707_v47, %v4568_v11  ;;  %v764_v51 = vadd.f32 %v4403_v49, %v4145_v8 }
 0x31d   :  { %3579 = vset.pattern.permute.xlu1 %v5601_v56 }
 0x31e   :  { %1751 = vperm.xlu1 %3579, %v1151_v23  }
 0x320   :  { %3442 = vmatmul.msk.f32.gmra.mxu2 %vm101_vm0, %v3736_v6  ;;  %v1384_v25 = vpop.permute.xlu1 %1383 }
 0x321   :  { %v1546_v16 = vperm.slane %v1384_v25, %v4568_v11  ;;  %v1710_v41 = vpop.permute.xlu0 %1709 }
 0x322   :  { %v1871_v57 = vperm.slane %v1710_v41, %v4574_v40 }
 0x323   :  { %v1548_v30 = vsel %vm1517_vm2, %v1547_v52, %v1546_v16  ;;  %v1154_v48 = vpop.f32.mrf.mxu2  ;;  %v4748_v53 = vpop.permute.xlu2 %1392  ;;  %v770_v52 = vadd.f32 %v4413_v4, %v4145_v8 }
 0x324   :  { %v4724_v35 = vsel %vm1614_vm4, %v1548_v30, %v1626_v19  ;;  %v1872_v31 = vsel %vm1517_vm2, %v1871_v57, %v1870_v10  ;;  %3581 = vset.pattern.permute.xlu2 %v5601_v56  ;;  %v5603_v10 = vld [vmem:[#allocation18_spill] sm:$0xff] }
 0x325   :  { %v4731_v61 = vsel %vm1612_vm3, %v1872_v31, %v1869_v34  ;;  %1754 = vperm.xlu2 %3581, %v1154_v48   ;;  %v773_v57 = vadd.f32 %v5603_v10, %v4145_v8 }
 0x326   :  { %3584 = vset.pattern.permute.xlu1 %v5602_v24 }
 0x328   :  { %3443 = vmatmul.msk.f32.gmra.mxu2 %vm101_vm0, %v3738_v55 }
 0x329   :  { %v4743_v42 = vpop.permute.xlu1 %1712 }
 0x32a   :  { %1413 = vperm.xlu0 %3567, %v4623_v3   ;;  %v746_v3 = vadd.f32 %v4367_v62, %v4145_v8 }
 0x32b   :  { %v1157_v44 = vpop.f32.mrf.mxu2 }
 0x32c   :  { %2085 = vperm.xlu1 %3584, %v1157_v44   ;;  %3743 = vtanh.f32 %v746_v3  ;;  %v4760_v17 = vpop.permute.xlu2 %1721 }
 0x330   :  { %3444 = vmatmul.msk.f32.gmra.mxu2 %vm101_vm0, %v3740_v9 }
 0x332   :  { %3577 = vset.pattern.permute.xlu0 %v5601_v56  ;;  %v4754_v20 = vpop.permute.xlu1 %1389  ;;  %v3744_v54 = vpop.eup %3743 }
 0x333   :  { %v1160_v15 = vpop.f32.mrf.mxu2  ;;  %1745 = vperm.xlu0 %3577, %v4673_v39   ;;  %v749_v39 = vadd.f32 %v4373_v38, %v4145_v8 }
 0x334   :  { %1760 = vperm.xlu2 %3581, %v1160_v15   ;;  %2088 = vperm.xlu1 %3584, %v1160_v15   ;;  %v4769_v12 = vpop.permute.xlu2 %1724 }
 0x335   :  { %3745 = vtanh.f32 %v749_v39 }
 0x336   :  { %3747 = vtanh.f32 %v752_v21  ;;  %v1549_v21 = vperm.slane %v4754_v20, %v4568_v11  ;;  %v1877_v20 = vperm.slane %v4760_v17, %v4574_v40 }
 0x337   :  { %3749 = vtanh.f32 %v755_v2 }
 0x338   :  { %3445 = vmatmul.msk.f32.gmra.mxu2 %vm101_vm0, %v3742_v63 }
 0x33b   :  { %v1163_v18 = vpop.f32.mrf.mxu2  ;;  %1748 = vperm.xlu0 %3577, %v1148_v60   ;;  %v3746_v34 = vpop.eup %3745  ;;  %v758_v60 = vadd.f32 %v4391_v28, %v4145_v8 }
 0x33c   :  { %3585 = vset.pattern.permute.xlu2 %v5602_v24  ;;  %3586 = vset.pattern.permute.xlu1 %v5601_v56  ;;  %v4762_v37 = vpop.permute.xlu1 %1718  ;;  %v3748_v13 = vpop.eup %3747 }
 0x33d   :  { %2091 = vperm.xlu2 %3585, %v1163_v18   ;;  %v3750_v7 = vpop.eup %3749  ;;  %3751 = vtanh.f32 %v758_v60  ;;  %v1876_v2 = vperm.slane %v4762_v37, %v4568_v11 }
 0x33e   :  { %v4776_v36 = vpop.permute.xlu2 %1401  ;;  %3753 = vtanh.f32 %v761_v50 }
 0x33f   :  { %3755 = vtanh.f32 %v764_v51  ;;  %v1555_v50 = vperm.slane %v4776_v36, %v4568_v11 }
 0x340   :  { %3446 = vmatmul.msk.f32.gmra.mxu2 %vm101_vm0, %v3744_v54  ;;  %3757 = vtanh.f32 %v767_v26  ;;  %v1396_v27 = vpop.permute.xlu0 %1395  ;;  %v1873_v54 = vperm.slane %v4743_v42, %v4568_v11 }
 0x341   :  { %3759 = vtanh.f32 %v770_v52  ;;  %v1552_v37 = vperm.slane %v1396_v27, %v4568_v11 }
 0x342   :  { %3761 = vtanh.f32 %v773_v57 }
 0x343   :  { %v1166_v62 = vpop.f32.mrf.mxu2  ;;  %3582 = vset.pattern.permute.xlu0 %v5602_v24  ;;  %v3752_v29 = vpop.eup %3751 }
 0x344   :  { %2082 = vperm.xlu0 %3582, %v1154_v48   ;;  %v3754_v43 = vpop.eup %3753 }
 0x345   :  { %2094 = vperm.xlu2 %3585, %v1166_v62   ;;  %v3756_v49 = vpop.eup %3755 }
 0x346   :  { %v3758_v58 = vpop.eup %3757 }
 0x347   :  { %v4785_v28 = vpop.permute.xlu2 %1733  ;;  %v3760_v48 = vpop.eup %3759 }
 0x348   :  { %3447 = vmatmul.msk.f32.gmra.mxu2 %vm101_vm0, %v3746_v34  ;;  %v4771_v1 = vpop.permute.xlu1 %1398 }
 0x349   :  { %v1553_v42 = vperm.slane %v4771_v1, %v4574_v40  ;;  %v1879_v1 = vperm.slane %v4769_v12, %v4568_v11 }
 0x34b   :  { %v1169_v38 = vpop.f32.mrf.mxu2 }
 0x34c   :  { %3583 = vset.pattern.permute.xlu0 %v5601_v56  ;;  %1769 = vperm.xlu1 %3586, %v1169_v38  }
 0x34d   :  { %1757 = vperm.xlu0 %3583, %v1157_v44   ;;  %3588 = vset.pattern.permute.xlu2 %v5601_v56  ;;  %v3762_v44 = vpop.eup %3761 }
 0x350   :  { %3448 = vmatmul.msk.f32.gmra.mxu2 %vm101_vm0, %v3748_v13  ;;  %v1550_v13 = vperm.slane %v4748_v53, %v4574_v40 }
 0x351   :  { %v4779_v22 = vpop.permute.xlu1 %1727 }
 0x352   :  { %v1551_v60 = vsel %vm1517_vm2, %v1550_v13, %v1549_v21 }
 0x353   :  { %v1172_v0 = vpop.f32.mrf.mxu2  ;;  %v1628_v36 = vsel %vm1616_vm5, %v1551_v60, %v4724_v35 }
 0x354   :  { %1772 = vperm.xlu1 %3586, %v1172_v0  }
 0x355   :  { %1763 = vperm.xlu0 %3583, %v1163_v18  }
 0x356   :  { %v4794_v23 = vpop.permute.xlu2 %1410 }
 0x358   :  { %3449 = vmatmul.msk.f32.gmra.mxu2 %vm101_vm0, %v3750_v7 }
 0x359   :  { %v4787_v45 = vpop.permute.xlu1 %1730 }
 0x35a   :  { %v1882_v7 = vperm.slane %v4787_v45, %v4568_v11 }
 0x35b   :  { %v1175_v47 = vpop.f32.mrf.mxu2 }
 0x35c   :  { %1775 = vperm.xlu2 %3588, %v1175_v47   ;;  %3589 = vset.pattern.permute.xlu1 %v5602_v24 }
 0x35d   :  { %1766 = vperm.xlu0 %3583, %v1166_v62   ;;  %2103 = vperm.xlu1 %3589, %v1175_v47   ;;  %v1878_v47 = vsel %vm1517_vm2, %v1877_v20, %v1876_v2 }
 0x35e   :  { %v1405_v63 = vpop.permute.xlu0 %1404 }
 0x35f   :  { %v4802_v6 = vpop.permute.xlu2 %1739  ;;  %v1556_v53 = vperm.slane %v1405_v63, %v4574_v40 }
 0x360   :  { %3450 = vmatmul.msk.f32.gmra.mxu2 %vm101_vm0, %v3752_v29  ;;  %v1883_v29 = vperm.slane %v4785_v28, %v4574_v40 }
 0x361   :  { %v1557_v26 = vsel %vm1517_vm2, %v1556_v53, %v1555_v50 }
 0x362   :  { %v1884_v28 = vsel %vm1517_vm2, %v1883_v29, %v1882_v7 }
 0x363   :  { %v1178_v59 = vpop.f32.mrf.mxu2 }
 0x365   :  { %3587 = vset.pattern.permute.xlu0 %v5602_v24  ;;  %3590 = vset.pattern.permute.xlu1 %v5601_v56 }
 0x366   :  { %2097 = vperm.xlu0 %3587, %v1169_v38   ;;  %1778 = vperm.xlu1 %3590, %v1178_v59   ;;  %v4796_v5 = vpop.permute.xlu1 %1407  ;;  %v1874_v38 = vperm.slane %v4739_v46, %v4574_v40  ;;  %v1880_v46 = vperm.slane %v4779_v22, %v4574_v40 }
 0x367   :  { %v4814_v30 = vpop.permute.xlu2 %1742  ;;  %v1558_v17 = vperm.slane %v4796_v5, %v4568_v11 }
 0x368   :  { %3451 = vmatmul.msk.f32.gmra.mxu2 %vm101_vm0, %v3754_v43  ;;  %v1881_v51 = vsel %vm1517_vm2, %v1880_v46, %v1879_v1  ;;  %v1559_v43 = vperm.slane %v4794_v23, %v4574_v40 }
 0x36b   :  { %v1181_v19 = vpop.f32.mrf.mxu2 }
 0x36c   :  { %1781 = vperm.xlu2 %3588, %v1181_v19  }
 0x36e   :  { %2100 = vperm.xlu0 %3587, %v1172_v0   ;;  %3591 = vset.pattern.permute.xlu1 %v5602_v24  ;;  %v1875_v0 = vsel %vm1517_vm2, %v1874_v38, %v1873_v54 }
 0x36f   :  { %2106 = vperm.xlu1 %3591, %v1178_v59   ;;  %v4807_v16 = vpop.permute.xlu1 %1736  ;;  %v1554_v59 = vsel %vm1517_vm2, %v1553_v42, %v1552_v37  ;;  %v1947_v12 = vsel %vm1614_vm4, %v1875_v0, %v4731_v61 }
 0x370   :  { %3452 = vmatmul.msk.f32.gmra.mxu2 %vm101_vm0, %v3756_v49  ;;  %v1885_v22 = vperm.slane %v4807_v16, %v4568_v11  ;;  %v1948_v23 = vsel %vm1616_vm5, %v1878_v47, %v1947_v12 }
 0x371   :  { %v1949_v16 = vsel %vm1618_vm6, %v1881_v51, %v1948_v23 }
 0x372   :  { %v1950_v57 = vsel %vm1620_vm7, %v1884_v28, %v1949_v16 }
 0x373   :  { %v1184_v25 = vpop.f32.mrf.mxu2 }
 0x374   :  { %3592 = vset.pattern.permute.xlu2 %v5602_v24 }
 0x375   :  { %2109 = vperm.xlu2 %3592, %v1181_v19   ;;  %v1886_v19 = vperm.slane %v4802_v6, %v4574_v40  ;;  %v1560_v6 = vsel %vm1517_vm2, %v1559_v43, %v1558_v17 }
 0x376   :  { %3593 = vset.pattern.permute.xlu0 %v5601_v56  ;;  %v2080_v55 = vpop.permute.xlu2 %2079 }
 0x377   :  { %1784 = vperm.xlu0 %3593, %v1184_v25   ;;  %3594 = vset.pattern.permute.xlu1 %v5601_v56  ;;  %v2220_v14 = vperm.slane %v2080_v55, %v4574_v40  ;;  %v1887_v52 = vsel %vm1517_vm2, %v1886_v19, %v1885_v22 }
 0x378   :  { %3453 = vmatmul.msk.f32.gmra.mxu2 %vm101_vm0, %v3758_v58  ;;  %v1888_v58 = vperm.slane %v4814_v30, %v4568_v11  ;;  %v1951_v27 = vsel %vm1622_vm8, %v1887_v52, %v1950_v57 }
 0x37b   :  { %v1187_v41 = vpop.f32.mrf.mxu2 }
 0x37c   :  { %1787 = vperm.xlu1 %3594, %v1187_v41  }
 0x37d   :  { %2112 = vperm.xlu2 %3592, %v1184_v25   ;;  %v1629_v25 = vsel %vm1618_vm6, %v1554_v59, %v1628_v36 }
 0x37e   :  { %v4816_v4 = vpop.permute.xlu1 %1416 }
 0x37f   :  { %3595 = vset.pattern.permute.xlu0 %v5602_v24  ;;  %v1562_v61 = vperm.slane %v4816_v4, %v4574_v40  ;;  %v1630_v4 = vsel %vm1620_vm7, %v1557_v26, %v1629_v25 }
 0x380   :  { %3454 = vmatmul.msk.f32.gmra.mxu2 %vm101_vm0, %v3760_v48  ;;  %2115 = vperm.xlu0 %3595, %v1187_v41  }
 0x383   :  { %v1190_v31 = vpop.f32.mrf.mxu2 }
 0x384   :  { %1790 = vperm.xlu1 %3594, %v1190_v31  }
 0x385   :  { %3597 = vset.pattern.permute.xlu2 %v5601_v56 }
 0x387   :  { %v2077_v8 = vpop.permute.xlu1 %2076 }
 0x388   :  { %v2219_v9 = vperm.slane %v2077_v8, %v4568_v11  ;;  %3455 = vmatmul.msk.f32.gmra.mxu2 %vm101_vm0, %v3762_v44  ;;  %3601 = vset.pattern.permute.xlu0 %v5600_v32  ;;  %v1755_v8 = vpop.permute.xlu2 %1754 }
 0x389   :  { %v4829_v39 = vpop.xlane.xlu0 %2305  ;;  %v1894_v37 = vperm.slane %v1755_v8, %v4568_v11 }
 0x38a   :  { %v4826_v15 = vsel %vm1517_vm2, %v2220_v14, %v2219_v9 }
 0x38b   :  { %v1193_v3 = vpop.f32.mrf.mxu2 }
 0x38c   :  { %1793 = vperm.xlu2 %3597, %v1193_v3   ;;  %3596 = vset.pattern.permute.xlu1 %v5602_v24 }
 0x38d   :  { %2118 = vperm.xlu1 %3596, %v1190_v31   ;;  %v1631_v31 = vsel %vm1622_vm8, %v1560_v6, %v1630_v4 }
 0x390   :  { %v1752_v49 = vpop.permute.xlu1 %1751  ;;  %v4909_v63 = vpop.permute.xlu2 %1760 }
 0x391   :  { %v1892_v7 = vperm.slane %v1752_v49, %v4574_v40  ;;  %v1897_v4 = vperm.slane %v4909_v63, %v4568_v11 }
 0x393   :  { %v1196_v18 = vpop.f32.mrf.mxu2 }
 0x394   :  { %3598 = vset.pattern.permute.xlu2 %v5602_v24 }
 0x395   :  { %2121 = vperm.xlu2 %3598, %v1193_v3   ;;  %3603 = vset.pattern.permute.xlu1 %v5600_v32 }
 0x398   :  { %v4923_v0 = vpop.permute.xlu2 %2091 }
 0x39b   :  { %v1199_v62 = vpop.f32.mrf.mxu2 }
 0x39c   :  { %1470 = vperm.xlu0 %3601, %v1199_v62   ;;  %v1414_v34 = vpop.permute.xlu0 %1413 }
 0x39d   :  { %3599 = vset.pattern.permute.xlu2 %v5600_v32  ;;  %v1561_v45 = vperm.slane %v1414_v34, %v4568_v11 }
 0x39e   :  { %1467 = vperm.xlu2 %3599, %v1196_v18   ;;  %v2086_v9 = vpop.permute.xlu1 %2085 }
 0x39f   :  { %v1563_v41 = vsel %vm1517_vm2, %v1562_v61, %v1561_v45  ;;  %v2223_v34 = vperm.slane %v2086_v9, %v4574_v40 }
 0x3a0   :  { %v1632_v30 = vsel %vm1624_vm9, %v1563_v41, %v1631_v31  ;;  %v4936_v22 = vpop.permute.xlu2 %2094 }
 0x3a1   :  { %v2228_v8 = vperm.slane %v4936_v22, %v4568_v11 }
 0x3a3   :  { %v4876_v5 = vpop.f32.mrf.mxu2 }
 0x3a4   :  { %3602 = vset.pattern.permute.xlu0 %v5601_v56 }
 0x3a5   :  { %1799 = vperm.xlu0 %3602, %v1199_v62   ;;  %v1746_v35 = vpop.permute.xlu0 %1745 }
 0x3a6   :  { %v1889_v10 = vperm.slane %v1746_v35, %v4574_v40  ;;  %3600 = vset.pattern.permute.xlu2 %v5601_v56  ;;  %v4911_v54 = vpop.permute.xlu1 %2088 }
 0x3a7   :  { %1796 = vperm.xlu2 %3600, %v1196_v18   ;;  %v2225_v41 = vperm.slane %v4911_v54, %v4568_v11 }
 0x3a8   :  { %v1890_v48 = vsel %vm1517_vm2, %v1889_v10, %v1888_v58 }
 0x3a9   :  { %v1952_v55 = vsel %vm1624_vm9, %v1890_v48, %v1951_v27  ;;  %v2226_v48 = vperm.slane %v4923_v0, %v4574_v40 }
 0x3aa   :  { %v4905_v44 = vsel %vm1251_vm12, %v1632_v30, %v1952_v55 }
 0x3ab   :  { %v1205_v14 = vpop.f32.mrf.mxu2  ;;  %v2307_v21 = vsel %vm2303_vm11, %v4905_v44, -inf }
 0x3ad   :  { %v1749_v3 = vpop.permute.xlu0 %1748  ;;  %3607 = vset.pattern.permute.xlu0 %v5600_v32 }
 0x3ae   :  { %v1891_v20 = vperm.slane %v1749_v3, %v4568_v11 }
 0x3af   :  { %3605 = vset.pattern.permute.xlu2 %v5600_v32 }
 0x3b0   :  { %1476 = vperm.xlu2 %3605, %v1205_v14   ;;  %v1893_v1 = vsel %vm1517_vm2, %v1892_v7, %v1891_v20 }
 0x3b3   :  { %v1208_v18 = vpop.f32.mrf.mxu2 }
 0x3b4   :  { %1479 = vperm.xlu0 %3607, %v1208_v18  }
 0x3b6   :  { %v2083_v62 = vpop.permute.xlu0 %2082  ;;  %v4941_v45 = vpop.permute.xlu2 %1775 }
 0x3b7   :  { %v2222_v38 = vperm.slane %v2083_v62, %v4568_v11  ;;  %2308 = vmax.xlane.f32.xlu1 %v2307_v21  ;;  %v1904_v9 = vperm.slane %v4941_v45, %v4574_v40 }
 0x3b8   :  { %3606 = vset.pattern.permute.xlu2 %v5601_v56 }
 0x3b9   :  { %v2224_v2 = vsel %vm1517_vm2, %v2223_v34, %v2222_v38  ;;  %1805 = vperm.xlu2 %3606, %v1205_v14   ;;  %v2227_v14 = vsel %vm1517_vm2, %v2226_v48, %v2225_v41 }
 0x3ba   :  { %v4921_v13 = vsel %vm1612_vm3, %v2224_v2, %v4826_v15 }
 0x3bb   :  { %v1211_v42 = vpop.f32.mrf.mxu2  ;;  %v2282_v21 = vsel %vm1614_vm4, %v2227_v14, %v4921_v13 }
 0x3be   :  { %v4926_v46 = vpop.permute.xlu1 %1769 }
 0x3bf   :  { %v1758_v60 = vpop.permute.xlu0 %1757  ;;  %v1901_v30 = vperm.slane %v4926_v46, %v4574_v40 }
 0x3c0   :  { %v1895_v53 = vperm.slane %v1758_v60, %v4574_v40 }
 0x3c1   :  { %1811 = vperm.xlu2 %3606, %v1211_v42  }
 0x3c2   :  { %v1896_v15 = vsel %vm1517_vm2, %v1895_v53, %v1894_v37 }
 0x3c3   :  { %v4934_v47 = vsel %vm1612_vm3, %v1896_v15, %v1893_v1  ;;  %v1214_v17 = vpop.f32.mrf.mxu2 }
 0x3c6   :  { %v4938_v29 = vpop.permute.xlu1 %1772  ;;  %v4951_v19 = vpop.permute.xlu2 %1781 }
 0x3c7   :  { %v1764_v50 = vpop.permute.xlu0 %1763  ;;  %v1903_v34 = vperm.slane %v4938_v29, %v4568_v11 }
 0x3c8   :  { %v1898_v10 = vperm.slane %v1764_v50, %v4574_v40 }
 0x3c9   :  { %3609 = vset.pattern.permute.xlu2 %v5600_v32  ;;  %v1905_v45 = vsel %vm1517_vm2, %v1904_v9, %v1903_v34 }
 0x3ca   :  { %1485 = vperm.xlu2 %3609, %v1214_v17   ;;  %v1899_v3 = vsel %vm1517_vm2, %v1898_v10, %v1897_v4  ;;  %v5605_v4 = vld [vmem:[#allocation20_spill] sm:$0xff] }
 0x3cb   :  { %v1217_v59 = vpop.f32.mrf.mxu2  ;;  %v1954_v0 = vsel %vm1614_vm4, %v1899_v3, %v4934_v47  ;;  %v2316_v3 = vsub.f32 %v4700_v33, %v4829_v39 }
 0x3cc   :  { %1488 = vperm.xlu0 %3607, %v1217_v59  }
 0x3cd   :  { %v2320_v34 = vmul.f32 1.442695, %v2316_v3 }
 0x3cf   :  { %v1767_v12 = vpop.permute.xlu0 %1766  ;;  %v4944_v51 = vpop.permute.xlu1 %2103 }
 0x3d0   :  { %1473 = vperm.xlu1 %3603, %v4876_v5   ;;  %v4962_v61 = vpop.permute.xlu2 %2109  ;;  %v1900_v57 = vperm.slane %v1767_v12, %v4568_v11  ;;  %v2232_v62 = vperm.slane %v4944_v51, %v4574_v40 }
 0x3d1   :  { %v2235_v37 = vperm.slane %v4962_v61, %v4574_v40 }
 0x3d2   :  { %3611 = vset.pattern.permute.xlu2 %v5601_v56  ;;  %v1902_v54 = vsel %vm1517_vm2, %v1901_v30, %v1900_v57  ;;  %v5604_v57 = vld [vmem:[#allocation21_spill] sm:$0xff] }
 0x3d3   :  { %v4947_v43 = vpop.f32.mrf.mxu2  ;;  %1817 = vperm.xlu2 %3611, %v1217_v59   ;;  %v1955_v7 = vsel %vm1616_vm5, %v1902_v54, %v1954_v0  ;;  %v2386_v48 = vadd.f32 %v5605_v4, %v5604_v57 }
 0x3d4   :  { %3613 = vset.pattern.permute.xlu0 %v5601_v56 }
 0x3d5   :  { %1820 = vperm.xlu0 %3613, %v4947_v43   ;;  %3763 = vtanh.f32 %v2386_v48 }
 0x3d6   :  { %3765 = vpow2.f32 %v2320_v34 }
 0x3d8   :  { %3604 = vset.pattern.permute.xlu1 %v5601_v56  ;;  %v2098_v36 = vpop.permute.xlu0 %2097  ;;  %v4958_v26 = vpop.permute.xlu1 %1778 }
 0x3d9   :  { %1802 = vperm.xlu1 %3604, %v4876_v5   ;;  %v2113_v25 = vpop.permute.xlu2 %2112  ;;  %v2229_v31 = vperm.slane %v2098_v36, %v4574_v40  ;;  %v1906_v2 = vperm.slane %v4958_v26, %v4568_v11  ;;  %v1956_v36 = vsel %vm1618_vm6, %v1905_v45, %v1955_v7 }
 0x3da   :  { %v2237_v1 = vperm.slane %v2113_v25, %v4568_v11 }
 0x3db   :  { %v4955_v28 = vpop.f32.mrf.mxu2  ;;  %3614 = vset.pattern.permute.xlu2 %v5600_v32  ;;  %v2230_v38 = vsel %vm1517_vm2, %v2229_v31, %v2228_v8 }
 0x3dc   :  { %1494 = vperm.xlu2 %3614, %v4955_v28   ;;  %v2283_v15 = vsel %vm1616_vm5, %v2230_v38, %v2282_v21 }
 0x3dd   :  { %3616 = vset.pattern.permute.xlu0 %v5600_v32 }
 0x3e0   :  { %v2101_v23 = vpop.permute.xlu0 %2100 }
 0x3e1   :  { %1808 = vperm.xlu1 %3604, %v1208_v18   ;;  %v2107_v5 = vpop.permute.xlu1 %2106  ;;  %v2231_v55 = vperm.slane %v2101_v23, %v4568_v11  ;;  %v1907_v18 = vperm.slane %v4951_v19, %v4574_v40 }
 0x3e3   :  { %v1226_v49 = vpop.f32.mrf.mxu2  ;;  %v2233_v20 = vsel %vm1517_vm2, %v2232_v62, %v2231_v55  ;;  %v1908_v22 = vsel %vm1517_vm2, %v1907_v18, %v1906_v2 }
 0x3e4   :  { %3617 = vset.pattern.permute.xlu2 %v5601_v56  ;;  %1497 = vperm.xlu0 %3616, %v1226_v49   ;;  %v2284_v50 = vsel %vm1618_vm6, %v2233_v20, %v2283_v15  ;;  %v5607_v15 = vld [vmem:[#allocation19_spill] sm:$0xff] }
 0x3e5   :  { %1826 = vperm.xlu2 %3617, %v1226_v49   ;;  %v1957_v49 = vsel %vm1620_vm7, %v1908_v22, %v1956_v36 }
 0x3e6   :  { %v1794_v16 = vpop.permute.xlu2 %1793 }
 0x3e7   :  { %v1913_v59 = vperm.slane %v1794_v16, %v4574_v40 }
 0x3e9   :  { %3608 = vset.pattern.permute.xlu1 %v5600_v32  ;;  %v1785_v52 = vpop.permute.xlu0 %1784 }
 0x3ea   :  { %1482 = vperm.xlu1 %3608, %v1211_v42   ;;  %v2234_v42 = vperm.slane %v2107_v5, %v4568_v11  ;;  %v1909_v47 = vperm.slane %v1785_v52, %v4568_v11 }
 0x3eb   :  { %v4966_v6 = vpop.f32.mrf.mxu2 }
 0x3ec   :  { %3619 = vset.pattern.permute.xlu0 %v5601_v56  ;;  %v2236_v29 = vsel %vm1517_vm2, %v2235_v37, %v2234_v42 }
 0x3ed   :  { %1829 = vperm.xlu0 %3619, %v4966_v6   ;;  %3620 = vset.pattern.permute.xlu2 %v5600_v32  ;;  %v2285_v23 = vsel %vm1620_vm7, %v2236_v29, %v2284_v50 }
 0x3ee   :  { %v1788_v35 = vpop.permute.xlu1 %1787 }
 0x3ef   :  { %v1910_v46 = vperm.slane %v1788_v35, %v4574_v40 }
 0x3f1   :  { %v1911_v12 = vsel %vm1517_vm2, %v1910_v46, %v1909_v47  ;;  %v2383_v47 = vadd.f32 %v5607_v15, %v5604_v57 }
 0x3f2   :  { %3610 = vset.pattern.permute.xlu1 %v5601_v56  ;;  %v2116_v63 = vpop.permute.xlu0 %2115  ;;  %v1958_v25 = vsel %vm1622_vm8, %v1911_v12, %v1957_v49 }
 0x3f3   :  { %v4972_v58 = vpop.f32.mrf.mxu2  ;;  %1814 = vperm.xlu1 %3610, %v1214_v17   ;;  %v2238_v60 = vperm.slane %v2116_v63, %v4574_v40  ;;  %v2122_v17 = vpop.permute.xlu2 %2121  ;;  %3767 = vtanh.f32 %v2383_v47 }
 0x3f4   :  { %1503 = vperm.xlu2 %3620, %v4972_v58  }
 0x3f5   :  { %3622 = vset.pattern.permute.xlu0 %v5600_v32  ;;  %v2239_v51 = vsel %vm1517_vm2, %v2238_v60, %v2237_v1 }
 0x3f6   :  { %v1791_v27 = vpop.permute.xlu1 %1790  ;;  %v2286_v52 = vsel %vm1622_vm8, %v2239_v51, %v2285_v23 }
 0x3f7   :  { %v1912_v53 = vperm.slane %v1791_v27, %v4568_v11 }
 0x3f9   :  { %v1914_v26 = vsel %vm1517_vm2, %v1913_v59, %v1912_v53 }
 0x3fa   :  { %v1959_v16 = vsel %vm1624_vm9, %v1914_v26, %v1958_v25 }
 0x3fb   :  { %v1235_v13 = vpop.f32.mrf.mxu2  ;;  %3612 = vset.pattern.permute.xlu1 %v5600_v32  ;;  %v1468_v30 = vpop.permute.xlu2 %1467 }
 0x3fc   :  { %3623 = vset.pattern.permute.xlu2 %v5601_v56  ;;  %1506 = vperm.xlu0 %3622, %v1235_v13  }
 0x3fd   :  { %1491 = vperm.xlu1 %3612, %v4947_v43   ;;  %1835 = vperm.xlu2 %3623, %v1235_v13   ;;  %v2241_v43 = vperm.slane %v2122_v17, %v4574_v40 }
 0x3ff   :  { %v2119_v19 = vpop.permute.xlu1 %2118 }
 0x400   :  { %v2240_v61 = vperm.slane %v2119_v19, %v4568_v11 }
 0x402   :  { %v2242_v5 = vsel %vm1517_vm2, %v2241_v43, %v2240_v61 }
 0x403   :  { %v1238_v35 = vpop.f32.mrf.mxu2  ;;  %v2287_v41 = vsel %vm1624_vm9, %v2242_v5, %v2286_v52  ;;  %v1797_v55 = vpop.permute.xlu2 %1796 }
 0x404   :  { %3625 = vset.pattern.permute.xlu0 %v5601_v56  ;;  %v5043_v10 = vsel %vm1246_vm10, %v2287_v41, %v1959_v16  ;;  %v1915_v0 = vperm.slane %v1797_v55, %v4568_v11 }
 0x405   :  { %3615 = vset.pattern.permute.xlu1 %v5601_v56  ;;  %1838 = vperm.xlu0 %3625, %v1238_v35  }
 0x406   :  { %1823 = vperm.xlu1 %3615, %v4955_v28   ;;  %3626 = vset.pattern.permute.xlu2 %v5600_v32  ;;  %v2310_v28 = vsel %vm2303_vm11, %v5043_v10, -inf }
 0x40b   :  { %v1241_v31 = vpop.f32.mrf.mxu2  ;;  %v1477_v14 = vpop.permute.xlu2 %1476 }
 0x40c   :  { %v1592_v18 = vperm.slane %v1477_v14, %v4574_v40 }
 0x40d   :  { %3628 = vset.pattern.permute.xlu0 %v5602_v24  ;;  %v3764_v24 = vpop.eup %3763 }
 0x40e   :  { %3618 = vset.pattern.permute.xlu1 %v5600_v32  ;;  %v5079_v7 = vpop.eup %3765 }
 0x40f   :  { %1500 = vperm.xlu1 %3618, %v4966_v6   ;;  %v5606_v6 = vld [vmem:[#allocation22_spill] sm:$0xff]  ;;  %v2328_v53 = vsel %vm2303_vm11, %v5079_v7, 0.0  ;;  %v3768_v29 = vpop.eup %3767 }
 0x410   :  { %v2400_v27 = vmul.f32 %v3764_v24, %v5606_v6  ;;  %v2399_v12 = vmul.f32 %v3768_v29, %v5606_v6 }
 0x412   :  { %v2403_v19 = vsel %vm101_vm0, %v2399_v12, 0.0 }
 0x413   :  { %v1806_v42 = vpop.permute.xlu2 %1805 }
 0x414   :  { %v1919_v20 = vperm.slane %v1806_v42, %v4574_v40 }
 0x417   :  { %3621 = vset.pattern.permute.xlu1 %v5601_v56 }
 0x418   :  { %1832 = vperm.xlu1 %3621, %v4972_v58   ;;  %v2406_v58 = vsel %vm101_vm0, %v2400_v27, 0.0 }
 0x41b   :  { %v1812_v17 = vpop.permute.xlu2 %1811 }
 0x420   :  { %3624 = vset.pattern.permute.xlu1 %v5600_v32  ;;  %v1471_v32 = vpop.permute.xlu0 %1470 }
 0x421   :  { %1509 = vperm.xlu1 %3624, %v1238_v35   ;;  %v1589_v9 = vperm.slane %v1471_v32, %v4574_v40 }
 0x424   :  { %v1486_v59 = vpop.permute.xlu2 %1485 }
 0x426   :  { %2311 = vmax.xlane.f32.xlu2 %v2310_v28 }
 0x428   :  { %v1800_v2 = vpop.permute.xlu0 %1799 }
 0x429   :  { %3627 = vset.pattern.permute.xlu1 %v5601_v56  ;;  %v1588_v56 = vperm.slane %v1468_v30, %v4568_v11  ;;  %v1916_v33 = vperm.slane %v1800_v2, %v4574_v40 }
 0x42a   :  { %1841 = vperm.xlu1 %3627, %v1241_v31   ;;  %v2309_v8 = vpop.xlane.xlu1 %2308 }
 0x42b   :  { %v1590_v62 = vsel %vm1517_vm2, %v1589_v9, %v1588_v56  ;;  %v1917_v60 = vsel %vm1517_vm2, %v1916_v33, %v1915_v0  ;;  %v2317_v50 = vsub.f32 %v4905_v44, %v2309_v8  ;;  %v1597_v8 = vperm.slane %v1486_v59, %v4568_v11 }
 0x42d   :  { %v2322_v45 = vmul.f32 1.442695, %v2317_v50  ;;  %v1818_v26 = vpop.permute.xlu2 %1817 }
 0x42f   :  { %2407 = vadd.xlane.f32.xlu0 %v2406_v58  ;;  %3769 = vpow2.f32 %v2322_v45  ;;  %v1922_v58 = vperm.slane %v1812_v17, %v4574_v40 }
 0x430   :  { %v1480_v36 = vpop.permute.xlu0 %1479 }
 0x431   :  { %v1594_v27 = vperm.slane %v1480_v36, %v4568_v11 }
 0x435   :  { %v5088_v43 = vpop.eup %3769 }
 0x436   :  { %v2331_v61 = vsel %vm2303_vm11, %v5088_v43, 0.0  ;;  %v1495_v44 = vpop.permute.xlu2 %1494 }
 0x43e   :  { %1512 = vperm.xlu2 %3626, %v1241_v31   ;;  %v1489_v49 = vpop.permute.xlu0 %1488 }
 0x43f   :  { %v1827_v52 = vpop.permute.xlu2 %1826  ;;  %v1598_v30 = vperm.slane %v1489_v49, %v4574_v40 }
 0x442   :  { %v1474_v63 = vpop.permute.xlu1 %1473 }
 0x443   :  { %v1591_v54 = vperm.slane %v1474_v63, %v4568_v11  ;;  %v1925_v63 = vperm.slane %v1818_v26, %v4574_v40 }
 0x445   :  { %v1593_v21 = vsel %vm1517_vm2, %v1592_v18, %v1591_v54 }
 0x446   :  { %v5070_v38 = vsel %vm1612_vm3, %v1593_v21, %v1590_v62  ;;  %v1601_v62 = vperm.slane %v1495_v44, %v4574_v40  ;;  %v1599_v21 = vsel %vm1517_vm2, %v1598_v30, %v1597_v8 }
 0x447   :  { %v1821_v25 = vpop.permute.xlu0 %1820 }
 0x448   :  { %v1927_v34 = vperm.slane %v1821_v25, %v4568_v11 }
 0x44b   :  { %v1803_v39 = vpop.permute.xlu1 %1802 }
 0x44c   :  { %v1918_v46 = vperm.slane %v1803_v39, %v4568_v11 }
 0x44e   :  { %v1920_v13 = vsel %vm1517_vm2, %v1919_v20, %v1918_v46  ;;  %v1504_v41 = vpop.permute.xlu2 %1503 }
 0x44f   :  { %v1960_v37 = vsel %vm1612_vm3, %v1920_v13, %v1917_v60  ;;  %v1606_v45 = vperm.slane %v1504_v41, %v4568_v11 }
 0x453   :  { %v1809_v1 = vpop.permute.xlu1 %1808 }
 0x454   :  { %2329 = vadd.xlane.f32.xlu1 %v2328_v53  ;;  %v1921_v6 = vperm.slane %v1809_v1, %v4568_v11 }
 0x456   :  { %v1498_v35 = vpop.permute.xlu0 %1497  ;;  %v1923_v56 = vsel %vm1517_vm2, %v1922_v58, %v1921_v6  ;;  %v5611_v58 = vld [vmem:[#allocation14_spill] sm:$0xff] }
 0x457   :  { %v1836_v48 = vpop.permute.xlu2 %1835  ;;  %v1603_v2 = vperm.slane %v1498_v35, %v4568_v11  ;;  %v1961_v20 = vsel %vm1614_vm4, %v1923_v56, %v1960_v37 }
 0x458   :  { %v1934_v15 = vperm.slane %v1836_v48, %v4574_v40 }
 0x45c   :  { %v1483_v22 = vpop.permute.xlu1 %1482 }
 0x45d   :  { %v1595_v31 = vperm.slane %v1483_v22, %v4574_v40  ;;  %v1930_v22 = vperm.slane %v1827_v52, %v4568_v11 }
 0x45f   :  { %v1830_v4 = vpop.permute.xlu0 %1829  ;;  %v1596_v32 = vsel %vm1517_vm2, %v1595_v31, %v1594_v27  ;;  %v5609_v31 = vld [vmem:[#allocation24_spill] sm:$0xff]  ;;  %v5610_v27 = vld [vmem:[#allocation13_spill] sm:$0xff] }
 0x460   :  { %v1641_v42 = vsel %vm1614_vm4, %v1596_v32, %v5070_v38  ;;  %v1931_v53 = vperm.slane %v1830_v4, %v4574_v40  ;;  %v2412_v6 = vsel %vm101_vm0, %v5609_v31, 0.0 }
 0x461   :  { %v1642_v17 = vsel %vm1616_vm5, %v1599_v21, %v1641_v42 }
 0x462   :  { %v1932_v36 = vsel %vm1517_vm2, %v1931_v53, %v1930_v22 }
 0x465   :  { %v1815_v51 = vpop.permute.xlu1 %1814 }
 0x466   :  { %v1924_v55 = vperm.slane %v1815_v51, %v4568_v11 }
 0x467   :  { %2404 = vadd.xlane.f32.xlu2 %v2403_v19 }
 0x468   :  { %v1926_v33 = vsel %vm1517_vm2, %v1925_v63, %v1924_v55  ;;  %v5612_v55 = vld [vmem:[#allocation16_spill] sm:$0xff] }
 0x469   :  { %v1962_v47 = vsel %vm1616_vm5, %v1926_v33, %v1961_v20 }
 0x46e   :  { %v1507_v28 = vpop.permute.xlu0 %1506 }
 0x46f   :  { %v1492_v23 = vpop.permute.xlu1 %1491  ;;  %2332 = vadd.xlane.f32.xlu2 %v2331_v61  ;;  %v1607_v37 = vperm.slane %v1507_v28, %v4574_v40  ;;  %v5608_v28 = vld [vmem:[#allocation23_spill] sm:$0xff] }
 0x470   :  { %v1600_v14 = vperm.slane %v1492_v23, %v4568_v11 }
 0x471   :  { %v1608_v23 = vsel %vm1517_vm2, %v1607_v37, %v1606_v45 }
 0x472   :  { %v1602_v46 = vsel %vm1517_vm2, %v1601_v62, %v1600_v14  ;;  %v5613_v14 = vld [vmem:[#allocation17_spill] sm:$0xff] }
 0x473   :  { %v1643_v50 = vsel %vm1618_vm6, %v1602_v46, %v1642_v17 }
 0x478   :  { %v1824_v5 = vpop.permute.xlu1 %1823 }
 0x479   :  { %v1928_v9 = vperm.slane %v1824_v5, %v4574_v40 }
 0x47b   :  { %v1929_v60 = vsel %vm1517_vm2, %v1928_v9, %v1927_v34 }
 0x47c   :  { %v1963_v59 = vsel %vm1618_vm6, %v1929_v60, %v1962_v47 }
 0x47d   :  { %v1964_v44 = vsel %vm1620_vm7, %v1932_v36, %v1963_v59 }
 0x481   :  { %v1501_v16 = vpop.permute.xlu1 %1500 }
 0x482   :  { %v1604_v18 = vperm.slane %v1501_v16, %v4574_v40 }
 0x484   :  { %v1605_v1 = vsel %vm1517_vm2, %v1604_v18, %v1603_v2 }
 0x485   :  { %v1644_v12 = vsel %vm1620_vm7, %v1605_v1, %v1643_v50 }
 0x486   :  { %v1645_v52 = vsel %vm1622_vm8, %v1608_v23, %v1644_v12  ;;  %v5615_v23 = vld [vmem:[#allocation15_spill] sm:$0xff] }
 0x48a   :  { %v1833_v57 = vpop.permute.xlu1 %1832 }
 0x48b   :  { %v1933_v13 = vperm.slane %v1833_v57, %v4568_v11 }
 0x48d   :  { %v1935_v51 = vsel %vm1517_vm2, %v1934_v15, %v1933_v13 }
 0x48e   :  { %v1965_v35 = vsel %vm1622_vm8, %v1935_v51, %v1964_v44 }
 0x493   :  { %v1510_v24 = vpop.permute.xlu1 %1509 }
 0x494   :  { %v1609_v26 = vperm.slane %v1510_v24, %v4568_v11  ;;  %v2409_v24 = vsel %vm101_vm0, %v5608_v28, 0.0 }
 0x499   :  { %v2312_v3 = vpop.xlane.xlu2 %2311 }
 0x49a   :  { %v2318_v54 = vsub.f32 %v5043_v10, %v2312_v3  ;;  %v1839_v10 = vpop.permute.xlu0 %1838 }
 0x49b   :  { %v1936_v29 = vperm.slane %v1839_v10, %v4568_v11 }
 0x49c   :  { %v2324_v39 = vmul.f32 1.442695, %v2318_v54  ;;  %v1842_v0 = vpop.permute.xlu1 %1841 }
 0x49d   :  { %v1937_v38 = vperm.slane %v1842_v0, %v4574_v40 }
 0x49e   :  { %3771 = vpow2.f32 %v2324_v39 }
 0x49f   :  { %v1938_v61 = vsel %vm1517_vm2, %v1937_v38, %v1936_v29 }
 0x4a0   :  { %v1966_v57 = vsel %vm1624_vm9, %v1938_v61, %v1965_v35 }
 0x4a1   :  { %v1513_v19 = vpop.permute.xlu2 %1512 }
 0x4a2   :  { %v1610_v49 = vperm.slane %v1513_v19, %v4574_v40  ;;  %v2408_v9 = vpop.xlane.xlu0 %2407 }
 0x4a4   :  { %v5137_v5 = vpop.eup %3771  ;;  %v1611_v25 = vsel %vm1517_vm2, %v1610_v49, %v1609_v26  ;;  %v5614_v49 = vld [vmem:[#allocation12_spill] sm:$0xff] }
 0x4a5   :  { %v2334_v16 = vsel %vm2303_vm11, %v5137_v5, 0.0  ;;  %v1646_v41 = vsel %vm1624_vm9, %v1611_v25, %v1645_v52 }
 0x4a6   :  { %2335 = vadd.xlane.f32.xlu0 %v2334_v16  ;;  %v1974_v4 = vsel %vm1251_vm12, %v1646_v41, %v1966_v57 }
 0x4a7   :  { %v2313_v48 = vsel %vm2303_vm11, %v1974_v4, -inf }
 0x4a8   :  { %2314 = vmax.xlane.f32.xlu1 %v2313_v48 }
 0x4ae   :  { %2410 = vadd.xlane.f32.xlu0 %v2409_v24 }
 0x4b0   :  { %2413 = vadd.xlane.f32.xlu1 %v2412_v6 }
 0x4c2   :  { %2543 = vrot.lane.b32.xlu0 %v5610_v27, %s3968_s25 }
 0x4c7   :  { %v2330_v30 = vpop.xlane.xlu1 %2329 }
 0x4c8   :  { %3773 = vrcp.f32 %v2330_v30  ;;  %v93_v30 = vld [vmem:[%s5567_s4 + $0x38] sm:$0xff] }
 0x4c9   :  { %2547 = vrot.lane.b32.xlu1 %v5611_v58, %s3968_s25  ;;  %v92_v58 = vld [vmem:[%s5567_s4 + $0x30] sm:$0xff]  ;;  %2664 = vmatpush.msrb.mxu0 %v93_v30 }
 0x4ca   :  { %2545 = vrot.lane.b32.xlu0 %v5612_v55, %s3968_s25 }
 0x4cb   :  { %2665 = vmatpush.msrb.mxu0 %v92_v58 }
 0x4ce   :  { %v3774_v8 = vpop.eup %3773 }
 0x4cf   :  { %v2344_v32 = vmul.f32 %v3774_v8, %v5079_v7 }
 0x4d1   :  { %3460 = vmatmul.msk.f32.vlgmr.msra.gmra.mxu0 %vm2303_vm11, %v2344_v32  ;;  %2551 = vrot.lane.b32.xlu1 %v5613_v14, %s3968_s25 }
 0x4da   :  { %v2405_v3 = vpop.xlane.xlu2 %2404 }
 0x4db   :  { %v2415_v63 = vmax.f32 %v2405_v3, %v2408_v9 }
 0x4dd   :  { %v2416_v56 = vrot.slane %v2415_v63, 4 }
 0x4df   :  { %v2417_v18 = vmax.f32 %v2415_v63, %v2416_v56  ;;  %v91_v63 = vld [vmem:[%s5567_s4 + $0x28] sm:$0xff] }
 0x4e0   :  { %2666 = vmatpush.msrb.mxu0 %v91_v63  ;;  %v95_v63 = vld [vmem:[#allocation7 + $0x8] sm:$0x3] }
 0x4e1   :  { %v2418_v54 = vrot.slane %v2417_v18, 2 }
 0x4e2   :  { %v2333_v62 = vpop.xlane.xlu2 %2332 }
 0x4e3   :  { %v2419_v21 = vmax.f32 %v2417_v18, %v2418_v54  ;;  %3775 = vrcp.f32 %v2333_v62  ;;  %v90_v18 = vld [vmem:[%s5567_s4 + $0x20] sm:$0xff]  ;;  %v89_v62 = vld [vmem:[%s5567_s4 + $0x18] sm:$0xff] }
 0x4e4   :  { %2667 = vmatpush.msrb.mxu0 %v90_v18 }
 0x4e5   :  { %v2420_v34 = vrot.slane %v2419_v21, 1 }
 0x4e6   :  { %2668 = vmatpush.msrb.mxu0 %v89_v62 }
 0x4e7   :  { %v2421_v2 = vmax.f32 %v2419_v21, %v2420_v34  ;;  %v88_v21 = vld [vmem:[%s5567_s4 + $0x10] sm:$0xff]  ;;  %v87_v34 = vld [vmem:[%s5567_s4 + $0x8] sm:$0xff] }
 0x4e8   :  { %2669 = vmatpush.msrb.mxu0 %v88_v21  ;;  %v5223_v21 = vperm.slane %v95_v63, 1 }
 0x4e9   :  { %v3776_v42 = vpop.eup %3775  ;;  %v2429_v33 = vsub.f32 %v2405_v3, %v2421_v2  ;;  %v2430_v39 = vsub.f32 %v2408_v9, %v2421_v2 }
 0x4ea   :  { %v2345_v7 = vmul.f32 %v3776_v42, %v5088_v43  ;;  %2670 = vmatpush.msrb.mxu0 %v87_v34  ;;  %v86_v42 = vld [vmem:[%s5567_s4] sm:$0xff]  ;;  %s3974_s4 = smov 64  }
 0x4eb   :  { %v2433_v0 = vmul.f32 1.442695, %v2429_v33  ;;  %v2435_v20 = vmul.f32 1.442695, %v2430_v39 }
 0x4ec   :  { %3461 = vmatmul.msk.f32.gmra.mxu0 %vm2303_vm11, %v2345_v7 }
 0x4ed   :  { %3777 = vpow2.f32 %v2433_v0  ;;  %2671 = vmatpush.msrb.mxu0 %v86_v42 }
 0x4ee   :  { %3779 = vpow2.f32 %v2435_v20 }
 0x4f3   :  { %v3778_v46 = vpop.eup %3777 }
 0x4f4   :  { %v3780_v10 = vpop.eup %3779 }
 0x4f5   :  { %v2441_v60 = vadd.f32 %v3780_v10, %v3778_v46 }
 0x4f7   :  { %v2442_v13 = vrot.slane %v2441_v60, 4 }
 0x4f9   :  { %v2443_v53 = vadd.f32 %v2442_v13, %v2441_v60 }
 0x4fb   :  { %v2444_v1 = vrot.slane %v2443_v53, 2 }
 0x4fd   :  { %v2445_v38 = vadd.f32 %v2444_v1, %v2443_v53 }
 0x4ff   :  { %v2446_v15 = vrot.slane %v2445_v38, 1 }
 0x501   :  { %v2447_v47 = vadd.f32 %v2446_v15, %v2445_v38 }
 0x503   :  { %3781 = vrcp.f32 %v2447_v47 }
 0x509   :  { %v3782_v37 = vpop.eup %3781 }
 0x50a   :  { %v2457_v17 = vmul.f32 %v3782_v37, %v3778_v46  ;;  %v2458_v22 = vmul.f32 %v3782_v37, %v3780_v10 }
 0x50c   :  { %v2465_v43 = vperm.slane %v2457_v17, %v4568_v11  ;;  %v2466_v50 = vperm.slane %v2458_v22, %v4574_v40 }
 0x50e   :  { %v2467_v29 = vsel %vm1517_vm2, %v2466_v50, %v2465_v43 }
 0x50f   :  { %3462 = vmatmul.msk.f32.gmra.mxu0 %vm2303_vm11, %v2467_v29 }
 0x519   :  { %v2336_v59 = vpop.xlane.xlu0 %2335 }
 0x51a   :  { %3783 = vrcp.f32 %v2336_v59  ;;  %v3860_v59 = vld [vmem:[#allocation7] sm:$0xff] }
 0x51b   :  { %v2315_v45 = vpop.xlane.xlu1 %2314 }
 0x51c   :  { %v2319_v12 = vsub.f32 %v1974_v4, %v2315_v45  ;;  %v3119_v45 = vperm.slane %v3860_v59, 7 }
 0x51e   :  { %v2326_v51 = vmul.f32 1.442695, %v2319_v12  ;;  %3122 = vrot.lane.b32.xlu0 %v3119_v45, %s3968_s25 }
 0x520   :  { %v3784_v19 = vpop.eup %3783  ;;  %3785 = vpow2.f32 %v2326_v51  ;;  %v3121_v51 = vrot.slane %v3119_v45, 1 }
 0x521   :  { %v2346_v36 = vmul.f32 %v3784_v19, %v5137_v5  ;;  %v2411_v25 = vpop.xlane.xlu0 %2410 }
 0x523   :  { %3463 = vmatmul.msk.f32.vlgmr.msrb.gmra.mxu3 %vm2303_vm11, %v2346_v36  ;;  %v2414_v44 = vpop.xlane.xlu1 %2413 }
 0x524   :  { %v2422_v52 = vmax.f32 %v2411_v25, %v2414_v44 }
 0x526   :  { %v3786_v26 = vpop.eup %3785  ;;  %v2423_v35 = vrot.slane %v2422_v52, 4 }
 0x527   :  { %v2337_v61 = vsel %vm2303_vm11, %v3786_v26, 0.0 }
 0x528   :  { %2338 = vadd.xlane.f32.xlu2 %v2337_v61  ;;  %v2424_v16 = vmax.f32 %v2422_v52, %v2423_v35 }
 0x52a   :  { %v2425_v41 = vrot.slane %v2424_v16, 2 }
 0x52c   :  { %v2426_v57 = vmax.f32 %v2424_v16, %v2425_v41 }
 0x52e   :  { %v2427_v5 = vrot.slane %v2426_v57, 1 }
 0x530   :  { %v2428_v4 = vmax.f32 %v2426_v57, %v2427_v5 }
 0x532   :  { %v2431_v48 = vsub.f32 %v2411_v25, %v2428_v4  ;;  %v2432_v28 = vsub.f32 %v2414_v44, %v2428_v4 }
 0x534   :  { %v2437_v24 = vmul.f32 1.442695, %v2431_v48  ;;  %v2439_v31 = vmul.f32 1.442695, %v2432_v28  ;;  %v2544_v50 = vpop.permute.xlu0 %2543 }
 0x536   :  { %3787 = vpow2.f32 %v2437_v24 }
 0x537   :  { %3789 = vpow2.f32 %v2439_v31 }
 0x53b   :  { %v2548_v44 = vpop.permute.xlu1 %2547 }
 0x53c   :  { %v3788_v6 = vpop.eup %3787  ;;  %v2546_v35 = vpop.permute.xlu0 %2545 }
 0x53d   :  { %v3790_v27 = vpop.eup %3789 }
 0x53e   :  { %v2448_v55 = vadd.f32 %v3790_v27, %v3788_v6 }
 0x540   :  { %2541 = vrot.lane.b32.xlu2 %v5614_v49, %s3968_s25  ;;  %v2449_v8 = vrot.slane %v2448_v55, 4 }
 0x542   :  { %v2450_v32 = vadd.f32 %v2449_v8, %v2448_v55 }
 0x544   :  { %v2451_v14 = vrot.slane %v2450_v32, 2 }
 0x546   :  { %v2452_v9 = vadd.f32 %v2451_v14, %v2450_v32 }
 0x548   :  { %2549 = vrot.lane.b32.xlu2 %v5615_v23, %s3968_s25  ;;  %v2453_v3 = vrot.slane %v2452_v9, 1 }
 0x54a   :  { %v2454_v56 = vadd.f32 %v2453_v3, %v2452_v9 }
 0x54c   :  { %3791 = vrcp.f32 %v2454_v56  ;;  %v5215_v56 = vperm.slane %v3860_v59, 6 }
 0x54e   :  { %v2496_v39 = vpop.f32.mrf.mxu0 }
 0x550   :  { %3124 = vrot.lane.b32.xlu2 %v3121_v51, %s3968_s25 }
 0x552   :  { %v3792_v2 = vpop.eup %3791 }
 0x553   :  { %v2460_v20 = vmul.f32 %v3792_v2, %v3790_v27  ;;  %v2459_v10 = vmul.f32 %v3792_v2, %v3788_v6 }
 0x555   :  { %v2468_v47 = vperm.slane %v2459_v10, %v4568_v11  ;;  %v2469_v37 = vperm.slane %v2460_v20, %v4574_v40 }
 0x557   :  { %v2470_v22 = vsel %vm1517_vm2, %v2469_v37, %v2468_v47  ;;  %v5234_v47 = vrot.slane %v5215_v56, 1 }
 0x569   :  { %v2499_v43 = vpop.f32.mrf.mxu0 }
 0x56a   :  { %v2560_v29 = vsel %vm101_vm0, %v2499_v43, %v2544_v50 }
 0x56b   :  { %v2578_v11 = vrot.slane %v2560_v29, 1  ;;  %v2579_v40 = vrot.slane %v2560_v29, 2  ;;  %v2580_v19 = vrot.slane %v2560_v29, 3  ;;  %v2581_v36 = vrot.slane %v2560_v29, 4 }
 0x56c   :  { %v2583_v61 = vrot.slane %v2560_v29, 6  ;;  %v2584_v49 = vrot.slane %v2560_v29, 7 }
 0x58c   :  { %v2502_v25 = vpop.f32.mrf.mxu0 }
 0x58d   :  { %v2561_v16 = vsel %vm101_vm0, %v2502_v25, %v2546_v35  ;;  %v5266_v35 = vrot.slane %v5215_v56, 3 }
 0x59b   :  { %v2339_v54 = vpop.xlane.xlu2 %2338 }
 0x59c   :  { %3793 = vrcp.f32 %v2339_v54  ;;  %v5219_v54 = vperm.slane %v95_v63, 0 }
 0x59e   :  { %v5242_v50 = vrot.slane %v5219_v54, 1 }
 0x5a2   :  { %v3794_v33 = vpop.eup %3793 }
 0x5a3   :  { %v2542_v7 = vpop.permute.xlu2 %2541  ;;  %v2347_v0 = vmul.f32 %v3794_v33, %v3786_v26  ;;  %v2582_v26 = vrot.slane %v2560_v29, 5  ;;  %v2552_v33 = vpop.permute.xlu1 %2551 }
 0x5a4   :  { %v2559_v46 = vsel %vm101_vm0, %v2496_v39, %v2542_v7 }
 0x5a5   :  { %v2571_v60 = vrot.slane %v2559_v46, 1  ;;  %v2572_v13 = vrot.slane %v2559_v46, 2  ;;  %v2573_v53 = vrot.slane %v2559_v46, 3  ;;  %2599 = vst [vmem:[#allocation1] ss:$9 sm:$0xff] %v2559_v46  ;;  %3464 = vmatmul.msk.f32.gmra.mxu3 %vm2303_vm11, %v2347_v0  ;;  %v2574_v1 = vrot.slane %v2559_v46, 4 }
 0x5a6   :  { %v2575_v38 = vrot.slane %v2559_v46, 5  ;;  %v2576_v15 = vrot.slane %v2559_v46, 6  ;;  %v2577_v17 = vrot.slane %v2559_v46, 7  ;;  %v2530_v23 = vpop.f32.mrf.mxu3 }
 0x5a7   :  { %2601 = vst [vmem:[#allocation1 + $0x1] ss:$9 sm:$0xff] %v2571_v60  ;;  %v2562_v52 = vsel %vm101_vm0, %v2530_v23, %v2548_v44 }
 0x5a8   :  { %2603 = vst [vmem:[#allocation1 + $0x2] ss:$9 sm:$0xff] %v2572_v13  ;;  %v2585_v57 = vrot.slane %v2562_v52, 1  ;;  %v2586_v5 = vrot.slane %v2562_v52, 2  ;;  %v2587_v4 = vrot.slane %v2562_v52, 3  ;;  %v2588_v48 = vrot.slane %v2562_v52, 4 }
 0x5a9   :  { %2605 = vst [vmem:[#allocation1 + $0x3] ss:$9 sm:$0xff] %v2573_v53  ;;  %v2589_v28 = vrot.slane %v2562_v52, 5  ;;  %v2590_v24 = vrot.slane %v2562_v52, 6  ;;  %v2591_v31 = vrot.slane %v2562_v52, 7 }
 0x5aa   :  { %2607 = vst [vmem:[#allocation1 + $0x4] ss:$9 sm:$0xff] %v2574_v1 }
 0x5ab   :  { %2609 = vst [vmem:[#allocation1 + $0x5] ss:$9 sm:$0xff] %v2575_v38  ;;  %v2550_v27 = vpop.permute.xlu2 %2549 }
 0x5ac   :  { %2611 = vst [vmem:[#allocation1 + $0x6] ss:$9 sm:$0xff] %v2576_v15 }
 0x5ad   :  { %2613 = vst [vmem:[#allocation1 + $0x7] ss:$9 sm:$0xff] %v2577_v17  ;;  %3465 = vmatmul.msk.f32.gmra.mxu3 %vm2303_vm11, %v2470_v22 }
 0x5b4   :  { %v2614_v12 = vld [vmem:[#allocation1] sm:$0xff] }
 0x5b5   :  { %2615 = vst [vmem:[#allocation1] ss:$9 sm:$0xff] %v2560_v29  ;;  %3466 = vmatmul.msk.f32.vlgmr.msrb.gmra.mxu0 %vm2645_vm13, %v2614_v12 }
 0x5b6   :  { %2616 = vst [vmem:[#allocation1 + $0x1] ss:$9 sm:$0xff] %v2578_v11  ;;  %v5248_v11 = vrot.slane %v5223_v21, 1 }
 0x5b7   :  { %2617 = vst [vmem:[#allocation1 + $0x2] ss:$9 sm:$0xff] %v2579_v40  ;;  %v5252_v40 = vrot.slane %v5215_v56, 2 }
 0x5b8   :  { %2618 = vst [vmem:[#allocation1 + $0x3] ss:$9 sm:$0xff] %v2580_v19 }
 0x5b9   :  { %2619 = vst [vmem:[#allocation1 + $0x4] ss:$9 sm:$0xff] %v2581_v36 }
 0x5ba   :  { %2620 = vst [vmem:[#allocation1 + $0x5] ss:$9 sm:$0xff] %v2582_v26 }
 0x5bb   :  { %2621 = vst [vmem:[#allocation1 + $0x6] ss:$9 sm:$0xff] %v2583_v61 }
 0x5bc   :  { %2622 = vst [vmem:[#allocation1 + $0x7] ss:$9 sm:$0xff] %v2584_v49  ;;  %v5260_v49 = vrot.slane %v5219_v54, 2 }
 0x5c3   :  { %v2623_v41 = vld [vmem:[#allocation1] sm:$0xff] }
 0x5c4   :  { %2624 = vst [vmem:[#allocation1] ss:$9 sm:$0xff] %v2561_v16  ;;  %3467 = vmatmul.msk.f32.gmra.mxu0 %vm2645_vm13, %v2623_v41  ;;  %v5270_v41 = vrot.slane %v5223_v21, 2 }
 0x5c5   :  { %2625 = vst [vmem:[#allocation1 + $0x1] ss:$9 sm:$0xff] %v2562_v52 }
 0x5c6   :  { %2626 = vst [vmem:[#allocation1 + $0x2] ss:$9 sm:$0xff] %v2585_v57 }
 0x5c7   :  { %2627 = vst [vmem:[#allocation1 + $0x3] ss:$9 sm:$0xff] %v2586_v5 }
 0x5c8   :  { %2628 = vst [vmem:[#allocation1 + $0x4] ss:$9 sm:$0xff] %v2587_v4 }
 0x5c9   :  { %2629 = vst [vmem:[#allocation1 + $0x5] ss:$9 sm:$0xff] %v2588_v48 }
 0x5ca   :  { %2630 = vst [vmem:[#allocation1 + $0x6] ss:$9 sm:$0xff] %v2589_v28 }
 0x5cb   :  { %2631 = vst [vmem:[#allocation1 + $0x7] ss:$9 sm:$0xff] %v2590_v24 }
 0x5d2   :  { %v2632_v6 = vld [vmem:[#allocation1] sm:$0xff] }
 0x5d3   :  { %2633 = vst [vmem:[#allocation1] ss:$9 sm:$0xff] %v2591_v31  ;;  %3468 = vmatmul.msk.f32.gmra.mxu0 %vm2645_vm13, %v2632_v6  ;;  %v5280_v6 = vrot.slane %v5219_v54, 3 }
 0x628   :  { %v2533_v30 = vpop.f32.mrf.mxu3 }
 0x629   :  { %v2563_v58 = vsel %vm101_vm0, %v2533_v30, %v2550_v27 }
 0x62a   :  { %v2592_v55 = vrot.slane %v2563_v58, 1  ;;  %v2593_v8 = vrot.slane %v2563_v58, 2  ;;  %v2594_v32 = vrot.slane %v2563_v58, 3  ;;  %2634 = vst [vmem:[#allocation1 + $0x1] ss:$9 sm:$0xff] %v2563_v58  ;;  %v2595_v14 = vrot.slane %v2563_v58, 4 }
 0x62b   :  { %v2596_v9 = vrot.slane %v2563_v58, 5  ;;  %v2597_v3 = vrot.slane %v2563_v58, 6  ;;  %v2598_v42 = vrot.slane %v2563_v58, 7 }
 0x62c   :  { %2635 = vst [vmem:[#allocation1 + $0x2] ss:$9 sm:$0xff] %v2592_v55 }
 0x62d   :  { %2636 = vst [vmem:[#allocation1 + $0x3] ss:$9 sm:$0xff] %v2593_v8 }
 0x62e   :  { %2637 = vst [vmem:[#allocation1 + $0x4] ss:$9 sm:$0xff] %v2594_v32 }
 0x62f   :  { %2638 = vst [vmem:[#allocation1 + $0x5] ss:$9 sm:$0xff] %v2595_v14  ;;  %v5289_v14 = vrot.slane %v5223_v21, 3 }
 0x630   :  { %2639 = vst [vmem:[#allocation1 + $0x6] ss:$9 sm:$0xff] %v2596_v9  ;;  %v2536_v2 = vpop.f32.mrf.mxu3 }
 0x631   :  { %2640 = vst [vmem:[#allocation1 + $0x7] ss:$9 sm:$0xff] %v2597_v3  ;;  %v2564_v0 = vsel %vm101_vm0, %v2536_v2, %v2552_v33 }
 0x632   :  { %v5217_v18 = vpop.f32.mrf.mxu0 }
 0x633   :  { %v2767_v62 = vadd.f32 %v5215_v56, %v5217_v18  ;;  %v2693_v15 = vrot.slane %v5217_v18, 1  ;;  %v2694_v12 = vrot.slane %v5217_v18, 2  ;;  %v2695_v57 = vrot.slane %v5217_v18, 3 }
 0x634   :  { %v2696_v63 = vrot.slane %v5217_v18, 4 }
 0x635   :  { %v2815_v34 = vmul.f32 %v5219_v54, %v2767_v62  ;;  %v2768_v43 = vadd.f32 %v5234_v47, %v2693_v15  ;;  %v2769_v61 = vadd.f32 %v5252_v40, %v2694_v12  ;;  %v2770_v31 = vadd.f32 %v5266_v35, %v2695_v57 }
 0x636   :  { %v5294_v62 = vrot.slane %v5215_v56, 4  ;;  %v2697_v12 = vrot.slane %v5217_v18, 5 }
 0x637   :  { %v2863_v7 = vadd.f32 %v5223_v21, %v2815_v34  ;;  %v2816_v45 = vmul.f32 %v5242_v50, %v2768_v43  ;;  %v2817_v16 = vmul.f32 %v5260_v49, %v2769_v61  ;;  %v2818_v32 = vmul.f32 %v5280_v6, %v2770_v31 }
 0x638   :  { %v2641_v39 = vld [vmem:[#allocation1] sm:$0xff] }
 0x639   :  { %2642 = vst [vmem:[#allocation1] ss:$9 sm:$0xff] %v2598_v42  ;;  %v2927_v20 = vmul.f32 1.442695, %v2863_v7  ;;  %3469 = vmatmul.msk.f32.gmra.mxu0 %vm2645_vm13, %v2641_v39  ;;  %vm2895_vm14 = vcmp.gt.f32.partialorder %v2863_v7, 0.0  ;;  %v2864_v26 = vadd.f32 %v5248_v11, %v2816_v45  ;;  %v5276_v24 = vadd.f32 %v5270_v41, %v2817_v16 }
 0x63a   :  { %2643 = vst [vmem:[#allocation1 + $0x1] ss:$9 sm:$0xff] %v2564_v0 }
 0x63b   :  { %3795 = vpow2.f32 %v2927_v20  ;;  %v2929_v52 = vmul.f32 1.442695, %v2864_v26  ;;  %v2931_v55 = vmul.f32 1.442695, %v5276_v24  ;;  %v2771_v20 = vadd.f32 %v5294_v62, %v2696_v63 }
 0x63c   :  { %vm2896_vm1 = vcmp.gt.f32.partialorder %v2864_v26, 0.0  ;;  %vm2897_vm3 = vcmp.gt.f32.partialorder %v5276_v24, 0.0 }
 0x63d   :  { %3797 = vpow2.f32 %v2929_v52 }
 0x641   :  { %v2644_v46 = vld [vmem:[#allocation1] sm:$0xff]  ;;  %v3796_v10 = vpop.eup %3795  ;;  %v5230_v38 = vpop.f32.mrf.mxu0 }
 0x642   :  { %3470 = vmatmul.msk.f32.gmra.mxu0 %vm2645_vm13, %v2644_v46  ;;  %v3471_v60 = vadd.f32 -1.0, %v3796_v10  ;;  %v5303_v46 = vrot.slane %v5219_v54, 4 }
 0x643   :  { %v3798_v58 = vpop.eup %3797 }
 0x644   :  { %v3023_v13 = vmul.f32 1.6732632, %v3471_v60  ;;  %v3472_v33 = vadd.f32 -1.0, %v3798_v58  ;;  %v2819_v43 = vmul.f32 %v5303_v46, %v2771_v20 }
 0x646   :  { %v3055_v53 = vsel %vm2895_vm14, %v2863_v7, %v3023_v13  ;;  %v5299_v7 = vadd.f32 %v5289_v14, %v2818_v32  ;;  %v5337_v32 = vrot.slane %v5223_v21, 5 }
 0x647   :  { %v3087_v1 = vmul.f32 1.050701, %v3055_v53 }
 0x648   :  { %v2933_v15 = vmul.f32 1.442695, %v5299_v7  ;;  %vm2898_vm5 = vcmp.gt.f32.partialorder %v5299_v7, 0.0 }
 0x649   :  { %3132 = vst [vmem:[#allocation1] ss:$9 sm:$0xff] %v3087_v1  ;;  %v3024_v1 = vmul.f32 1.6732632, %v3472_v33 }
 0x650   :  { %v5236_v37 = vpop.f32.mrf.mxu0 }
 0x651   :  { %v2707_v17 = vrot.slane %v5236_v37, 1  ;;  %v2708_v22 = vrot.slane %v5236_v37, 2  ;;  %v2709_v51 = vrot.slane %v5236_v37, 3  ;;  %v2710_v28 = vrot.slane %v5236_v37, 4 }
 0x652   :  { %v2711_v42 = vrot.slane %v5236_v37, 5  ;;  %v2712_v61 = vrot.slane %v5236_v37, 6  ;;  %v2713_v63 = vrot.slane %v5236_v37, 7 }
 0x653   :  { %v2783_v29 = vadd.f32 %v5215_v56, %v2707_v17  ;;  %v2784_v59 = vadd.f32 %v5234_v47, %v2708_v22  ;;  %v2785_v23 = vadd.f32 %v5252_v40, %v2709_v51  ;;  %v2786_v30 = vadd.f32 %v5266_v35, %v2710_v28 }
 0x654   :  { %v2787_v13 = vadd.f32 %v5294_v62, %v2711_v42  ;;  %v5317_v51 = vrot.slane %v5215_v56, 5  ;;  %v5345_v42 = vrot.slane %v5215_v56, 6 }
 0x655   :  { %v2831_v19 = vmul.f32 %v5219_v54, %v2783_v29  ;;  %v2832_v36 = vmul.f32 %v5242_v50, %v2784_v59  ;;  %v2833_v5 = vmul.f32 %v5260_v49, %v2785_v23  ;;  %v2834_v34 = vmul.f32 %v5280_v6, %v2786_v30 }
 0x656   :  { %v5312_v29 = vrot.slane %v5223_v21, 4  ;;  %v2772_v57 = vadd.f32 %v5317_v51, %v2697_v12  ;;  %v5364_v12 = vrot.slane %v5223_v21, 6 }
 0x657   :  { %v2879_v44 = vadd.f32 %v5223_v21, %v2831_v19  ;;  %v2880_v25 = vadd.f32 %v5248_v11, %v2832_v36  ;;  %v5283_v27 = vadd.f32 %v5270_v41, %v2833_v5  ;;  %v5306_v10 = vadd.f32 %v5289_v14, %v2834_v34 }
 0x658   :  { %v2835_v19 = vmul.f32 %v5303_v46, %v2787_v13  ;;  %v3056_v36 = vsel %vm2896_vm1, %v2864_v26, %v3024_v1  ;;  %v5322_v52 = vadd.f32 %v5312_v29, %v2819_v43  ;;  %v5326_v5 = vrot.slane %v5219_v54, 5 }
 0x659   :  { %v2959_v4 = vmul.f32 1.442695, %v2879_v44  ;;  %v2961_v48 = vmul.f32 1.442695, %v2880_v25  ;;  %v2963_v9 = vmul.f32 1.442695, %v5283_v27  ;;  %v2788_v26 = vadd.f32 %v5317_v51, %v2712_v61 }
 0x65a   :  { %vm2911_vm15 = vcmp.gt.f32.partialorder %v2879_v44, 0.0  ;;  %v2965_v59 = vmul.f32 1.442695, %v5306_v10  ;;  %vm2912_vm2 = vcmp.gt.f32.partialorder %v2880_v25, 0.0  ;;  %v2935_v30 = vmul.f32 1.442695, %v5322_v52 }
 0x65b   :  { %3799 = vpow2.f32 %v2959_v4  ;;  %v3088_v4 = vmul.f32 1.050701, %v3056_v36  ;;  %v2836_v34 = vmul.f32 %v5326_v5, %v2788_v26  ;;  %vm2913_vm4 = vcmp.gt.f32.partialorder %v5283_v27, 0.0 }
 0x65c   :  { %3801 = vpow2.f32 %v2961_v48  ;;  %v5329_v48 = vadd.f32 %v5312_v29, %v2835_v19  ;;  %vm2914_vm6 = vcmp.gt.f32.partialorder %v5306_v10, 0.0  ;;  %vm2899_vm7 = vcmp.gt.f32.partialorder %v5322_v52, 0.0 }
 0x65d   :  { %3803 = vpow2.f32 %v2931_v55  ;;  %v5355_v1 = vadd.f32 %v5337_v32, %v2836_v34 }
 0x65e   :  { %3805 = vpow2.f32 %v2963_v9  ;;  %v2967_v9 = vmul.f32 1.442695, %v5329_v48  ;;  %vm2915_vm8 = vcmp.gt.f32.partialorder %v5329_v48, 0.0 }
 0x65f   :  { %3807 = vpow2.f32 %v2933_v15  ;;  %v2969_v36 = vmul.f32 1.442695, %v5355_v1  ;;  %vm2916_vm10 = vcmp.gt.f32.partialorder %v5355_v1, 0.0 }
 0x660   :  { %3809 = vpow2.f32 %v2965_v59 }
 0x661   :  { %v3800_v8 = vpop.eup %3799  ;;  %3811 = vpow2.f32 %v2935_v30 }
 0x662   :  { %v3802_v3 = vpop.eup %3801  ;;  %v3487_v2 = vadd.f32 -1.0, %v3800_v8  ;;  %v2820_v8 = vmul.f32 %v5326_v5, %v2772_v57  ;;  %3813 = vpow2.f32 %v2967_v9 }
 0x663   :  { %v3488_v0 = vadd.f32 -1.0, %v3802_v3  ;;  %v3804_v22 = vpop.eup %3803 }
 0x664   :  { %v3039_v39 = vmul.f32 1.6732632, %v3487_v2  ;;  %v3806_v45 = vpop.eup %3805  ;;  %v3473_v23 = vadd.f32 -1.0, %v3804_v22  ;;  %v2698_v2 = vrot.slane %v5217_v18, 6  ;;  %v5351_v20 = vadd.f32 %v5337_v32, %v2820_v8 }
 0x665   :  { %v3040_v17 = vmul.f32 1.6732632, %v3488_v0  ;;  %v3489_v16 = vadd.f32 -1.0, %v3806_v45  ;;  %v3808_v55 = vpop.eup %3807 }
 0x666   :  { %v3071_v60 = vsel %vm2911_vm15, %v2879_v44, %v3039_v39  ;;  %v3810_v3 = vpop.eup %3809  ;;  %v3474_v39 = vadd.f32 -1.0, %v3808_v55  ;;  %v2773_v15 = vadd.f32 %v5345_v42, %v2698_v2  ;;  %v5381_v55 = vrot.slane %v5219_v54, 7 }
 0x667   :  { %v3103_v53 = vmul.f32 1.050701, %v3071_v60  ;;  %v3072_v44 = vsel %vm2912_vm2, %v2880_v25, %v3040_v17  ;;  %v3025_v25 = vmul.f32 1.6732632, %v3473_v23  ;;  %v3041_v58 = vmul.f32 1.6732632, %v3489_v16  ;;  %v3812_v45 = vpop.eup %3811 }
 0x668   :  { %v3104_v28 = vmul.f32 1.050701, %v3072_v44  ;;  %v3490_v60 = vadd.f32 -1.0, %v3810_v3  ;;  %v3026_v43 = vmul.f32 1.6732632, %v3474_v39  ;;  %v3814_v61 = vpop.eup %3813  ;;  %v2699_v44 = vrot.slane %v5217_v18, 7 }
 0x669   :  { %3134 = vst [vmem:[#allocation1 + $0x1] ss:$9 sm:$0xff] %v3103_v53  ;;  %v3057_v33 = vsel %vm2897_vm3, %v5276_v24, %v3025_v25  ;;  %v3073_v0 = vsel %vm2913_vm4, %v5283_v27, %v3041_v58  ;;  %v2789_v53 = vadd.f32 %v5345_v42, %v2713_v63  ;;  %v5359_v24 = vrot.slane %v5219_v54, 6 }
 0x66a   :  { %v3089_v13 = vmul.f32 1.050701, %v3057_v33  ;;  %v3105_v17 = vmul.f32 1.050701, %v3073_v0  ;;  %v2937_v27 = vmul.f32 1.442695, %v5351_v20  ;;  %v3058_v57 = vsel %vm2898_vm5, %v5299_v7, %v3026_v43 }
 0x66b   :  { %v3042_v59 = vmul.f32 1.6732632, %v3490_v60  ;;  %v2837_v19 = vmul.f32 %v5359_v24, %v2789_v53  ;;  %v2821_v23 = vmul.f32 %v5359_v24, %v2773_v15  ;;  %v5372_v16 = vrot.slane %v5215_v56, 7 }
 0x66c   :  { %3815 = vpow2.f32 %v2937_v27  ;;  %v3491_v25 = vadd.f32 -1.0, %v3814_v61  ;;  %v3090_v58 = vmul.f32 1.050701, %v3058_v57  ;;  %v5387_v33 = vrot.slane %v5223_v21, 7 }
 0x66d   :  { %v3074_v26 = vsel %vm2914_vm6, %v5306_v10, %v3042_v59  ;;  %3817 = vpow2.f32 %v2969_v36  ;;  %v2869_v30 = vadd.f32 %v5364_v12, %v2821_v23  ;;  %v2774_v18 = vadd.f32 %v5372_v16, %v2699_v44 }
 0x66e   :  { %v3106_v8 = vmul.f32 1.050701, %v3074_v26  ;;  %v3043_v63 = vmul.f32 1.6732632, %v3491_v25  ;;  %vm2900_vm9 = vcmp.gt.f32.partialorder %v5351_v20, 0.0 }
 0x66f   :  { %v2939_v34 = vmul.f32 1.442695, %v2869_v30  ;;  %v2822_v2 = vmul.f32 %v5381_v55, %v2774_v18  ;;  %vm2901_vm12 = vcmp.gt.f32.partialorder %v2869_v30, 0.0 }
 0x670   :  { %v5332_v31 = vld [vmem:[#allocation1] sm:$0xff] }
 0x671   :  { %3139 = vst [vmem:[#allocation1] ss:$9 sm:$0xff] %v3088_v4  ;;  %v3475_v4 = vadd.f32 -1.0, %v3812_v45  ;;  %v2870_v15 = vadd.f32 %v5387_v33, %v2822_v2 }
 0x672   :  { %3141 = vst [vmem:[#allocation1 + $0x1] ss:$9 sm:$0xff] %v3104_v28  ;;  %v2885_v28 = vadd.f32 %v5364_v12, %v2837_v19  ;;  %v3816_v10 = vpop.eup %3815 }
 0x673   :  { %v3027_v9 = vmul.f32 1.6732632, %v3475_v4  ;;  %v3818_v39 = vpop.eup %3817  ;;  %v3476_v60 = vadd.f32 -1.0, %v3816_v10  ;;  %v2941_v45 = vmul.f32 1.442695, %v2870_v15  ;;  %vm2902_vm14 = vcmp.gt.f32.partialorder %v2870_v15, 0.0 }
 0x674   :  { %v2971_v3 = vmul.f32 1.442695, %v2885_v28  ;;  %v3492_v53 = vadd.f32 -1.0, %v3818_v39  ;;  %vm2917_vm11 = vcmp.gt.f32.partialorder %v2885_v28, 0.0 }
 0x675   :  { %v3059_v0 = vsel %vm2899_vm7, %v5322_v52, %v3027_v9  ;;  %v3028_v27 = vmul.f32 1.6732632, %v3476_v60 }
 0x676   :  { %3819 = vpow2.f32 %v2971_v3  ;;  %v3044_v59 = vmul.f32 1.6732632, %v3492_v53 }
 0x677   :  { %3821 = vpow2.f32 %v2939_v34  ;;  %v3060_v36 = vsel %vm2900_vm9, %v5351_v20, %v3028_v27 }
 0x678   :  { %v3076_v61 = vsel %vm2916_vm10, %v5355_v1, %v3044_v59  ;;  %3823 = vpow2.f32 %v2941_v45  ;;  %v3092_v44 = vmul.f32 1.050701, %v3060_v36 }
 0x679   :  { %v3142_v22 = vld [vmem:[#allocation1] sm:$0xff]  ;;  %v3108_v57 = vmul.f32 1.050701, %v3076_v61 }
 0x67a   :  { %3148 = vst [vmem:[#allocation1] ss:$9 sm:$0xff] %v3089_v13  ;;  %3143 = vrot.lane.b32.xlu1 %v3142_v22, %s3968_s25  ;;  %v3075_v13 = vsel %vm2915_vm8, %v5329_v48, %v3043_v63 }
 0x67b   :  { %3150 = vst [vmem:[#allocation1 + $0x1] ss:$9 sm:$0xff] %v3105_v17  ;;  %v3091_v17 = vmul.f32 1.050701, %v3059_v0  ;;  %v3107_v22 = vmul.f32 1.050701, %v3075_v13 }
 0x67c   :  { %v3820_v52 = vpop.eup %3819 }
 0x67d   :  { %v3822_v19 = vpop.eup %3821  ;;  %v3493_v48 = vadd.f32 -1.0, %v3820_v52 }
 0x67e   :  { %v3477_v23 = vadd.f32 -1.0, %v3822_v19 }
 0x67f   :  { %v3045_v26 = vmul.f32 1.6732632, %v3493_v48 }
 0x680   :  { %v3029_v25 = vmul.f32 1.6732632, %v3477_v23  ;;  %v2701_v23 = vrot.slane %v5230_v38, 2 }
 0x681   :  { %v3077_v18 = vsel %vm2917_vm11, %v2885_v28, %v3045_v26 }
 0x682   :  { %v5383_v7 = vld [vmem:[#allocation1] sm:$0xff]  ;;  %v3061_v20 = vsel %vm2901_vm12, %v2869_v30, %v3029_v25  ;;  %v3109_v9 = vmul.f32 1.050701, %v3077_v18  ;;  %v2775_v30 = vadd.f32 %v5215_v56, %v5230_v38 }
 0x683   :  { %3157 = vst [vmem:[#allocation1] ss:$9 sm:$0xff] %v3090_v58  ;;  %v3824_v58 = vpop.eup %3823  ;;  %v3093_v3 = vmul.f32 1.050701, %v3061_v20 }
 0x684   :  { %3159 = vst [vmem:[#allocation1 + $0x1] ss:$9 sm:$0xff] %v3106_v8  ;;  %v3478_v8 = vadd.f32 -1.0, %v3824_v58  ;;  %v2823_v13 = vmul.f32 %v5219_v54, %v2775_v30 }
 0x686   :  { %v3030_v1 = vmul.f32 1.6732632, %v3478_v8  ;;  %v2871_v27 = vadd.f32 %v5223_v21, %v2823_v13 }
 0x688   :  { %v3062_v10 = vsel %vm2902_vm14, %v2870_v15, %v3030_v1  ;;  %v2700_v15 = vrot.slane %v5230_v38, 1  ;;  %v2943_v19 = vmul.f32 1.442695, %v2871_v27  ;;  %vm2903_vm1 = vcmp.gt.f32.partialorder %v2871_v27, 0.0 }
 0x689   :  { %v3094_v34 = vmul.f32 1.050701, %v3062_v10 }
 0x68a   :  { %v2776_v45 = vadd.f32 %v5234_v47, %v2700_v15  ;;  %3825 = vpow2.f32 %v2943_v19 }
 0x68b   :  { %v5394_v43 = vld [vmem:[#allocation1] sm:$0xff] }
 0x68c   :  { %3166 = vst [vmem:[#allocation1] ss:$9 sm:$0xff] %v3091_v17  ;;  %v2824_v48 = vmul.f32 %v5242_v50, %v2776_v45 }
 0x68d   :  { %3168 = vst [vmem:[#allocation1 + $0x1] ss:$9 sm:$0xff] %v3107_v22 }
 0x690   :  { %v3826_v25 = vpop.eup %3825 }
 0x694   :  { %v5400_v4 = vld [vmem:[#allocation1] sm:$0xff] }
 0x695   :  { %3173 = vst [vmem:[#allocation1] ss:$9 sm:$0xff] %v3092_v44 }
 0x696   :  { %3175 = vst [vmem:[#allocation1 + $0x1] ss:$9 sm:$0xff] %v3108_v57  ;;  %v5427_v57 = vadd.f32 %v5248_v11, %v2824_v48 }
 0x698   :  { %v2945_v58 = vmul.f32 1.442695, %v5427_v57  ;;  %vm2904_vm3 = vcmp.gt.f32.partialorder %v5427_v57, 0.0 }
 0x69d   :  { %v3176_v63 = vld [vmem:[#allocation1] sm:$0xff] }
 0x69e   :  { %3184 = vst [vmem:[#allocation1 + $0x1] ss:$9 sm:$0xff] %v3109_v9  ;;  %3177 = vrot.lane.b32.xlu1 %v3176_v63, %s3968_s25  ;;  %v2702_v9 = vrot.slane %v5230_v38, 3 }
 0x69f   :  { %3182 = vst [vmem:[#allocation1] ss:$9 sm:$0xff] %v3093_v3 }
 0x6a6   :  { %v3185_v2 = vld [vmem:[#allocation1] sm:$0xff] }
 0x6a7   :  { %3186 = vrot.lane.b32.xlu1 %v3185_v2, %s3974_s4  ;;  %3191 = vst [vmem:[#allocation1] ss:$9 sm:$0xff] %v3094_v34  ;;  %v2778_v2 = vadd.f32 %v5266_v35, %v2702_v9 }
 0x6b6   :  { %v5404_v39 = vpop.f32.mrf.mxu0 }
 0x6b7   :  { %v2714_v28 = vrot.slane %v5404_v39, 1  ;;  %v2790_v0 = vadd.f32 %v5372_v16, %v5404_v39  ;;  %v2715_v22 = vrot.slane %v5404_v39, 2  ;;  %v2716_v44 = vrot.slane %v5404_v39, 3 }
 0x6b8   :  { %v2717_v1 = vrot.slane %v5404_v39, 4  ;;  %v2719_v9 = vrot.slane %v5404_v39, 6 }
 0x6b9   :  { %v2791_v60 = vadd.f32 %v5215_v56, %v2714_v28  ;;  %v2838_v53 = vmul.f32 %v5381_v55, %v2790_v0  ;;  %v2792_v56 = vadd.f32 %v5234_v47, %v2715_v22  ;;  %v2793_v26 = vadd.f32 %v5252_v40, %v2716_v44 }
 0x6bb   :  { %v2839_v17 = vmul.f32 %v5219_v54, %v2791_v60  ;;  %v2886_v59 = vadd.f32 %v5387_v33, %v2838_v53  ;;  %v2840_v54 = vmul.f32 %v5242_v50, %v2792_v56  ;;  %v2841_v3 = vmul.f32 %v5260_v49, %v2793_v26 }
 0x6bc   :  { %v2703_v56 = vrot.slane %v5230_v38, 4 }
 0x6bd   :  { %v2887_v52 = vadd.f32 %v5223_v21, %v2839_v17  ;;  %v2973_v36 = vmul.f32 1.442695, %v2886_v59  ;;  %v2777_v21 = vadd.f32 %v5252_v40, %v2701_v23  ;;  %v5431_v47 = vadd.f32 %v5248_v11, %v2840_v54 }
 0x6be   :  { %v3479_v11 = vadd.f32 -1.0, %v3826_v25  ;;  %vm2918_vm15 = vcmp.gt.f32.partialorder %v2886_v59, 0.0  ;;  %v5445_v28 = vadd.f32 %v5270_v41, %v2841_v3  ;;  %v2826_v17 = vmul.f32 %v5280_v6, %v2778_v2 }
 0x6bf   :  { %v2975_v61 = vmul.f32 1.442695, %v2887_v52  ;;  %3827 = vpow2.f32 %v2973_v36  ;;  %v2825_v50 = vmul.f32 %v5260_v49, %v2777_v21  ;;  %v2977_v20 = vmul.f32 1.442695, %v5431_v47 }
 0x6c0   :  { %v2794_v49 = vadd.f32 %v5266_v35, %v2717_v1  ;;  %v3031_v60 = vmul.f32 1.6732632, %v3479_v11  ;;  %v2979_v22 = vmul.f32 1.442695, %v5445_v28  ;;  %v2718_v35 = vrot.slane %v5404_v39, 5 }
 0x6c1   :  { %3829 = vpow2.f32 %v2975_v61  ;;  %v5441_v40 = vadd.f32 %v5270_v41, %v2825_v50  ;;  %vm2919_vm2 = vcmp.gt.f32.partialorder %v2887_v52, 0.0  ;;  %v5455_v48 = vadd.f32 %v5289_v14, %v2826_v17 }
 0x6c2   :  { %3831 = vpow2.f32 %v2945_v58  ;;  %v2842_v41 = vmul.f32 %v5280_v6, %v2794_v49  ;;  %v2779_v23 = vadd.f32 %v5294_v62, %v2703_v56  ;;  %v2795_v6 = vadd.f32 %v5294_v62, %v2718_v35 }
 0x6c3   :  { %3833 = vpow2.f32 %v2977_v20  ;;  %v2947_v13 = vmul.f32 1.442695, %v5441_v40  ;;  %vm2920_vm4 = vcmp.gt.f32.partialorder %v5431_v47, 0.0  ;;  %vm2905_vm5 = vcmp.gt.f32.partialorder %v5441_v40, 0.0 }
 0x6c4   :  { %v5459_v44 = vadd.f32 %v5289_v14, %v2842_v41  ;;  %v2704_v14 = vrot.slane %v5230_v38, 5  ;;  %v2843_v62 = vmul.f32 %v5303_v46, %v2795_v6  ;;  %vm2921_vm6 = vcmp.gt.f32.partialorder %v5445_v28, 0.0 }
 0x6c5   :  { %v3828_v18 = vpop.eup %3827  ;;  %3835 = vpow2.f32 %v2947_v13  ;;  %vm2906_vm7 = vcmp.gt.f32.partialorder %v5455_v48, 0.0 }
 0x6c6   :  { %v3494_v63 = vadd.f32 -1.0, %v3828_v18  ;;  %3837 = vpow2.f32 %v2979_v22  ;;  %v2827_v18 = vmul.f32 %v5303_v46, %v2779_v23  ;;  %v2981_v50 = vmul.f32 1.442695, %v5459_v44 }
 0x6c7   :  { %v3830_v8 = vpop.eup %3829  ;;  %v5478_v46 = vadd.f32 %v5312_v29, %v2843_v62  ;;  %v2720_v22 = vrot.slane %v5404_v39, 7  ;;  %vm2922_vm8 = vcmp.gt.f32.partialorder %v5459_v44, 0.0 }
 0x6c8   :  { %v3046_v10 = vmul.f32 1.6732632, %v3494_v63  ;;  %v3495_v34 = vadd.f32 -1.0, %v3830_v8  ;;  %v3832_v15 = vpop.eup %3831  ;;  %v5474_v1 = vadd.f32 %v5312_v29, %v2827_v18  ;;  %v2705_v29 = vrot.slane %v5230_v38, 6 }
 0x6c9   :  { %v3834_v45 = vpop.eup %3833  ;;  %v3480_v19 = vadd.f32 -1.0, %v3832_v15  ;;  %vm2923_vm10 = vcmp.gt.f32.partialorder %v5478_v46, 0.0 }
 0x6ca   :  { %v3078_v30 = vsel %vm2918_vm15, %v2886_v59, %v3046_v10  ;;  %v3047_v53 = vmul.f32 1.6732632, %v3495_v34  ;;  %v3063_v59 = vsel %vm2903_vm1, %v2871_v27, %v3031_v60  ;;  %v3496_v61 = vadd.f32 -1.0, %v3834_v45 }
 0x6cb   :  { %v3110_v0 = vmul.f32 1.050701, %v3078_v30  ;;  %v3095_v54 = vmul.f32 1.050701, %v3063_v59  ;;  %v3032_v26 = vmul.f32 1.6732632, %v3480_v19  ;;  %v3836_v58 = vpop.eup %3835  ;;  %v2780_v10 = vadd.f32 %v5317_v51, %v2704_v14 }
 0x6cc   :  { %v3079_v36 = vsel %vm2919_vm2, %v2887_v52, %v3047_v53  ;;  %v2949_v52 = vmul.f32 1.442695, %v5455_v48  ;;  %v3048_v25 = vmul.f32 1.6732632, %v3496_v61  ;;  %v3838_v20 = vpop.eup %3837  ;;  %v3481_v3 = vadd.f32 -1.0, %v3836_v58  ;;  %v5511_v58 = vpop.f32.mrf.mxu0 }
 0x6cd   :  { %3193 = vst [vmem:[#allocation1 + $0x1] ss:$9 sm:$0xff] %v3110_v0  ;;  %v3111_v27 = vmul.f32 1.050701, %v3079_v36  ;;  %v3064_v8 = vsel %vm2904_vm3, %v5427_v57, %v3032_v26  ;;  %v3497_v11 = vadd.f32 -1.0, %v3838_v20  ;;  %v2796_v57 = vadd.f32 %v5317_v51, %v2719_v9 }
 0x6ce   :  { %3839 = vpow2.f32 %v2949_v52  ;;  %v3080_v63 = vsel %vm2920_vm4, %v5431_v47, %v3048_v25  ;;  %v3096_v34 = vmul.f32 1.050701, %v3064_v8  ;;  %v3033_v49 = vmul.f32 1.6732632, %v3481_v3 }
 0x6cf   :  { %3841 = vpow2.f32 %v2981_v50  ;;  %v3112_v2 = vmul.f32 1.050701, %v3080_v63  ;;  %v2951_v47 = vmul.f32 1.442695, %v5474_v1  ;;  %v3049_v0 = vmul.f32 1.6732632, %v3497_v11 }
 0x6d0   :  { %v2828_v13 = vmul.f32 %v5326_v5, %v2780_v10  ;;  %v2983_v53 = vmul.f32 1.442695, %v5478_v46  ;;  %v2844_v51 = vmul.f32 %v5326_v5, %v2796_v57  ;;  %v3065_v17 = vsel %vm2905_vm5, %v5441_v40, %v3033_v49 }
 0x6d1   :  { %3843 = vpow2.f32 %v2951_v47  ;;  %v3081_v56 = vsel %vm2921_vm6, %v5445_v28, %v3049_v0  ;;  %v2781_v35 = vadd.f32 %v5345_v42, %v2705_v29  ;;  %v3097_v19 = vmul.f32 1.050701, %v3065_v17 }
 0x6d2   :  { %v5494_v41 = vadd.f32 %v5337_v32, %v2828_v13  ;;  %3845 = vpow2.f32 %v2983_v53  ;;  %v5498_v5 = vadd.f32 %v5337_v32, %v2844_v51  ;;  %v2797_v40 = vadd.f32 %v5345_v42, %v2720_v22 }
 0x6d3   :  { %v3113_v39 = vmul.f32 1.050701, %v3081_v56  ;;  %v2829_v6 = vmul.f32 %v5359_v24, %v2781_v35  ;;  %v2706_v42 = vrot.slane %v5230_v38, 7  ;;  %vm2907_vm9 = vcmp.gt.f32.partialorder %v5474_v1, 0.0 }
 0x6d4   :  { %v3194_v21 = vld [vmem:[#allocation1] sm:$0xff]  ;;  %v3840_v60 = vpop.eup %3839  ;;  %v2953_v28 = vmul.f32 1.442695, %v5494_v41  ;;  %v2845_v32 = vmul.f32 %v5359_v24, %v2797_v40  ;;  %vm2908_vm11 = vcmp.gt.f32.partialorder %v5494_v41, 0.0  ;;  %vm2924_vm12 = vcmp.gt.f32.partialorder %v5498_v5, 0.0 }
 0x6d5   :  { %3195 = vrot.lane.b32.xlu0 %v3194_v21, %s3969_s9  ;;  %3200 = vst [vmem:[#allocation1] ss:$9 sm:$0xff] %v3095_v54  ;;  %v3842_v15 = vpop.eup %3841  ;;  %v3482_v45 = vadd.f32 -1.0, %v3840_v60  ;;  %v2877_v18 = vadd.f32 %v5364_v12, %v2829_v6  ;;  %v2782_v24 = vadd.f32 %v5372_v16, %v2706_v42  ;;  %vm3268_vm3 = vcmask 785408  }
 0x6d6   :  { %3202 = vst [vmem:[#allocation1 + $0x1] ss:$9 sm:$0xff] %v3111_v27  ;;  %v3498_v59 = vadd.f32 -1.0, %v3842_v15  ;;  %v2985_v27 = vmul.f32 1.442695, %v5498_v5  ;;  %3847 = vpow2.f32 %v2953_v28  ;;  %v2893_v14 = vadd.f32 %v5364_v12, %v2845_v32 }
 0x6d7   :  { %v3034_v61 = vmul.f32 1.6732632, %v3482_v45  ;;  %v3844_v54 = vpop.eup %3843  ;;  %v2830_v11 = vmul.f32 %v5381_v55, %v2782_v24  ;;  %vm2909_vm14 = vcmp.gt.f32.partialorder %v2877_v18, 0.0  ;;  %vm3295_vm4 = vcmask 1041408  }
 0x6d8   :  { %v3050_v23 = vmul.f32 1.6732632, %v3498_v59  ;;  %v3846_v21 = vpop.eup %3845  ;;  %v3483_v52 = vadd.f32 -1.0, %v3844_v54  ;;  %3849 = vpow2.f32 %v2985_v27  ;;  %v2987_v63 = vmul.f32 1.442695, %v2893_v14 }
 0x6d9   :  { %v3066_v26 = vsel %vm2906_vm7, %v5455_v48, %v3034_v61  ;;  %v3499_v50 = vadd.f32 -1.0, %v3846_v21  ;;  %v2798_v48 = vadd.f32 %v5372_v16, %v5511_v58  ;;  %v2878_v49 = vadd.f32 %v5387_v33, %v2830_v11 }
 0x6da   :  { %v3082_v25 = vsel %vm2922_vm8, %v5459_v44, %v3050_v23  ;;  %v3098_v20 = vmul.f32 1.050701, %v3066_v26  ;;  %v3035_v8 = vmul.f32 1.6732632, %v3483_v52  ;;  %v2955_v44 = vmul.f32 1.442695, %v2877_v18  ;;  %v3123_v52 = vpop.permute.xlu0 %3122 }
 0x6db   :  { %v3114_v38 = vmul.f32 1.050701, %v3082_v25  ;;  %v3051_v9 = vmul.f32 1.6732632, %v3499_v50  ;;  %v2846_v12 = vmul.f32 %v5381_v55, %v2798_v48  ;;  %v2957_v53 = vmul.f32 1.442695, %v2878_v49 }
 0x6dc   :  { %v3848_v3 = vpop.eup %3847  ;;  %3851 = vpow2.f32 %v2955_v44  ;;  %vm2925_vm15 = vcmp.gt.f32.partialorder %v2893_v14, 0.0  ;;  %vm2910_vm1 = vcmp.gt.f32.partialorder %v2878_v49, 0.0  ;;  %v2721_v25 = vrot.slane %v5511_v58, 1 }
 0x6dd   :  { %v5481_v30 = vld [vmem:[#allocation1] sm:$0xff]  ;;  %v3484_v16 = vadd.f32 -1.0, %v3848_v3  ;;  %v3083_v57 = vsel %vm2923_vm10, %v5478_v46, %v3051_v9  ;;  %3853 = vpow2.f32 %v2987_v63  ;;  %v2894_v0 = vadd.f32 %v5387_v33, %v2846_v12 }
 0x6de   :  { %3207 = vst [vmem:[#allocation1] ss:$9 sm:$0xff] %v3096_v34  ;;  %v3850_v10 = vpop.eup %3849  ;;  %v3067_v34 = vsel %vm2907_vm9, %v5474_v1, %v3035_v8  ;;  %v3115_v60 = vmul.f32 1.050701, %v3083_v57  ;;  %3855 = vpow2.f32 %v2957_v53  ;;  %v3128_v50 = vadd.f32 %v3123_v52, %v5236_v37 }
 0x6df   :  { %3209 = vst [vmem:[#allocation1 + $0x1] ss:$9 sm:$0xff] %v3112_v2  ;;  %v3500_v2 = vadd.f32 -1.0, %v3850_v10  ;;  %v3099_v47 = vmul.f32 1.050701, %v3067_v34  ;;  %vm2926_vm2 = vcmp.gt.f32.partialorder %v2894_v0, 0.0 }
 0x6e0   :  { %v3036_v13 = vmul.f32 1.6732632, %v3484_v16  ;;  %v2989_v15 = vmul.f32 1.442695, %v2894_v0  ;;  %vm3297_vm5 = vcmask 1045508   ;;  %vm3299_vm6 = vcmask 1043456  }
 0x6e1   :  { %v3052_v1 = vmul.f32 1.6732632, %v3500_v2 }
 0x6e2   :  { %v3852_v46 = vpop.eup %3851  ;;  %v3068_v51 = vsel %vm2908_vm11, %v5494_v41, %v3036_v13  ;;  %3857 = vpow2.f32 %v2989_v15 }
 0x6e3   :  { %v3854_v29 = vpop.eup %3853  ;;  %v3485_v33 = vadd.f32 -1.0, %v3852_v46  ;;  %v3100_v22 = vmul.f32 1.050701, %v3068_v51 }
 0x6e4   :  { %v3501_v17 = vadd.f32 -1.0, %v3854_v29 }
 0x6e5   :  { %v3037_v59 = vmul.f32 1.6732632, %v3485_v33 }
 0x6e6   :  { %v3210_v36 = vld [vmem:[#allocation1] sm:$0xff]  ;;  %v3053_v35 = vmul.f32 1.6732632, %v3501_v17 }
 0x6e7   :  { %3211 = vrot.lane.b32.xlu0 %v3210_v36, %s3968_s25  ;;  %3216 = vst [vmem:[#allocation1] ss:$9 sm:$0xff] %v3097_v19  ;;  %v3856_v19 = vpop.eup %3855  ;;  %v3069_v41 = vsel %vm2909_vm14, %v2877_v18, %v3037_v59  ;;  %v3125_v18 = vpop.permute.xlu2 %3124 }
 0x6e8   :  { %3218 = vst [vmem:[#allocation1 + $0x1] ss:$9 sm:$0xff] %v3113_v39  ;;  %v3858_v40 = vpop.eup %3857  ;;  %v3085_v39 = vsel %vm2925_vm15, %v2893_v14, %v3053_v35  ;;  %v3486_v36 = vadd.f32 -1.0, %v3856_v19 }
 0x6e9   :  { %v3502_v61 = vadd.f32 -1.0, %v3858_v40  ;;  %v3117_v28 = vmul.f32 1.050701, %v3085_v39 }
 0x6ea   :  { %v3038_v54 = vmul.f32 1.6732632, %v3486_v36 }
 0x6eb   :  { %v3054_v6 = vmul.f32 1.6732632, %v3502_v61 }
 0x6ec   :  { %v3070_v27 = vsel %vm2910_vm1, %v2878_v49, %v3038_v54 }
 0x6ed   :  { %v3086_v21 = vsel %vm2926_vm2, %v2894_v0, %v3054_v6  ;;  %v3102_v32 = vmul.f32 1.050701, %v3070_v27 }
 0x6ee   :  { %v3118_v42 = vmul.f32 1.050701, %v3086_v21 }
 0x6ef   :  { %v3219_v62 = vld [vmem:[#allocation1] sm:$0xff] }
 0x6f0   :  { %3220 = vrot.lane.b32.xlu0 %v3219_v62, %s3974_s4  ;;  %3225 = vst [vmem:[#allocation1] ss:$9 sm:$0xff] %v3098_v20  ;;  %v3129_v20 = vadd.f32 %v3125_v18, %v2721_v25  ;;  %v3144_v62 = vpop.permute.xlu1 %3143 }
 0x6f1   :  { %3227 = vst [vmem:[#allocation1 + $0x1] ss:$9 sm:$0xff] %v3114_v38  ;;  %v3266_v16 = vsel %vm101_vm0, %v5332_v31, %v3144_v62 }
 0x6f8   :  { %3152 = vrot.lane.b32.xlu0 %v5383_v7, %s3974_s4  ;;  %v3228_v55 = vld [vmem:[#allocation1] sm:$0xff]  ;;  %v3084_v7 = vsel %vm2924_vm12, %v5498_v5, %v3052_v1  ;;  %v3101_v5 = vmul.f32 1.050701, %v3069_v41 }
 0x6f9   :  { %3229 = vrot.lane.b32.xlu2 %v3228_v55, %s3969_s9  ;;  %3234 = vst [vmem:[#allocation1] ss:$9 sm:$0xff] %v3099_v47  ;;  %v3116_v45 = vmul.f32 1.050701, %v3084_v7 }
 0x6fa   :  { %3236 = vst [vmem:[#allocation1 + $0x1] ss:$9 sm:$0xff] %v3115_v60 }
 0x701   :  { %v5534_v56 = vld [vmem:[#allocation1] sm:$0xff] }
 0x702   :  { %3241 = vst [vmem:[#allocation1] ss:$9 sm:$0xff] %v3100_v22 }
 0x703   :  { %3243 = vst [vmem:[#allocation1 + $0x1] ss:$9 sm:$0xff] %v3116_v45 }
 0x70a   :  { %v3244_v23 = vld [vmem:[#allocation1] sm:$0xff] }
 0x70b   :  { %3245 = vrot.lane.b32.xlu2 %v3244_v23, %s3968_s25  ;;  %3250 = vst [vmem:[#allocation1] ss:$9 sm:$0xff] %v3101_v5  ;;  %s3975_s25 = smov [#allocation8]  }
 0x70c   :  { %3252 = vst [vmem:[#allocation1 + $0x1] ss:$9 sm:$0xff] %v3117_v28  ;;  %s3310_s29 = sshll.u32 %s3975_s25, 4  ;;  %s3311_s29 = int_to_ptr.vmem [resolvable:$true] %s3310_s29 }
 0x710   :  { %v3178_v44 = vpop.permute.xlu1 %3177 }
 0x711   :  { %v3270_v11 = vsel %vm101_vm0, %v5400_v4, %v3178_v44 }
 0x713   :  { %v3253_v26 = vld [vmem:[#allocation1] sm:$0xff] }
 0x714   :  { %3254 = vrot.lane.b32.xlu2 %v3253_v26, %s3974_s4  ;;  %3259 = vst [vmem:[#allocation1] ss:$9 sm:$0xff] %v3102_v32 }
 0x715   :  { %3261 = vst [vmem:[#allocation1 + $0x1] ss:$9 sm:$0xff] %v3118_v42 }
 0x719   :  { %v3187_v3 = vpop.permute.xlu1 %3186 }
 0x71a   :  { %v3271_v12 = vsel %vm2645_vm13, %v3270_v11, %v3187_v3 }
 0x71c   :  { %3161 = vrot.lane.b32.xlu2 %v5394_v43, %s3969_s9  ;;  %v3262_v14 = vld [vmem:[#allocation1] sm:$0xff] }
 0x71d   :  { %3263 = vrot.lane.b32.xlu1 %v3262_v14, %s3969_s9  ;;  %3281 = vst [vmem:[#allocation1] ss:$9 sm:$0xff] %v3128_v50 }
 0x71e   :  { %3283 = vst [vmem:[#allocation1 + $0x1] ss:$9 sm:$0xff] %v3129_v20 }
 0x725   :  { %v3284_v24 = vld [vmem:[#allocation1] sm:$0xff] }
 0x726   :  { %3285 = vrot.lane.b32.xlu1 %v3284_v24, %s3969_s9  ;;  %s3312_s9 = sshll.u32 %s5570_s7, 4  ;;  %s3313_s9 = int_to_ptr.hbm [resolvable:$true] %s3312_s9 }
 0x747   :  { %v3196_v38 = vpop.permute.xlu0 %3195 }
 0x748   :  { %v3272_v57 = vsel %vm3268_vm3, %v3271_v12, %v3196_v38 }
 0x749   :  { %v3292_v55 = vrot.slane %v3272_v57, 6 }
 0x753   :  { %v3230_v48 = vpop.permute.xlu2 %3229 }
 0x759   :  { %v3212_v8 = vpop.permute.xlu0 %3211 }
 0x75a   :  { %v3273_v43 = vsel %vm101_vm0, %v5481_v30, %v3212_v8 }
 0x762   :  { %v3221_v9 = vpop.permute.xlu0 %3220 }
 0x763   :  { %v3274_v63 = vsel %vm2645_vm13, %v3273_v43, %v3221_v9 }
 0x764   :  { %v3275_v2 = vsel %vm3268_vm3, %v3274_v63, %v3230_v48 }
 0x765   :  { %v3246_v58 = vpop.permute.xlu2 %3245  ;;  %v3293_v31 = vrot.slane %v3275_v2, 4 }
 0x766   :  { %v3276_v30 = vsel %vm101_vm0, %v5534_v56, %v3246_v58  ;;  %vm3303_vm0 = vcmask 254976  }
 0x76a   :  { %v3153_v10 = vpop.permute.xlu0 %3152 }
 0x76b   :  { %v3267_v49 = vsel %vm2645_vm13, %v3266_v16, %v3153_v10 }
 0x76e   :  { %v3255_v37 = vpop.permute.xlu2 %3254 }
 0x76f   :  { %v3277_v47 = vsel %vm2645_vm13, %v3276_v30, %v3255_v37 }
 0x776   :  { %v3162_v34 = vpop.permute.xlu2 %3161 }
 0x777   :  { %v3269_v4 = vsel %vm3268_vm3, %v3267_v49, %v3162_v34 }
 0x778   :  { %v3296_v1 = vsel %vm3295_vm4, %v3269_v4, %v3292_v55 }
 0x78f   :  { %v3264_v0 = vpop.permute.xlu1 %3263 }
 0x790   :  { %v3278_v60 = vsel %vm3268_vm3, %v3277_v47, %v3264_v0 }
 0x791   :  { %v3294_v13 = vrot.slane %v3278_v60, 2 }
 0x793   :  { %v3298_v53 = vsel %vm3297_vm5, %v3293_v31, %v3294_v13 }
 0x794   :  { %v3300_v46 = vsel %vm3299_vm6, %v3296_v1, %v3298_v53 }
 0x795   :  { %3302 = vst [vmem:[#allocation8] sm:$0xff] %v3300_v46 }
 0x798   :  { %v3286_v15 = vpop.permute.xlu1 %3285 }
 0x799   :  { %3304 = vst.msk [vmem:[#allocation8 + $0x8] sm:$0x3] %vm3303_vm0, %v3286_v15 }
 0x79a   :  { %3315 = dma.vmem_to_hbm [thread:$0]  %s3311_s29, 160, %s3313_s9, [#allocation4]  }
 0x79b   :  { %3961 = dma.done.wait [#allocation4], 160  }
 0x79c   :  { %3962 = vsyncadd [#allocation4], 4294967136 }
 0x79d   :  { %3320 = vsyncpa [#allocation3], 1 }
 0x79e   :  { %3321 = vsyncpa [#allocation6], 1 }
 0x79f   :  { %3322 = vsyncpa [#allocation4], 1 }

</bundles_post_ra>
